<compile_context>
chip_gen: v7x
topology: tpu7x:2x2x1
jax: 0.10.0
libtpu: 0.0.40
codegen_flags: <defaults>
</compile_context>

<pallas_src>
import numpy as np

import jax
import jax.numpy as jnp
from jax import lax
from jax.experimental import pallas as pl
from jax.experimental.pallas import tpu as pltpu

_L1 = 892    # conv1 output span
_LP1 = 859   # pool1 output span
_L2 = 595    # conv2 output span
_LP2 = 529   # pool2 output span


# ----------------------------------------------------------------------------
# Fused kernel: one image per grid step.
# ----------------------------------------------------------------------------
def _lenet_kernel(x_ref, w1_ref, b1_ref, w2_ref, b2_ref, sel_ref,
                  wf1_ref, bf1_ref, wf2_ref, bf2_ref, wf3_ref, bf3_ref,
                  o_ref):
    x = x_ref[0]                                            # (3, 1024) one image

    # ---- conv1 (5x5, 3->6) + bias + ReLU: in-kernel im2col, single matmul ----
    p1 = jnp.concatenate(
        [x[:, 32 * i + j: 32 * i + j + _L1] for i in range(5) for j in range(5)],
        axis=0)                                             # (75, 892) rows = (i,j,c)
    a1 = jnp.dot(w1_ref[...], p1, preferred_element_type=jnp.float32)
    a1 = jnp.maximum(a1 + b1_ref[...], 0.0)                 # (6, 892)

    # ---- maxpool 2x2/2 (valid results at flat index 64*y + 2*x) ----
    v1 = jnp.maximum(jnp.maximum(a1[:, 0:_LP1], a1[:, 1:1 + _LP1]),
                     jnp.maximum(a1[:, 32:32 + _LP1], a1[:, 33:33 + _LP1]))  # (6, 859)

    # ---- conv2 (5x5, 6->16) + bias + ReLU ----
    p2 = jnp.concatenate(
        [v1[:, 64 * i + 2 * j: 64 * i + 2 * j + _L2]
         for i in range(5) for j in range(5)],
        axis=0)                                             # (150, 595)
    a2 = jnp.dot(w2_ref[...], p2, preferred_element_type=jnp.float32)
    a2 = jnp.maximum(a2 + b2_ref[...], 0.0)                 # (16, 595)

    # ---- maxpool 2x2/2 (valid results at flat index 128*y + 4*x) ----
    v2 = jnp.maximum(jnp.maximum(a2[:, 0:_LP2], a2[:, 2:2 + _LP2]),
                     jnp.maximum(a2[:, 64:64 + _LP2], a2[:, 66:66 + _LP2]))  # (16, 529)

    # ---- gather the 5x5 grid per channel (selection matmul), flatten (c,y,x) ----
    feat = jnp.dot(v2, sel_ref[...], preferred_element_type=jnp.float32)     # (16, 32)
    frow = jnp.concatenate([feat[c:c + 1, :] for c in range(16)], axis=1)    # (1, 512)

    # ---- fc1 -> fc2 -> fc3 (outputs padded to 128 lanes; pads are exact zeros) ----
    h = jnp.maximum(
        jnp.dot(frow, wf1_ref[...], preferred_element_type=jnp.float32) + bf1_ref[...],
        0.0)                                                 # (1, 128)
    h = jnp.maximum(
        jnp.dot(h, wf2_ref[...], preferred_element_type=jnp.float32) + bf2_ref[...],
        0.0)                                                 # (1, 128)
    o_ref[0] = (jnp.dot(h, wf3_ref[...], preferred_element_type=jnp.float32)
                + bf3_ref[...])                              # (1, 10)


def _resident(shape):
    """Whole-array VMEM block, same index every grid step (weights stay resident)."""
    nd = len(shape)
    return pl.BlockSpec(shape, lambda i, _nd=nd: (0,) * _nd)


@jax.jit
def forward(kparams, x):
    """x: (B, 3, 32, 32) float32 NCHW -> (B, 10) logits."""
    b = x.shape[0]
    x_flat = x.reshape(b, 3, 1024)
    out = pl.pallas_call(
        _lenet_kernel,
        out_shape=jax.ShapeDtypeStruct((b, 1, 10), jnp.float32),
        grid=(b,),
        in_specs=[
            pl.BlockSpec((1, 3, 1024), lambda i: (i, 0, 0)),   # one image per step
            _resident((6, 75)),      # conv1 weight  (o, (i*5+j)*3+c)
            _resident((6, 1)),       # conv1 bias
            _resident((16, 150)),    # conv2 weight
            _resident((16, 1)),      # conv2 bias
            _resident((_LP2, 32)),   # pool2 selection matrix
            _resident((512, 128)),   # fc1 weight (padded)
            _resident((1, 128)),     # fc1 bias   (padded)
            _resident((128, 128)),   # fc2 weight (padded)
            _resident((1, 128)),     # fc2 bias   (padded)
            _resident((128, 10)),    # fc3 weight (padded rows)
            _resident((1, 10)),      # fc3 bias
        ],
        out_specs=pl.BlockSpec((1, 1, 10), lambda i: (i, 0, 0)),
        compiler_params=pltpu.CompilerParams(dimension_semantics=("parallel",)),
    )(x_flat, kparams["w1"], kparams["b1"], kparams["w2"], kparams["b2"],
      kparams["sel"], kparams["wf1"], kparams["bf1"], kparams["wf2"],
      kparams["bf2"], kparams["wf3"], kparams["bf3"])
    return out.reshape(b, 10)


# ----------------------------------------------------------------------------
# Parameters: PyTorch-layout init + one-time conversion to kernel layout.
# ----------------------------------------------------------------------------
def init_params(key):
    """Parameters in PyTorch nn.Module layout (deterministic uniform init)."""
    ks = jax.random.split(key, 10)

    def u(k, shape, fan_in):
        bound = 1.0 / float(np.sqrt(fan_in))
        return jax.random.uniform(k, shape, jnp.float32, -bound, bound)

    return {
        "conv1_w": u(ks[0], (6, 3, 5, 5), 3 * 25),
        "conv1_b": u(ks[1], (6,), 3 * 25),
        "conv2_w": u(ks[2], (16, 6, 5, 5), 6 * 25),
        "conv2_b": u(ks[3], (16,), 6 * 25),
        "fc1_w": u(ks[4], (120, 400), 400),
        "fc1_b": u(ks[5], (120,), 400),
        "fc2_w": u(ks[6], (84, 120), 120),
        "fc2_b": u(ks[7], (84,), 120),
        "fc3_w": u(ks[8], (10, 84), 84),
        "fc3_b": u(ks[9], (10,), 84),
    }


def prepare_params(p):
    """One-time conversion of PyTorch-layout params to kernel layout (pre-
    transposed, zero-padded).  Called once at init, not per forward."""
    kp = {}
    # conv weights: (Cout, Cin, KH, KW) -> (Cout, KH*KW*Cin), col = (i*5+j)*3 + c
    kp["w1"] = jnp.transpose(p["conv1_w"], (0, 2, 3, 1)).reshape(6, 75)
    kp["b1"] = p["conv1_b"].reshape(6, 1)
    kp["w2"] = jnp.transpose(p["conv2_w"], (0, 2, 3, 1)).reshape(16, 150)
    kp["b2"] = p["conv2_b"].reshape(16, 1)

    # pool2 outputs live at flat index 128*y + 4*x (y, x in [0,5)); sel compacts
    # them into columns s = 5*y + x of a (16, 32) tile (cols 25..31 stay zero).
    sel = np.zeros((_LP2, 32), np.float32)
    for y in range(5):
        for xx in range(5):
            sel[128 * y + 4 * xx, 5 * y + xx] = 1.0
    kp["sel"] = jnp.asarray(sel)

    # fc1: torch feature index f = c*25 + 5*y + x ; kernel lane index = c*32 + s.
    wf1 = np.zeros((16, 32, 128), np.float32)
    wf1[:, :25, :120] = np.asarray(p["fc1_w"], np.float32).reshape(
        120, 16, 25).transpose(1, 2, 0)
    kp["wf1"] = jnp.asarray(wf1.reshape(512, 128))
    bf1 = np.zeros((1, 128), np.float32)
    bf1[0, :120] = np.asarray(p["fc1_b"], np.float32)
    kp["bf1"] = jnp.asarray(bf1)

    wf2 = np.zeros((128, 128), np.float32)
    wf2[:120, :84] = np.asarray(p["fc2_w"], np.float32).T
    kp["wf2"] = jnp.asarray(wf2)
    bf2 = np.zeros((1, 128), np.float32)
    bf2[0, :84] = np.asarray(p["fc2_b"], np.float32)
    kp["bf2"] = jnp.asarray(bf2)

    wf3 = np.zeros((128, 10), np.float32)
    wf3[:84, :] = np.asarray(p["fc3_w"], np.float32).T
    kp["wf3"] = jnp.asarray(wf3)
    kp["bf3"] = p["fc3_b"].reshape(1, 10)
    return kp


# ----------------------------------------------------------------------------
# Pure-JAX reference (mirrors the PyTorch Model.forward) for a numerical check.
# ----------------------------------------------------------------------------
def reference_forward(p, x):
    dn = ("NCHW", "OIHW", "NCHW")
    y = lax.conv_general_dilated(x, p["conv1_w"], (1, 1), "VALID",
                                 dimension_numbers=dn)
    y = jnp.maximum(y + p["conv1_b"].reshape(1, 6, 1, 1), 0.0)
    y = lax.reduce_window(y, -jnp.inf, lax.max, (1, 1, 2, 2), (1, 1, 2, 2), "VALID")
    y = lax.conv_general_dilated(y, p["conv2_w"], (1, 1), "VALID",
                                 dimension_numbers=dn)
    y = jnp.maximum(y + p["conv2_b"].reshape(1, 16, 1, 1), 0.0)
    y = lax.reduce_window(y, -jnp.inf, lax.max, (1, 1, 2, 2), (1, 1, 2, 2), "VALID")
    y = y.reshape(y.shape[0], 400)                       # same order as torch .view
    y = jnp.maximum(y @ p["fc1_w"].T + p["fc1_b"], 0.0)
    y = jnp.maximum(y @ p["fc2_w"].T + p["fc2_b"], 0.0)
    return y @ p["fc3_w"].T + p["fc3_b"]


if __name__ == "__main__":
    key = jax.random.PRNGKey(0)
    k_param, k_input = jax.random.split(key)
    params = init_params(k_param)
    kparams = prepare_params(params)

    # CIFAR-10 sized input (the 16*5*5 flatten requires 32x32 spatial), small batch.
    x = jax.random.normal(k_input, (4, 3, 32, 32), dtype=jnp.float32)

    out = jax.block_until_ready(forward(kparams, x))
    assert out.shape == (4, 10) and out.dtype == jnp.float32

    ref = jax.block_until_ready(reference_forward(params, x))
    max_err = float(jnp.max(jnp.abs(out - ref)))
    assert jnp.allclose(out, ref, atol=2e-2, rtol=2e-2), max_err

    print("KERNEL_OK")
</pallas_src>

<mosaic_0001>
module attributes {stable_mosaic.version = 11 : i64} {
  func.func @_lenet_kernel(%arg0: i32, %arg1: memref<1x3x1024xf32, #tpu.memory_space<vmem>>, %arg2: memref<6x75xf32, #tpu.memory_space<vmem>>, %arg3: memref<6x1xf32, #tpu.memory_space<vmem>>, %arg4: memref<16x150xf32, #tpu.memory_space<vmem>>, %arg5: memref<16x1xf32, #tpu.memory_space<vmem>>, %arg6: memref<529x32xf32, #tpu.memory_space<vmem>>, %arg7: memref<512x128xf32, #tpu.memory_space<vmem>>, %arg8: memref<1x128xf32, #tpu.memory_space<vmem>>, %arg9: memref<128x128xf32, #tpu.memory_space<vmem>>, %arg10: memref<1x128xf32, #tpu.memory_space<vmem>>, %arg11: memref<128x10xf32, #tpu.memory_space<vmem>>, %arg12: memref<1x10xf32, #tpu.memory_space<vmem>>, %arg13: memref<1x1x10xf32, #tpu.memory_space<vmem>>) attributes {dimension_semantics = [#tpu.dimension_semantics<parallel>], iteration_bounds = array<i64: 4>, scalar_prefetch = 0 : i64, scratch_operands = 0 : i64, tpu.core_type = #tpu.core_type<tc>, window_params = [{transform_indices = @transform_0, window_bounds = array<i64: 1, 3, 1024>}, {pipeline_mode = #tpu.pipeline_mode<synchronous>, transform_indices = @transform_1, window_bounds = array<i64: 6, 75>}, {pipeline_mode = #tpu.pipeline_mode<synchronous>, transform_indices = @transform_2, window_bounds = array<i64: 6, 1>}, {pipeline_mode = #tpu.pipeline_mode<synchronous>, transform_indices = @transform_3, window_bounds = array<i64: 16, 150>}, {pipeline_mode = #tpu.pipeline_mode<synchronous>, transform_indices = @transform_4, window_bounds = array<i64: 16, 1>}, {pipeline_mode = #tpu.pipeline_mode<synchronous>, transform_indices = @transform_5, window_bounds = array<i64: 529, 32>}, {pipeline_mode = #tpu.pipeline_mode<synchronous>, transform_indices = @transform_6, window_bounds = array<i64: 512, 128>}, {pipeline_mode = #tpu.pipeline_mode<synchronous>, transform_indices = @transform_7, window_bounds = array<i64: 1, 128>}, {pipeline_mode = #tpu.pipeline_mode<synchronous>, transform_indices = @transform_8, window_bounds = array<i64: 128, 128>}, {pipeline_mode = #tpu.pipeline_mode<synchronous>, transform_indices = @transform_9, window_bounds = array<i64: 1, 128>}, {pipeline_mode = #tpu.pipeline_mode<synchronous>, transform_indices = @transform_10, window_bounds = array<i64: 128, 10>}, {pipeline_mode = #tpu.pipeline_mode<synchronous>, transform_indices = @transform_11, window_bounds = array<i64: 1, 10>}, {transform_indices = @transform_12, window_bounds = array<i64: 1, 1, 10>}]} {
    %c0 = arith.constant 0 : index
    %c0_0 = arith.constant 0 : index
    %c0_1 = arith.constant 0 : index
    %0 = vector.load %arg1[%c0, %c0_0, %c0_1] : memref<1x3x1024xf32, #tpu.memory_space<vmem>>, vector<1x3x1024xf32>
    %1 = vector.shape_cast %0 : vector<1x3x1024xf32> to vector<3x1024xf32>
    %2 = vector.extract_strided_slice %1 {offsets = [0, 0], sizes = [3, 892], strides = [1, 1]} : vector<3x1024xf32> to vector<3x892xf32>
    %3 = vector.extract_strided_slice %1 {offsets = [0, 1], sizes = [3, 892], strides = [1, 1]} : vector<3x1024xf32> to vector<3x892xf32>
    %4 = vector.extract_strided_slice %1 {offsets = [0, 2], sizes = [3, 892], strides = [1, 1]} : vector<3x1024xf32> to vector<3x892xf32>
    %5 = vector.extract_strided_slice %1 {offsets = [0, 3], sizes = [3, 892], strides = [1, 1]} : vector<3x1024xf32> to vector<3x892xf32>
    %6 = vector.extract_strided_slice %1 {offsets = [0, 4], sizes = [3, 892], strides = [1, 1]} : vector<3x1024xf32> to vector<3x892xf32>
    %7 = vector.extract_strided_slice %1 {offsets = [0, 32], sizes = [3, 892], strides = [1, 1]} : vector<3x1024xf32> to vector<3x892xf32>
    %8 = vector.extract_strided_slice %1 {offsets = [0, 33], sizes = [3, 892], strides = [1, 1]} : vector<3x1024xf32> to vector<3x892xf32>
    %9 = vector.extract_strided_slice %1 {offsets = [0, 34], sizes = [3, 892], strides = [1, 1]} : vector<3x1024xf32> to vector<3x892xf32>
    %10 = vector.extract_strided_slice %1 {offsets = [0, 35], sizes = [3, 892], strides = [1, 1]} : vector<3x1024xf32> to vector<3x892xf32>
    %11 = vector.extract_strided_slice %1 {offsets = [0, 36], sizes = [3, 892], strides = [1, 1]} : vector<3x1024xf32> to vector<3x892xf32>
    %12 = vector.extract_strided_slice %1 {offsets = [0, 64], sizes = [3, 892], strides = [1, 1]} : vector<3x1024xf32> to vector<3x892xf32>
    %13 = vector.extract_strided_slice %1 {offsets = [0, 65], sizes = [3, 892], strides = [1, 1]} : vector<3x1024xf32> to vector<3x892xf32>
    %14 = vector.extract_strided_slice %1 {offsets = [0, 66], sizes = [3, 892], strides = [1, 1]} : vector<3x1024xf32> to vector<3x892xf32>
    %15 = vector.extract_strided_slice %1 {offsets = [0, 67], sizes = [3, 892], strides = [1, 1]} : vector<3x1024xf32> to vector<3x892xf32>
    %16 = vector.extract_strided_slice %1 {offsets = [0, 68], sizes = [3, 892], strides = [1, 1]} : vector<3x1024xf32> to vector<3x892xf32>
    %17 = vector.extract_strided_slice %1 {offsets = [0, 96], sizes = [3, 892], strides = [1, 1]} : vector<3x1024xf32> to vector<3x892xf32>
    %18 = vector.extract_strided_slice %1 {offsets = [0, 97], sizes = [3, 892], strides = [1, 1]} : vector<3x1024xf32> to vector<3x892xf32>
    %19 = vector.extract_strided_slice %1 {offsets = [0, 98], sizes = [3, 892], strides = [1, 1]} : vector<3x1024xf32> to vector<3x892xf32>
    %20 = vector.extract_strided_slice %1 {offsets = [0, 99], sizes = [3, 892], strides = [1, 1]} : vector<3x1024xf32> to vector<3x892xf32>
    %21 = vector.extract_strided_slice %1 {offsets = [0, 100], sizes = [3, 892], strides = [1, 1]} : vector<3x1024xf32> to vector<3x892xf32>
    %22 = vector.extract_strided_slice %1 {offsets = [0, 128], sizes = [3, 892], strides = [1, 1]} : vector<3x1024xf32> to vector<3x892xf32>
    %23 = vector.extract_strided_slice %1 {offsets = [0, 129], sizes = [3, 892], strides = [1, 1]} : vector<3x1024xf32> to vector<3x892xf32>
    %24 = vector.extract_strided_slice %1 {offsets = [0, 130], sizes = [3, 892], strides = [1, 1]} : vector<3x1024xf32> to vector<3x892xf32>
    %25 = vector.extract_strided_slice %1 {offsets = [0, 131], sizes = [3, 892], strides = [1, 1]} : vector<3x1024xf32> to vector<3x892xf32>
    %26 = vector.extract_strided_slice %1 {offsets = [0, 132], sizes = [3, 892], strides = [1, 1]} : vector<3x1024xf32> to vector<3x892xf32>
    %27 = tpu.concatenate %2, %3, %4, %5, %6, %7, %8, %9, %10, %11, %12, %13, %14, %15, %16, %17 in 0 : vector<3x892xf32>, vector<3x892xf32>, vector<3x892xf32>, vector<3x892xf32>, vector<3x892xf32>, vector<3x892xf32>, vector<3x892xf32>, vector<3x892xf32>, vector<3x892xf32>, vector<3x892xf32>, vector<3x892xf32>, vector<3x892xf32>, vector<3x892xf32>, vector<3x892xf32>, vector<3x892xf32>, vector<3x892xf32> -> vector<48x892xf32>
    %28 = tpu.concatenate %18, %19, %20, %21, %22, %23, %24, %25, %26 in 0 : vector<3x892xf32>, vector<3x892xf32>, vector<3x892xf32>, vector<3x892xf32>, vector<3x892xf32>, vector<3x892xf32>, vector<3x892xf32>, vector<3x892xf32>, vector<3x892xf32> -> vector<27x892xf32>
    %29 = tpu.concatenate %27, %28 in 0 : vector<48x892xf32>, vector<27x892xf32> -> vector<75x892xf32>
    %c0_2 = arith.constant 0 : index
    %c0_3 = arith.constant 0 : index
    %30 = vector.load %arg2[%c0_2, %c0_3] : memref<6x75xf32, #tpu.memory_space<vmem>>, vector<6x75xf32>
    %cst = arith.constant dense<0.000000e+00> : vector<6x892xf32>
    %31 = tpu.matmul %30, %29, %cst {dimension_numbers = #tpu.dot_dimension_numbers<[1], [0], [0], [1], [0, 0, 1, 1], [], []>} : vector<6x75xf32>, vector<75x892xf32>, vector<6x892xf32> -> vector<6x892xf32>
    %c0_4 = arith.constant 0 : index
    %c0_5 = arith.constant 0 : index
    %32 = vector.load %arg3[%c0_4, %c0_5] : memref<6x1xf32, #tpu.memory_space<vmem>>, vector<6x1xf32>
    %33 = vector.broadcast %32 : vector<6x1xf32> to vector<6x892xf32>
    %34 = arith.addf %31, %33 : vector<6x892xf32>
    %cst_6 = arith.constant 0.000000e+00 : f32
    %35 = vector.broadcast %cst_6 : f32 to vector<6x892xf32>
    %36 = arith.maximumf %34, %35 : vector<6x892xf32>
    %37 = vector.extract_strided_slice %36 {offsets = [0, 0], sizes = [6, 859], strides = [1, 1]} : vector<6x892xf32> to vector<6x859xf32>
    %38 = vector.extract_strided_slice %36 {offsets = [0, 1], sizes = [6, 859], strides = [1, 1]} : vector<6x892xf32> to vector<6x859xf32>
    %39 = arith.maximumf %37, %38 : vector<6x859xf32>
    %40 = vector.extract_strided_slice %36 {offsets = [0, 32], sizes = [6, 859], strides = [1, 1]} : vector<6x892xf32> to vector<6x859xf32>
    %41 = vector.extract_strided_slice %36 {offsets = [0, 33], sizes = [6, 859], strides = [1, 1]} : vector<6x892xf32> to vector<6x859xf32>
    %42 = arith.maximumf %40, %41 : vector<6x859xf32>
    %43 = arith.maximumf %39, %42 : vector<6x859xf32>
    %44 = vector.extract_strided_slice %43 {offsets = [0, 0], sizes = [6, 595], strides = [1, 1]} : vector<6x859xf32> to vector<6x595xf32>
    %45 = vector.extract_strided_slice %43 {offsets = [0, 2], sizes = [6, 595], strides = [1, 1]} : vector<6x859xf32> to vector<6x595xf32>
    %46 = vector.extract_strided_slice %43 {offsets = [0, 4], sizes = [6, 595], strides = [1, 1]} : vector<6x859xf32> to vector<6x595xf32>
    %47 = vector.extract_strided_slice %43 {offsets = [0, 6], sizes = [6, 595], strides = [1, 1]} : vector<6x859xf32> to vector<6x595xf32>
    %48 = vector.extract_strided_slice %43 {offsets = [0, 8], sizes = [6, 595], strides = [1, 1]} : vector<6x859xf32> to vector<6x595xf32>
    %49 = vector.extract_strided_slice %43 {offsets = [0, 64], sizes = [6, 595], strides = [1, 1]} : vector<6x859xf32> to vector<6x595xf32>
    %50 = vector.extract_strided_slice %43 {offsets = [0, 66], sizes = [6, 595], strides = [1, 1]} : vector<6x859xf32> to vector<6x595xf32>
    %51 = vector.extract_strided_slice %43 {offsets = [0, 68], sizes = [6, 595], strides = [1, 1]} : vector<6x859xf32> to vector<6x595xf32>
    %52 = vector.extract_strided_slice %43 {offsets = [0, 70], sizes = [6, 595], strides = [1, 1]} : vector<6x859xf32> to vector<6x595xf32>
    %53 = vector.extract_strided_slice %43 {offsets = [0, 72], sizes = [6, 595], strides = [1, 1]} : vector<6x859xf32> to vector<6x595xf32>
    %54 = vector.extract_strided_slice %43 {offsets = [0, 128], sizes = [6, 595], strides = [1, 1]} : vector<6x859xf32> to vector<6x595xf32>
    %55 = vector.extract_strided_slice %43 {offsets = [0, 130], sizes = [6, 595], strides = [1, 1]} : vector<6x859xf32> to vector<6x595xf32>
    %56 = vector.extract_strided_slice %43 {offsets = [0, 132], sizes = [6, 595], strides = [1, 1]} : vector<6x859xf32> to vector<6x595xf32>
    %57 = vector.extract_strided_slice %43 {offsets = [0, 134], sizes = [6, 595], strides = [1, 1]} : vector<6x859xf32> to vector<6x595xf32>
    %58 = vector.extract_strided_slice %43 {offsets = [0, 136], sizes = [6, 595], strides = [1, 1]} : vector<6x859xf32> to vector<6x595xf32>
    %59 = vector.extract_strided_slice %43 {offsets = [0, 192], sizes = [6, 595], strides = [1, 1]} : vector<6x859xf32> to vector<6x595xf32>
    %60 = vector.extract_strided_slice %43 {offsets = [0, 194], sizes = [6, 595], strides = [1, 1]} : vector<6x859xf32> to vector<6x595xf32>
    %61 = vector.extract_strided_slice %43 {offsets = [0, 196], sizes = [6, 595], strides = [1, 1]} : vector<6x859xf32> to vector<6x595xf32>
    %62 = vector.extract_strided_slice %43 {offsets = [0, 198], sizes = [6, 595], strides = [1, 1]} : vector<6x859xf32> to vector<6x595xf32>
    %63 = vector.extract_strided_slice %43 {offsets = [0, 200], sizes = [6, 595], strides = [1, 1]} : vector<6x859xf32> to vector<6x595xf32>
    %64 = vector.extract_strided_slice %43 {offsets = [0, 256], sizes = [6, 595], strides = [1, 1]} : vector<6x859xf32> to vector<6x595xf32>
    %65 = vector.extract_strided_slice %43 {offsets = [0, 258], sizes = [6, 595], strides = [1, 1]} : vector<6x859xf32> to vector<6x595xf32>
    %66 = vector.extract_strided_slice %43 {offsets = [0, 260], sizes = [6, 595], strides = [1, 1]} : vector<6x859xf32> to vector<6x595xf32>
    %67 = vector.extract_strided_slice %43 {offsets = [0, 262], sizes = [6, 595], strides = [1, 1]} : vector<6x859xf32> to vector<6x595xf32>
    %68 = vector.extract_strided_slice %43 {offsets = [0, 264], sizes = [6, 595], strides = [1, 1]} : vector<6x859xf32> to vector<6x595xf32>
    %69 = tpu.concatenate %44, %45, %46, %47, %48, %49, %50, %51, %52, %53, %54, %55, %56, %57, %58, %59 in 0 : vector<6x595xf32>, vector<6x595xf32>, vector<6x595xf32>, vector<6x595xf32>, vector<6x595xf32>, vector<6x595xf32>, vector<6x595xf32>, vector<6x595xf32>, vector<6x595xf32>, vector<6x595xf32>, vector<6x595xf32>, vector<6x595xf32>, vector<6x595xf32>, vector<6x595xf32>, vector<6x595xf32>, vector<6x595xf32> -> vector<96x595xf32>
    %70 = tpu.concatenate %60, %61, %62, %63, %64, %65, %66, %67, %68 in 0 : vector<6x595xf32>, vector<6x595xf32>, vector<6x595xf32>, vector<6x595xf32>, vector<6x595xf32>, vector<6x595xf32>, vector<6x595xf32>, vector<6x595xf32>, vector<6x595xf32> -> vector<54x595xf32>
    %71 = tpu.concatenate %69, %70 in 0 : vector<96x595xf32>, vector<54x595xf32> -> vector<150x595xf32>
    %c0_7 = arith.constant 0 : index
    %c0_8 = arith.constant 0 : index
    %72 = vector.load %arg4[%c0_7, %c0_8] : memref<16x150xf32, #tpu.memory_space<vmem>>, vector<16x150xf32>
    %cst_9 = arith.constant dense<0.000000e+00> : vector<16x595xf32>
    %73 = tpu.matmul %72, %71, %cst_9 {dimension_numbers = #tpu.dot_dimension_numbers<[1], [0], [0], [1], [0, 0, 1, 1], [], []>} : vector<16x150xf32>, vector<150x595xf32>, vector<16x595xf32> -> vector<16x595xf32>
    %c0_10 = arith.constant 0 : index
    %c0_11 = arith.constant 0 : index
    %74 = vector.load %arg5[%c0_10, %c0_11] : memref<16x1xf32, #tpu.memory_space<vmem>>, vector<16x1xf32>
    %75 = vector.broadcast %74 : vector<16x1xf32> to vector<16x595xf32>
    %76 = arith.addf %73, %75 : vector<16x595xf32>
    %cst_12 = arith.constant 0.000000e+00 : f32
    %77 = vector.broadcast %cst_12 : f32 to vector<16x595xf32>
    %78 = arith.maximumf %76, %77 : vector<16x595xf32>
    %79 = vector.extract_strided_slice %78 {offsets = [0, 0], sizes = [16, 529], strides = [1, 1]} : vector<16x595xf32> to vector<16x529xf32>
    %80 = vector.extract_strided_slice %78 {offsets = [0, 2], sizes = [16, 529], strides = [1, 1]} : vector<16x595xf32> to vector<16x529xf32>
    %81 = arith.maximumf %79, %80 : vector<16x529xf32>
    %82 = vector.extract_strided_slice %78 {offsets = [0, 64], sizes = [16, 529], strides = [1, 1]} : vector<16x595xf32> to vector<16x529xf32>
    %83 = vector.extract_strided_slice %78 {offsets = [0, 66], sizes = [16, 529], strides = [1, 1]} : vector<16x595xf32> to vector<16x529xf32>
    %84 = arith.maximumf %82, %83 : vector<16x529xf32>
    %85 = arith.maximumf %81, %84 : vector<16x529xf32>
    %c0_13 = arith.constant 0 : index
    %c0_14 = arith.constant 0 : index
    %86 = vector.load %arg6[%c0_13, %c0_14] : memref<529x32xf32, #tpu.memory_space<vmem>>, vector<529x32xf32>
    %cst_15 = arith.constant dense<0.000000e+00> : vector<16x32xf32>
    %87 = tpu.matmul %85, %86, %cst_15 {dimension_numbers = #tpu.dot_dimension_numbers<[1], [0], [0], [1], [0, 0, 1, 1], [], []>} : vector<16x529xf32>, vector<529x32xf32>, vector<16x32xf32> -> vector<16x32xf32>
    %88 = vector.extract_strided_slice %87 {offsets = [0, 0], sizes = [1, 32], strides = [1, 1]} : vector<16x32xf32> to vector<1x32xf32>
    %89 = vector.extract_strided_slice %87 {offsets = [1, 0], sizes = [1, 32], strides = [1, 1]} : vector<16x32xf32> to vector<1x32xf32>
    %90 = vector.extract_strided_slice %87 {offsets = [2, 0], sizes = [1, 32], strides = [1, 1]} : vector<16x32xf32> to vector<1x32xf32>
    %91 = vector.extract_strided_slice %87 {offsets = [3, 0], sizes = [1, 32], strides = [1, 1]} : vector<16x32xf32> to vector<1x32xf32>
    %92 = vector.extract_strided_slice %87 {offsets = [4, 0], sizes = [1, 32], strides = [1, 1]} : vector<16x32xf32> to vector<1x32xf32>
    %93 = vector.extract_strided_slice %87 {offsets = [5, 0], sizes = [1, 32], strides = [1, 1]} : vector<16x32xf32> to vector<1x32xf32>
    %94 = vector.extract_strided_slice %87 {offsets = [6, 0], sizes = [1, 32], strides = [1, 1]} : vector<16x32xf32> to vector<1x32xf32>
    %95 = vector.extract_strided_slice %87 {offsets = [7, 0], sizes = [1, 32], strides = [1, 1]} : vector<16x32xf32> to vector<1x32xf32>
    %96 = vector.extract_strided_slice %87 {offsets = [8, 0], sizes = [1, 32], strides = [1, 1]} : vector<16x32xf32> to vector<1x32xf32>
    %97 = vector.extract_strided_slice %87 {offsets = [9, 0], sizes = [1, 32], strides = [1, 1]} : vector<16x32xf32> to vector<1x32xf32>
    %98 = vector.extract_strided_slice %87 {offsets = [10, 0], sizes = [1, 32], strides = [1, 1]} : vector<16x32xf32> to vector<1x32xf32>
    %99 = vector.extract_strided_slice %87 {offsets = [11, 0], sizes = [1, 32], strides = [1, 1]} : vector<16x32xf32> to vector<1x32xf32>
    %100 = vector.extract_strided_slice %87 {offsets = [12, 0], sizes = [1, 32], strides = [1, 1]} : vector<16x32xf32> to vector<1x32xf32>
    %101 = vector.extract_strided_slice %87 {offsets = [13, 0], sizes = [1, 32], strides = [1, 1]} : vector<16x32xf32> to vector<1x32xf32>
    %102 = vector.extract_strided_slice %87 {offsets = [14, 0], sizes = [1, 32], strides = [1, 1]} : vector<16x32xf32> to vector<1x32xf32>
    %103 = vector.extract_strided_slice %87 {offsets = [15, 0], sizes = [1, 32], strides = [1, 1]} : vector<16x32xf32> to vector<1x32xf32>
    %104 = tpu.concatenate %88, %89, %90, %91, %92, %93, %94, %95, %96, %97, %98, %99, %100, %101, %102, %103 in 1 : vector<1x32xf32>, vector<1x32xf32>, vector<1x32xf32>, vector<1x32xf32>, vector<1x32xf32>, vector<1x32xf32>, vector<1x32xf32>, vector<1x32xf32>, vector<1x32xf32>, vector<1x32xf32>, vector<1x32xf32>, vector<1x32xf32>, vector<1x32xf32>, vector<1x32xf32>, vector<1x32xf32>, vector<1x32xf32> -> vector<1x512xf32>
    %c0_16 = arith.constant 0 : index
    %c0_17 = arith.constant 0 : index
    %105 = vector.load %arg7[%c0_16, %c0_17] : memref<512x128xf32, #tpu.memory_space<vmem>>, vector<512x128xf32>
    %cst_18 = arith.constant dense<0.000000e+00> : vector<1x128xf32>
    %106 = tpu.matmul %104, %105, %cst_18 {dimension_numbers = #tpu.dot_dimension_numbers<[1], [0], [0], [1], [0, 0, 1, 1], [], []>} : vector<1x512xf32>, vector<512x128xf32>, vector<1x128xf32> -> vector<1x128xf32>
    %c0_19 = arith.constant 0 : index
    %c0_20 = arith.constant 0 : index
    %107 = vector.load %arg8[%c0_19, %c0_20] : memref<1x128xf32, #tpu.memory_space<vmem>>, vector<1x128xf32>
    %108 = arith.addf %106, %107 : vector<1x128xf32>
    %cst_21 = arith.constant 0.000000e+00 : f32
    %109 = vector.broadcast %cst_21 : f32 to vector<1x128xf32>
    %110 = arith.maximumf %108, %109 : vector<1x128xf32>
    %c0_22 = arith.constant 0 : index
    %c0_23 = arith.constant 0 : index
    %111 = vector.load %arg9[%c0_22, %c0_23] : memref<128x128xf32, #tpu.memory_space<vmem>>, vector<128x128xf32>
    %cst_24 = arith.constant dense<0.000000e+00> : vector<1x128xf32>
    %112 = tpu.matmul %110, %111, %cst_24 {dimension_numbers = #tpu.dot_dimension_numbers<[1], [0], [0], [1], [0, 0, 1, 1], [], []>} : vector<1x128xf32>, vector<128x128xf32>, vector<1x128xf32> -> vector<1x128xf32>
    %c0_25 = arith.constant 0 : index
    %c0_26 = arith.constant 0 : index
    %113 = vector.load %arg10[%c0_25, %c0_26] : memref<1x128xf32, #tpu.memory_space<vmem>>, vector<1x128xf32>
    %114 = arith.addf %112, %113 : vector<1x128xf32>
    %cst_27 = arith.constant 0.000000e+00 : f32
    %115 = vector.broadcast %cst_27 : f32 to vector<1x128xf32>
    %116 = arith.maximumf %114, %115 : vector<1x128xf32>
    %c0_28 = arith.constant 0 : index
    %c0_29 = arith.constant 0 : index
    %117 = vector.load %arg11[%c0_28, %c0_29] : memref<128x10xf32, #tpu.memory_space<vmem>>, vector<128x10xf32>
    %cst_30 = arith.constant dense<0.000000e+00> : vector<1x10xf32>
    %118 = tpu.matmul %116, %117, %cst_30 {dimension_numbers = #tpu.dot_dimension_numbers<[1], [0], [0], [1], [0, 0, 1, 1], [], []>} : vector<1x128xf32>, vector<128x10xf32>, vector<1x10xf32> -> vector<1x10xf32>
    %c0_31 = arith.constant 0 : index
    %c0_32 = arith.constant 0 : index
    %119 = vector.load %arg12[%c0_31, %c0_32] : memref<1x10xf32, #tpu.memory_space<vmem>>, vector<1x10xf32>
    %120 = arith.addf %118, %119 : vector<1x10xf32>
    %c0_33 = arith.constant 0 : index
    %c0_34 = arith.constant 0 : index
    %c0_35 = arith.constant 0 : index
    %121 = vector.load %arg13[%c0_33, %c0_34, %c0_35] : memref<1x1x10xf32, #tpu.memory_space<vmem>>, vector<1x1x10xf32>
    %122 = vector.shape_cast %121 : vector<1x1x10xf32> to vector<1x10xf32>
    %123 = vector.shape_cast %120 : vector<1x10xf32> to vector<1x1x10xf32>
    tpu.vector_store %arg13[%c0_33, %c0_34, %c0_35], %123 {strides = array<i32>} : memref<1x1x10xf32, #tpu.memory_space<vmem>>, vector<1x1x10xf32>,
    return
  }
  func.func @transform_0(%arg0: i32) -> (i32, i32, i32) {
    %c0_i32 = arith.constant 0 : i32
    %c0_i32_0 = arith.constant 0 : i32
    %c0_i32_1 = arith.constant 0 : i32
    return %arg0, %c0_i32, %c0_i32_0 : i32, i32, i32
  }
  func.func @transform_1(%arg0: i32) -> (i32, i32) {
    %c0_i32 = arith.constant 0 : i32
    %c0_i32_0 = arith.constant 0 : i32
    %c0_i32_1 = arith.constant 0 : i32
    return %c0_i32, %c0_i32_0 : i32, i32
  }
  func.func @transform_2(%arg0: i32) -> (i32, i32) {
    %c0_i32 = arith.constant 0 : i32
    %c0_i32_0 = arith.constant 0 : i32
    %c0_i32_1 = arith.constant 0 : i32
    return %c0_i32, %c0_i32_0 : i32, i32
  }
  func.func @transform_3(%arg0: i32) -> (i32, i32) {
    %c0_i32 = arith.constant 0 : i32
    %c0_i32_0 = arith.constant 0 : i32
    %c0_i32_1 = arith.constant 0 : i32
    return %c0_i32, %c0_i32_0 : i32, i32
  }
  func.func @transform_4(%arg0: i32) -> (i32, i32) {
    %c0_i32 = arith.constant 0 : i32
    %c0_i32_0 = arith.constant 0 : i32
    %c0_i32_1 = arith.constant 0 : i32
    return %c0_i32, %c0_i32_0 : i32, i32
  }
  func.func @transform_5(%arg0: i32) -> (i32, i32) {
    %c0_i32 = arith.constant 0 : i32
    %c0_i32_0 = arith.constant 0 : i32
    %c0_i32_1 = arith.constant 0 : i32
    return %c0_i32, %c0_i32_0 : i32, i32
  }
  func.func @transform_6(%arg0: i32) -> (i32, i32) {
    %c0_i32 = arith.constant 0 : i32
    %c0_i32_0 = arith.constant 0 : i32
    %c0_i32_1 = arith.constant 0 : i32
    return %c0_i32, %c0_i32_0 : i32, i32
  }
  func.func @transform_7(%arg0: i32) -> (i32, i32) {
    %c0_i32 = arith.constant 0 : i32
    %c0_i32_0 = arith.constant 0 : i32
    %c0_i32_1 = arith.constant 0 : i32
    return %c0_i32, %c0_i32_0 : i32, i32
  }
  func.func @transform_8(%arg0: i32) -> (i32, i32) {
    %c0_i32 = arith.constant 0 : i32
    %c0_i32_0 = arith.constant 0 : i32
    %c0_i32_1 = arith.constant 0 : i32
    return %c0_i32, %c0_i32_0 : i32, i32
  }
  func.func @transform_9(%arg0: i32) -> (i32, i32) {
    %c0_i32 = arith.constant 0 : i32
    %c0_i32_0 = arith.constant 0 : i32
    %c0_i32_1 = arith.constant 0 : i32
    return %c0_i32, %c0_i32_0 : i32, i32
  }
  func.func @transform_10(%arg0: i32) -> (i32, i32) {
    %c0_i32 = arith.constant 0 : i32
    %c0_i32_0 = arith.constant 0 : i32
    %c0_i32_1 = arith.constant 0 : i32
    return %c0_i32, %c0_i32_0 : i32, i32
  }
  func.func @transform_11(%arg0: i32) -> (i32, i32) {
    %c0_i32 = arith.constant 0 : i32
    %c0_i32_0 = arith.constant 0 : i32
    %c0_i32_1 = arith.constant 0 : i32
    return %c0_i32, %c0_i32_0 : i32, i32
  }
  func.func @transform_12(%arg0: i32) -> (i32, i32, i32) {
    %c0_i32 = arith.constant 0 : i32
    %c0_i32_0 = arith.constant 0 : i32
    %c0_i32_1 = arith.constant 0 : i32
    return %arg0, %c0_i32, %c0_i32_0 : i32, i32, i32
  }
}

</mosaic_0001>

<bundles_post_ra>
// kernel: forward.1
= control target key start
LH: loop header
LB: loop body
LE: loop exit
PB: predicated region body
PF: predicated region fallthrough
CT: control target
= control target key end

     0   :  { %s8085_s0 = inlined_call_operand.vmem [shape: f32[4,3,1024], index: 0, kind: input, shape index: {}]   ;;  %s8086_s1 = inlined_call_operand.vmem [shape: f32[6,75], index: 1, kind: input, shape index: {}]   ;;  %s8087_s2 = inlined_call_operand.vmem [shape: f32[6,1], index: 2, kind: input, shape index: {}]   ;;  %s8088_s3 = inlined_call_operand.vmem [shape: f32[16,150], index: 3, kind: input, shape index: {}]   ;;  %s8089_s4 = inlined_call_operand.vmem [shape: f32[16,1], index: 4, kind: input, shape index: {}]   ;;  %s8090_s5 = inlined_call_operand.vmem [shape: f32[529,32], index: 5, kind: input, shape index: {}]   ;;  %s8091_s6 = inlined_call_operand.vmem [shape: f32[512,128], index: 6, kind: input, shape index: {}]   ;;  %s8092_s7 = inlined_call_operand.vmem [shape: f32[1,128], index: 7, kind: input, shape index: {}]   ;;  %s8093_s8 = inlined_call_operand.vmem [shape: f32[128,128], index: 8, kind: input, shape index: {}]   ;;  %s8094_s9 = inlined_call_operand.vmem [shape: f32[1,128], index: 9, kind: input, shape index: {}]   ;;  %s8095_s10 = inlined_call_operand.vmem [shape: f32[128,10], index: 10, kind: input, shape index: {}]   ;;  %s8096_s11 = inlined_call_operand.vmem [shape: f32[1,10], index: 11, kind: input, shape index: {}]   ;;  %s8097_s12 = inlined_call_operand.hbm [shape: f32[4,1,10], index: 12, kind: output, shape index: {}]  }
   0x1   :  { %8152 = sst [smem:[#allocation15_spill]] %s8085_s0 }
   0x2   :  { %8153 = sst [smem:[#allocation16_spill]] %s8086_s1 }
   0x3   :  { %8154 = sst [smem:[#allocation17_spill]] %s8087_s2 }
   0x4   :  { %8155 = sst [smem:[#allocation18_spill]] %s8088_s3 }
   0x5   :  { %17 = vsyncpa [#allocation3], 0 }
   0x6   :  { %19 = vsyncpa [#allocation3 + $0x1], 0  ;;  %s5193_s21 = smov 0   ;;  %s5195_s22 = smov 0  }
   0x7   :  { %s5197_s23 = smov 0   ;;  %s5199_s24 = smov 0  }
   0x8 LB: > { %s5214_s25 = sadd.s32 4294967295, %s5098_s24   ;;  %s3511_s26 = sadd.s32 4294967294, %s5098_s24   ;;  %s5098_s24 = sphi %s5199_s24, %s8311_s24   ;;  %s5094_s23 = sphi %s5197_s23, %s8310_s23   ;;  %s5090_s22 = sphi %s5195_s22, %s8309_s22   ;;  %s5086_s21 = sphi %s5193_s21, %s8308_s21  }
   0x9   : > { %s5218_s27 = sadd.s32 1, %s5098_s24   ;;  %s289_s28 = sadd.s32 1, %s5094_s23 }
   0xa   : > { %s286_s29 = ssub.s32 %s5098_s24, %s5218_s27  ;;  %p299_p0 = scmp.ne.s32.totalorder %s5094_s23, %s5090_s22 }
   0xb   : > { %p287_p1 = scmp.eq.s32.totalorder %s286_s29, 0  ;;  %p300_p2 = scmp.eq.s32.totalorder %s5214_s25, 3 }
   0xc   : > { %p305_p3 = scmp.ne.s32.totalorder %s5090_s22, %s5086_s21  ;;  %p306_p4 = scmp.eq.s32.totalorder %s3511_s26, 3 }
   0xd   : > { %s5229_s30 = scalar_select %p287_p1, %s5094_s23, %s289_s28  }
   0xe   : > { %p5231_p5 = por %p300_p2, %p299_p0  ;;  %p5235_p6 = por %p306_p4, %p305_p3 }
   0xf   : > { %p3514_p7 = scmp.ge.s32.totalorder %s5098_s24, 1  ;;  %p365_p8 = scmp.lt.s32.totalorder %s5098_s24, 5 }
  0x11   : > { %p366_p9 = pnand %p3514_p7, %p365_p8 }
  0x13   : > { %369 = sbr.rel (%p366_p9) target bundleno = 2673 (0xa71), region = 68 }
  0x1a   : > { %p406_p10 = scmp.lt.s32.totalorder %s5214_s25, 3  ;;  %s8158_s0 = sld [smem:[#allocation15_spill]]  ;;  %vm516_vm0 = vcmask 1022976   ;;  %vm8119_vm1 = vcmask 1031168   ;;  %vm8121_vm2 = vcmask 1039360   ;;  %vm947_vm3 = vcmask 1040384  }
  0x1b   : > { %s5100_s20 = smov 125   ;;  %s8098_s26 = smov 126   ;;  %vm1066_vm4 = vcmask 793600   ;;  %vm955_vm5 = vcmask 1043456   ;;  %vm8120_vm6 = vcmask 785408   ;;  %vm931_vm7 = vcmask 1042432  }
  0x1c   : > { %s407_s15 = scalar_select %p406_p10, %s5214_s25, 3  ;;  %vm939_vm8 = vcmask 1045504   ;;  %vm963_vm9 = vcmask 1046528   ;;  %vm626_vm10 = vcmask 777216   ;;  %vm665_vm11 = vcmask 769024  }
  0x1d   : > { %s8109_s28 = smov 127   ;;  %s5103_s29 = smov 97   ;;  %vm8129_vm12 = vcmask 1041408   ;;  %vm696_vm13 = vcmask 760832   ;;  %vm8128_vm14 = vcmask 1044480   ;;  %vm548_vm15 = vcmask 1014784  }
  0x1e   : > { %s3545_s16 = sshll.u32 %s407_s15, 5  ;;  %s8100_s15 = smov 96  }
  0x1f   : > { %s5106_s17 = smov 94   ;;  %s5107_s18 = smov 93  }
  0x20   : > { %s5246_s19 = scalar_lea.vmem %s8158_s0, %s3545_s16  ;;  %s5105_s16 = smov 95  }
  0x21   : > { %v5249_v0 = vld [vmem:[%s5246_s19] sm:$0x77]  ;;  %v5252_v1 = vld [vmem:[%s5246_s19 + $0x8] sm:$0x77]  ;;  %v5271_v12 = vld [vmem:[%s5246_s19 + $0x10] sm:$0x77] }
  0x22   : > { %v5256_v2 = vcombine.high %v5249_v0, %v5249_v0  ;;  %v497_v3 = vrot.slane %v5252_v1, 7  ;;  %v462_v4 = vrot.slane %v5252_v1, 2  ;;  %v5262_v5 = vcombine.high %v5252_v1, %v5252_v1  ;;  %v5315_v36 = vld [vmem:[%s5246_s19 + $0x18] sm:$0x77]  ;;  %s5108_s19 = smov 124   ;;  %s8192_s2 = sld [smem:[#allocation17_spill]] }
  0x23   : > { %v495_v6 = vrot.slane %v5249_v0, 7  ;;  %v460_v7 = vrot.slane %v5249_v0, 2  ;;  %v425_v15 = vrot.slane %v5249_v0, 5  ;;  %v427_v17 = vrot.slane %v5252_v1, 5  ;;  %s8196_s1 = sld [smem:[#allocation16_spill]]  ;;  %s8263_s3 = sld [smem:[#allocation18_spill]] }
  0x24   : > { %v496_v8 = vrot.slane %v5256_v2, 7  ;;  %v461_v9 = vrot.slane %v5256_v2, 2  ;;  %v498_v10 = vrot.slane %v5262_v5, 7  ;;  %v463_v11 = vrot.slane %v5262_v5, 2 }
  0x25   : > { %v428_v16 = vrot.slane %v5262_v5, 5  ;;  %v426_v20 = vrot.slane %v5256_v2, 5  ;;  %v5287_v21 = vcombine.high %v5271_v12, %v5271_v12  ;;  %v499_v23 = vrot.slane %v5271_v12, 7 }
  0x26   : > { %v5273_v13 = vpack.i.bf16 %v497_v3, %v496_v8  ;;  %v5275_v14 = vpack.i.bf16 %v462_v4, %v461_v9  ;;  %v4286_v18 = vpack.i.bf16 %v495_v6, %v498_v10  ;;  %v4276_v19 = vpack.i.bf16 %v460_v7, %v463_v11 }
  0x27   : > { %v4296_v22 = vpack.i.bf16 %v425_v15, %v428_v16  ;;  %v5292_v24 = vpack.i.bf16 %v427_v17, %v426_v20  ;;  %v500_v25 = vrot.slane %v5287_v21, 7  ;;  %v464_v26 = vrot.slane %v5271_v12, 2 }
  0x28   : > { %4282 = vrot.lane.b32.xlu1 %v5273_v13, %s5100_s20  ;;  %4272 = vrot.lane.b32.xlu0 %v5275_v14, %s8098_s26  ;;  %v465_v27 = vrot.slane %v5287_v21, 2  ;;  %v5299_v28 = vcombine.low %v5271_v12, %v5271_v12  ;;  %v531_v31 = vcombine.low %v5252_v1, %v5252_v1  ;;  %v564_v32 = vrot.slane %v5256_v2, 1 }
  0x29   : > { %v5304_v29 = vpack.i.bf16 %v500_v25, %v499_v23  ;;  %v565_v33 = vrot.slane %v5252_v1, 1  ;;  %v429_v34 = vrot.slane %v5271_v12, 5  ;;  %v430_v35 = vrot.slane %v5287_v21, 5 }
  0x2a   : > { %v5306_v30 = vpack.i.bf16 %v465_v27, %v464_v26  ;;  %v4316_v37 = vpack.i.bf16 %v5299_v28, %v5252_v1  ;;  %v5324_v38 = vpack.i.bf16 %v531_v31, %v5249_v0  ;;  %v5332_v41 = vcombine.low %v5315_v36, %v5315_v36 }
  0x2b   : > { %v5326_v39 = vpack.i.bf16 %v565_v33, %v564_v32  ;;  %v5328_v40 = vpack.i.bf16 %v430_v35, %v429_v34  ;;  %v566_v42 = vrot.slane %v5262_v5, 1  ;;  %v567_v43 = vrot.slane %v5271_v12, 1 }
  0x2c   : > { %4287 = vrot.lane.b32.xlu1 %v4286_v18, %s5100_s20  ;;  %4277 = vrot.lane.b32.xlu0 %v4276_v19, %s8098_s26  ;;  %v603_v44 = vrot.slane %v5256_v2, 6  ;;  %v604_v45 = vrot.slane %v5252_v1, 6  ;;  %v568_v46 = vrot.slane %v5287_v21, 1  ;;  %v607_v47 = vrot.slane %v5287_v21, 6 }
  0x2d   : > { %v606_v48 = vrot.slane %v5271_v12, 6  ;;  %v645_v49 = vrot.slane %v5271_v12, 3  ;;  %v642_v50 = vrot.slane %v5256_v2, 3  ;;  %v5346_v51 = vpack.i.bf16 %v428_v16, %v425_v15 }
  0x2e   : > { %v5348_v52 = vpack.i.bf16 %v463_v11, %v460_v7  ;;  %v5350_v53 = vpack.i.bf16 %v498_v10, %v495_v6  ;;  %v643_v54 = vrot.slane %v5252_v1, 3  ;;  %v646_v55 = vrot.slane %v5287_v21, 3 }
  0x2f   : > { %v5354_v56 = vpack.i.bf16 %v604_v45, %v603_v44  ;;  %v4336_v57 = vpack.i.bf16 %v5332_v41, %v5271_v12  ;;  %v4331_v58 = vpack.i.bf16 %v567_v43, %v566_v42  ;;  %v569_v59 = vrot.slane %v5315_v36, 1 }
  0x30   : > { %4297 = vrot.lane.b32.xlu1 %v4296_v22, %s8109_s28  ;;  %4292 = vrot.lane.b32.xlu0 %v5292_v24, %s8109_s28  ;;  %v5365_v60 = vpack.i.bf16 %v568_v46, %v567_v43  ;;  %v5367_v61 = vpack.i.bf16 %v643_v54, %v642_v50  ;;  %v5369_v62 = vpack.i.bf16 %v607_v47, %v606_v48  ;;  %v608_v4 = vrot.slane %v5315_v36, 6 }
  0x31   : > { %v5371_v63 = vpack.i.bf16 %v646_v55, %v645_v49  ;;  %v4341_v3 = vpack.i.bf16 %v569_v59, %v568_v46  ;;  %v605_v6 = vrot.slane %v5262_v5, 6  ;;  %v644_v9 = vrot.slane %v5262_v5, 3 }
  0x32   : > { %v4356_v7 = vpack.i.bf16 %v608_v4, %v607_v47  ;;  %v647_v11 = vrot.slane %v5315_v36, 3  ;;  %v4376_v15 = vpack.i.bf16 %v5252_v1, %v5256_v2  ;;  %v5399_v17 = vcombine.high %v5315_v36, %v5315_v36 }
  0x33   : > { %v4351_v8 = vpack.i.bf16 %v606_v48, %v605_v6  ;;  %v4366_v10 = vpack.i.bf16 %v645_v49, %v644_v9  ;;  %v4386_v18 = vpack.i.bf16 %v5315_v36, %v5287_v21  ;;  %v4381_v19 = vpack.i.bf16 %v5271_v12, %v5262_v5 }
  0x34   : > { %4307 = vrot.lane.b32.xlu1 %v5304_v29, %s5100_s20  ;;  %4302 = vrot.lane.b32.xlu0 %v5306_v30, %s8098_s26  ;;  %v4371_v16 = vpack.i.bf16 %v647_v11, %v646_v55  ;;  %v501_v20 = vrot.slane %v5315_v36, 7  ;;  %v775_v22 = vrot.slane %v5399_v17, 7  ;;  %v466_v23 = vrot.slane %v5315_v36, 2 }
  0x35   : > { %v743_v25 = vrot.slane %v5399_v17, 2  ;;  %v431_v31 = vrot.slane %v5315_v36, 5  ;;  %v711_v32 = vrot.slane %v5399_v17, 5  ;;  %v602_v33 = vrot.slane %v5249_v0, 6 }
  0x36   : > { %v5413_v26 = vpack.i.bf16 %v775_v22, %v501_v20  ;;  %v609_v35 = vrot.slane %v5399_v17, 6  ;;  %v570_v43 = vrot.slane %v5399_v17, 1  ;;  %v641_v46 = vrot.slane %v5249_v0, 3 }
  0x37   : > { %v5415_v27 = vpack.i.bf16 %v743_v25, %v466_v23  ;;  %v5424_v34 = vpack.i.bf16 %v711_v32, %v431_v31  ;;  %v648_v47 = vrot.slane %v5399_v17, 3  ;;  %v4421_v48 = vpack.i.bf16 %v5249_v0, %v5399_v17 }
  0x38   : > { %4317 = vrot.lane.b32.xlu1 %v4316_v37, %s5103_s29  ;;  %4312 = vrot.lane.b32.xlu0 %v5324_v38, %s5103_s29  ;;  %v563_v37 = vrot.slane %v5249_v0, 1  ;;  %v4411_v44 = vpack.i.bf16 %v602_v33, %v609_v35  ;;  %v530_v50 = vcombine.low %v5249_v0, %v5249_v0  ;;  %v4436_v55 = vpack.i.bf16 %v5271_v12, %v5299_v28 }
  0x39   : > { %v4416_v49 = vpack.i.bf16 %v641_v46, %v648_v47 }
  0x3a   : > { %v4406_v45 = vpack.i.bf16 %v563_v37, %v570_v43  ;;  %v4431_v54 = vpack.i.bf16 %v5252_v1, %v530_v50 }
  0x3c   : > { %4327 = vrot.lane.b32.xlu1 %v5326_v39, %s8100_s15  ;;  %4322 = vrot.lane.b32.xlu0 %v5328_v40, %s8109_s28 }
  0x40   : > { %4337 = vrot.lane.b32.xlu1 %v4336_v57, %s5103_s29  ;;  %4332 = vrot.lane.b32.xlu0 %v4331_v58, %s8100_s15  ;;  %v5451_v57 = vpack.i.bf16 %v570_v43, %v569_v59  ;;  %v5456_v58 = vpack.i.bf16 %v648_v47, %v647_v11 }
  0x42   : > { %8159 = vst [vmem:[#allocation5_spill] sm:$0xff] %v5456_v58 }
  0x44   : > { %4347 = vrot.lane.b32.xlu1 %v5354_v56, %s5105_s16  ;;  %4342 = vrot.lane.b32.xlu0 %v4341_v3, %s8100_s15  ;;  %v5460_v3 = vpack.i.bf16 %v609_v35, %v608_v4 }
  0x46   : > { %8160 = vst [vmem:[#allocation6_spill] sm:$0xff] %v5460_v3 }
  0x48   : > { %4357 = vrot.lane.b32.xlu1 %v4356_v7, %s5105_s16  ;;  %4352 = vrot.lane.b32.xlu0 %v4351_v8, %s5105_s16 }
  0x4c   : > { %4367 = vrot.lane.b32.xlu1 %v4366_v10, %s5106_s17  ;;  %4362 = vrot.lane.b32.xlu0 %v5367_v61, %s5106_s17 }
  0x50   : > { %4377 = vrot.lane.b32.xlu1 %v4376_v15, %s5107_s18  ;;  %4372 = vrot.lane.b32.xlu0 %v4371_v16, %s5106_s17 }
  0x54   : > { %4387 = vrot.lane.b32.xlu1 %v4386_v18, %s5107_s18  ;;  %4382 = vrot.lane.b32.xlu0 %v4381_v19, %s5107_s18 }
  0x58   : > { %4397 = vrot.lane.b32.xlu1 %v5413_v26, %s5100_s20  ;;  %4392 = vrot.lane.b32.xlu0 %v5415_v27, %s8098_s26  ;;  %s5109_s20 = smov 92   ;;  %s5114_s26 = smov 60  }
  0x5c   : > { %1064 = vrot.lane.b32.xlu1 %v5315_v36, %s5103_s29  ;;  %4402 = vrot.lane.b32.xlu0 %v5424_v34, %s8109_s28  ;;  %s8150_s29 = smov 64   ;;  %s5116_s28 = smov 31  }
  0x60   : > { %4412 = vrot.lane.b32.xlu1 %v4411_v44, %s5105_s16  ;;  %4407 = vrot.lane.b32.xlu0 %v4406_v45, %s8100_s15  ;;  %s5111_s16 = smov 63   ;;  %s8132_s15 = smov 32  }
  0x64   : > { %4422 = vrot.lane.b32.xlu1 %v4421_v48, %s5107_s18  ;;  %4417 = vrot.lane.b32.xlu0 %v4416_v49, %s5106_s17  ;;  %s5112_s17 = smov 61   ;;  %s5113_s18 = smov 62  }
  0x68   : > { %4432 = vrot.lane.b32.xlu1 %v4431_v54, %s5108_s19  ;;  %4427 = vrot.lane.b32.xlu0 %v5324_v38, %s5108_s19 }
  0x6c   : > { %4442 = vrot.lane.b32.xlu1 %v5292_v24, %s5109_s20  ;;  %4437 = vrot.lane.b32.xlu0 %v4436_v55, %s5108_s19  ;;  %v4536_v24 = vpack.i.bf16 %v644_v9, %v641_v46 }
  0x70   : > { %4452 = vrot.lane.b32.xlu1 %v5328_v40, %s5109_s20  ;;  %4447 = vrot.lane.b32.xlu0 %v5346_v51, %s5109_s20 }
  0x74   : > { %4462 = vrot.lane.b32.xlu1 %v5348_v52, %s8150_s29  ;;  %4457 = vrot.lane.b32.xlu0 %v5275_v14, %s8150_s29  ;;  %v4521_v14 = vpack.i.bf16 %v605_v6, %v602_v33 }
  0x78   : > { %4467 = vrot.lane.b32.xlu0 %v5306_v30, %s8150_s29  ;;  %4472 = vrot.lane.b32.xlu1 %v5273_v13, %s5111_s16  ;;  %v4511_v13 = vpack.i.bf16 %v566_v42, %v563_v37 }
  0x7c   : > { %4482 = vrot.lane.b32.xlu1 %v5304_v29, %s5111_s16  ;;  %4477 = vrot.lane.b32.xlu0 %v5350_v53, %s5111_s16 }
  0x80   : > { %4492 = vrot.lane.b32.xlu1 %v5326_v39, %s5112_s17  ;;  %4487 = vrot.lane.b32.xlu0 %v5324_v38, %s5113_s18 }
  0x84   : > { %4502 = vrot.lane.b32.xlu1 %v4431_v54, %s5113_s18  ;;  %4497 = vrot.lane.b32.xlu0 %v5354_v56, %s5114_s26 }
  0x88   : > { %4512 = vrot.lane.b32.xlu1 %v4511_v13, %s5112_s17  ;;  %4507 = vrot.lane.b32.xlu0 %v4436_v55, %s5113_s18 }
  0x8c   : > { %4522 = vrot.lane.b32.xlu1 %v4521_v14, %s5114_s26  ;;  %4517 = vrot.lane.b32.xlu0 %v5365_v60, %s5112_s17 }
  0x90   : > { %4532 = vrot.lane.b32.xlu1 %v5367_v61, %s8132_s15  ;;  %4527 = vrot.lane.b32.xlu0 %v5369_v62, %s5114_s26 }
  0x94   : > { %4542 = vrot.lane.b32.xlu1 %v5371_v63, %s8132_s15  ;;  %4537 = vrot.lane.b32.xlu0 %v4536_v24, %s8132_s15 }
  0x9a   : > { %v4283_v28 = vpop.permute.xlu1 %4282  ;;  %v4273_v29 = vpop.permute.xlu0 %4272 }
  0x9b   : > { %v4285_v60 = vunpack.i.h.bf16 %v4283_v28  ;;  %v4284_v61 = vunpack.i.l.bf16 %v4283_v28  ;;  %v4275_v62 = vunpack.i.h.bf16 %v4273_v29  ;;  %v4274_v63 = vunpack.i.l.bf16 %v4273_v29 }
  0x9d   : > { %v518_v18 = vsel %vm516_vm0, %v4284_v61, %v4285_v60  ;;  %v483_v20 = vsel %vm8119_vm1, %v4274_v63, %v4275_v62 }
  0x9e   : > { %v5503_v30 = vpop.permute.xlu1 %4287  ;;  %v5505_v38 = vpop.permute.xlu0 %4277  ;;  %v5546_v43 = vsel %vm947_vm3, %v483_v20, %v518_v18 }
  0x9f   : > { %v4289_v4 = vunpack.i.l.bf16 %v5503_v30  ;;  %v4279_v6 = vunpack.i.l.bf16 %v5505_v38  ;;  %v4290_v10 = vunpack.i.h.bf16 %v5503_v30  ;;  %v4280_v11 = vunpack.i.h.bf16 %v5505_v38 }
  0xa1   : > { %v519_v22 = vsel %vm516_vm0, %v4285_v60, %v4289_v4  ;;  %v484_v23 = vsel %vm8119_vm1, %v4275_v62, %v4279_v6  ;;  %v517_v32 = vsel %vm516_vm0, %v4290_v10, %v4284_v61  ;;  %v482_v37 = vsel %vm8119_vm1, %v4280_v11, %v4274_v63 }
  0xa2   : > { %v5507_v39 = vpop.permute.xlu1 %4297  ;;  %v4293_v40 = vpop.permute.xlu0 %4292  ;;  %v5554_v48 = vsel %vm947_vm3, %v484_v23, %v519_v22 }
  0xa3   : > { %v4299_v7 = vunpack.i.l.bf16 %v5507_v39  ;;  %v4295_v8 = vunpack.i.h.bf16 %v4293_v40  ;;  %v4294_v9 = vunpack.i.l.bf16 %v4293_v40  ;;  %v4300_v19 = vunpack.i.h.bf16 %v5507_v39 }
  0xa5   : > { %v449_v25 = vsel %vm8121_vm2, %v4295_v8, %v4299_v7  ;;  %v448_v31 = vsel %vm8121_vm2, %v4294_v9, %v4295_v8  ;;  %v447_v45 = vsel %vm8121_vm2, %v4300_v19, %v4294_v9 }
  0xa6   : > { %v5509_v42 = vpop.permute.xlu1 %4307  ;;  %v5511_v51 = vpop.permute.xlu0 %4302  ;;  %v933_v54 = vsel %vm931_vm7, %v5256_v2, %v448_v31  ;;  %v934_v55 = vsel %vm931_vm7, %v5252_v1, %v449_v25  ;;  %v932_v2 = vsel %vm931_vm7, %v5249_v0, %v447_v45  ;;  %v5575_v1 = vsel %vm947_vm3, %v482_v37, %v517_v32 }
  0xa7   : > { %v4309_v46 = vunpack.i.l.bf16 %v5509_v42  ;;  %v4304_v47 = vunpack.i.l.bf16 %v5511_v51  ;;  %v8104_v49 = vunpack.i.h.bf16 %v5509_v42  ;;  %v8103_v50 = vunpack.i.h.bf16 %v5511_v51 }
  0xa8   : > { %v5582_v61 = vsel %vm939_vm8, %v934_v55, %v484_v23  ;;  %v5601_v11 = vsel %vm939_vm8, %v932_v2, %v482_v37 }
  0xa9   : > { %v520_v60 = vsel %vm516_vm0, %v4289_v4, %v4309_v46  ;;  %v485_v62 = vsel %vm8119_vm1, %v4279_v6, %v4304_v47  ;;  %v521_v63 = vsel %vm516_vm0, %v4309_v46, %v8104_v49  ;;  %v486_v4 = vsel %vm8119_vm1, %v4304_v47, %v8103_v50 }
  0xaa   : > { %v5513_v52 = vpop.permute.xlu1 %4317  ;;  %v5515_v53 = vpop.permute.xlu0 %4312  ;;  %v5614_v23 = vsel %vm947_vm3, %v485_v62, %v520_v60  ;;  %v5623_v31 = vsel %vm947_vm3, %v486_v4, %v521_v63 }
  0xab   : > { %v8105_v13 = vunpack.i.h.bf16 %v5513_v52  ;;  %v4319_v14 = vunpack.i.l.bf16 %v5513_v52  ;;  %v4315_v24 = vunpack.i.h.bf16 %v5515_v53  ;;  %v4314_v28 = vunpack.i.l.bf16 %v5515_v53 }
  0xac   : > { %v5579_v53 = vsel %vm939_vm8, %v933_v54, %v483_v20 }
  0xad   : > { %v1069_v9 = vsel %vm1066_vm4, %v4319_v14, %v8105_v13  ;;  %v1068_v6 = vsel %vm1066_vm4, %v4315_v24, %v4319_v14  ;;  %v1067_v10 = vsel %vm1066_vm4, %v4314_v28, %v4315_v24 }
  0xae   : > { %v5517_v56 = vpop.permute.xlu1 %4327  ;;  %v5519_v59 = vpop.permute.xlu0 %4322  ;;  %v1094_v37 = vsel %vm955_vm5, %v5546_v43, %v1067_v10  ;;  %v5633_v45 = vsel %vm955_vm5, %v5554_v48, %v1068_v6 }
  0xaf   : > { %v8102_v29 = vunpack.i.h.bf16 %v5519_v59  ;;  %v4324_v30 = vunpack.i.l.bf16 %v5519_v59  ;;  %v4330_v0 = vunpack.i.h.bf16 %v5517_v56  ;;  %v5590_v8 = vunpack.i.l.bf16 %v5517_v56 }
  0xb1   : > { %v450_v56 = vsel %vm8121_vm2, %v4299_v7, %v4324_v30  ;;  %v451_v18 = vsel %vm8121_vm2, %v4324_v30, %v8102_v29  ;;  %v1093_v7 = vsel %vm955_vm5, %v5575_v1, %v4314_v28  ;;  %v5627_v32 = vsel %vm8120_vm6, %v5590_v8, %v4330_v0 }
  0xb2   : > { %v5526_v15 = vpop.permute.xlu1 %4337  ;;  %v5528_v16 = vpop.permute.xlu0 %4332  ;;  %v935_v47 = vsel %vm931_vm7, %v5262_v5, %v450_v56  ;;  %v936_v54 = vsel %vm931_vm7, %v5271_v12, %v451_v18  ;;  %v5646_v55 = vsel %vm963_vm9, %v1093_v7, %v5590_v8  ;;  %v5660_v12 = vsel %vm963_vm9, %v1094_v37, %v5627_v32 }
  0xb3   : > { %v4334_v14 = vunpack.i.l.bf16 %v5528_v16  ;;  %v4339_v10 = vunpack.i.l.bf16 %v5526_v15  ;;  %v5669_v44 = vsel %vm939_vm8, %v935_v47, %v485_v62 }
  0xb5   : > { %v5675_v37 = vsel %vm8120_vm6, %v4330_v0, %v4334_v14 }
  0xb6   : > { %v5540_v33 = vpop.permute.xlu1 %4347  ;;  %v5542_v35 = vpop.permute.xlu0 %4342 }
  0xb7   : > { %v4350_v25 = vunpack.i.h.bf16 %v5540_v33  ;;  %v5618_v39 = vunpack.i.l.bf16 %v5540_v33  ;;  %v5637_v33 = vsel %vm955_vm5, %v5614_v23, %v1069_v9 }
  0xb9   : > { %v628_v5 = vsel %vm626_vm10, %v5618_v39, %v4350_v25 }
  0xba   : > { %v5568_v38 = vpop.permute.xlu1 %4357  ;;  %v5570_v40 = vpop.permute.xlu0 %4352 }
  0xbb   : > { %v4354_v46 = vunpack.i.l.bf16 %v5570_v40  ;;  %v4355_v56 = vunpack.i.h.bf16 %v5570_v40 }
  0xbd   : > { %v629_v7 = vsel %vm626_vm10, %v4350_v25, %v4354_v46 }
  0xbe   : > { %v5609_v19 = vpop.permute.xlu1 %4367  ;;  %v4363_v20 = vpop.permute.xlu0 %4362  ;;  %v974_v49 = vsel %vm8129_vm12, %v5675_v37, %v629_v7 }
  0xbf   : > { %v4369_v24 = vunpack.i.l.bf16 %v5609_v19  ;;  %v4365_v28 = vunpack.i.h.bf16 %v4363_v20  ;;  %v5650_v30 = vunpack.i.l.bf16 %v4363_v20  ;;  %v4370_v18 = vunpack.i.h.bf16 %v5609_v19 }
  0xc0   : > { %v4335_v20 = vunpack.i.h.bf16 %v5528_v16  ;;  %v973_v16 = vsel %vm8129_vm12, %v5627_v32, %v628_v5 }
  0xc1   : > { %v667_v40 = vsel %vm665_vm11, %v5650_v30, %v4365_v28  ;;  %v668_v19 = vsel %vm665_vm11, %v4365_v28, %v4369_v24  ;;  %v669_v28 = vsel %vm665_vm11, %v4369_v24, %v4370_v18 }
  0xc2   : > { %v4378_v2 = vpop.permute.xlu1 %4377  ;;  %v5652_v60 = vpop.permute.xlu0 %4372  ;;  %v5706_v0 = vsel %vm8128_vm14, %v973_v16, %v667_v40  ;;  %v8168_v40 = vunpack.i.h.bf16 %v5526_v15 }
  0xc3   : > { %v4380_v63 = vunpack.i.h.bf16 %v4378_v2  ;;  %v5656_v9 = vunpack.i.l.bf16 %v4378_v2  ;;  %v5672_v2 = vsel %vm939_vm8, %v936_v54, %v486_v4  ;;  %v630_v54 = vsel %vm626_vm10, %v4354_v46, %v4355_v56  ;;  %8165 = vst [vmem:[#allocation11_spill] sm:$0xff] %v5706_v0 }
  0xc4   : > { %8161 = vst [vmem:[#allocation7_spill] sm:$0xff] %v5672_v2  ;;  %v5722_v16 = vsel %vm1066_vm4, %v4339_v10, %v8168_v40 }
  0xc5   : > { %v5687_v4 = vsel %vm696_vm13, %v5656_v9, %v4380_v63 }
  0xc6   : > { %v5677_v29 = vpop.permute.xlu1 %4387  ;;  %v4383_v50 = vpop.permute.xlu0 %4382 }
  0xc7   : > { %8162 = vst [vmem:[#allocation8_spill] sm:$0xff] %v5677_v29  ;;  %v8108_v62 = vunpack.i.l.bf16 %v5677_v29  ;;  %v4385_v25 = vunpack.i.h.bf16 %v4383_v50  ;;  %v4384_v47 = vunpack.i.l.bf16 %v4383_v50  ;;  %v5714_v29 = vsel %vm8128_vm14, %v974_v49, %v668_v19 }
  0xc8   : > { %8166 = vst [vmem:[#allocation12_spill] sm:$0xff] %v5714_v29  ;;  %v1109_v49 = vsel %vm8129_vm12, %v5590_v8, %v5618_v39  ;;  %v4566_v19 = vpack.i.bf16 %v5714_v29, %v5706_v0  ;;  %v8175_v29 = vunpack.i.h.bf16 %v5511_v51 }
  0xc9   : > { %v5695_v22 = vsel %vm696_vm13, %v4384_v47, %v4385_v25  ;;  %v5700_v50 = vsel %vm696_vm13, %v4385_v25, %v8108_v62  ;;  %v5703_v5 = vsel %vm696_vm13, %v4380_v63, %v4384_v47  ;;  %v8167_v25 = vunpack.i.h.bf16 %v5513_v52 }
  0xca   : > { %8163 = vst [vmem:[#allocation9_spill] sm:$0xff] %v5695_v22  ;;  %8164 = vst [vmem:[#allocation10_spill] sm:$0xff] %v5703_v5  ;;  %v4398_v6 = vpop.permute.xlu1 %4397  ;;  %v4393_v7 = vpop.permute.xlu0 %4392  ;;  %v4551_v24 = vpack.i.bf16 %v5700_v50, %v5695_v22  ;;  %v4546_v13 = vpack.i.bf16 %v5703_v5, %v5687_v4  ;;  %v5725_v47 = vsel %vm8120_vm6, %v4334_v14, %v4335_v20  ;;  %v4344_v62 = vunpack.i.l.bf16 %v5542_v35 }
  0xcb   : > { %v1070_v63 = vsel %vm1066_vm4, %v8167_v25, %v4339_v10  ;;  %v4399_v46 = vunpack.i.l.bf16 %v4398_v6  ;;  %v4394_v3 = vunpack.i.l.bf16 %v4393_v7  ;;  %v975_v52 = vsel %vm8129_vm12, %v5725_v47, %v630_v54 }
  0xcc   : > { %4552 = vrot.lane.b32.xlu1 %v4551_v24, %s5116_s28  ;;  %4547 = vrot.lane.b32.xlu0 %v4546_v13, %s5116_s28  ;;  %v8169_v10 = vunpack.i.l.bf16 %v5568_v38  ;;  %v5741_v25 = vsel %vm8128_vm14, %v975_v52, %v669_v28  ;;  %v1111_v13 = vsel %vm8128_vm14, %v1109_v49, %v5650_v30  ;;  %v4400_v24 = vunpack.i.h.bf16 %v4398_v6 }
  0xcd   : > { %8170 = vst [vmem:[#allocation13_spill] sm:$0xff] %v5741_v25  ;;  %v5745_v40 = vunpack.i.h.bf16 %v4393_v7  ;;  %v8171_v22 = vunpack.i.l.bf16 %v5652_v60  ;;  %v4561_v52 = vpack.i.bf16 %v5669_v44, %v5601_v11  ;;  %v1103_v6 = vsel %vm963_vm9, %v5633_v45, %v5675_v37 }
  0xce   : > { %v631_v14 = vsel %vm626_vm10, %v4355_v56, %v8169_v10  ;;  %v1065_v54 = vpop.permute.xlu1 %1064  ;;  %v4403_v5 = vpop.permute.xlu0 %4402  ;;  %v5751_v56 = vsel %vm947_vm3, %v4394_v3, %v4399_v46  ;;  %v5754_v10 = vsel %vm8120_vm6, %v4335_v20, %v4344_v62  ;;  %v4360_v7 = vunpack.i.h.bf16 %v5568_v38 }
  0xcf   : > { %v670_v58 = vsel %vm665_vm11, %v4370_v18, %v8171_v22  ;;  %8172 = vst [vmem:[#allocation14_spill] sm:$0xff] %v5751_v56  ;;  %v4404_v28 = vunpack.i.l.bf16 %v4403_v5  ;;  %v8173_v22 = vpack.i.bf16 %v5582_v61, %v5579_v53  ;;  %v4571_v18 = vpack.i.bf16 %v5741_v25, %v1111_v13 }
  0xd0   : > { %4567 = vrot.lane.b32.xlu1 %v4566_v19, %s5116_s28  ;;  %v976_v20 = vsel %vm8129_vm12, %v5754_v10, %v631_v14  ;;  %v4586_v49 = vpack.i.bf16 %v5646_v55, %v5672_v2  ;;  %v8174_v56 = vunpack.i.h.bf16 %v5509_v42  ;;  %v487_v19 = vsel %vm8119_vm1, %v8175_v29, %v4394_v3 }
  0xd1   : > { %4557 = vrot.lane.b32.xlu0 %v8173_v22, %s5116_s28  ;;  %v938_v0 = vsel %vm931_vm7, %v5315_v36, %v4404_v28  ;;  %v5781_v22 = vsel %vm8128_vm14, %v976_v20, %v670_v58  ;;  %v1049_v13 = vsel %vm516_vm0, %v4399_v46, %v4400_v24  ;;  %v1044_v14 = vsel %vm8119_vm1, %v4394_v3, %v5745_v40 }
  0xd2   : > { %v522_v45 = vsel %vm516_vm0, %v8174_v56, %v4399_v46  ;;  %v4405_v55 = vunpack.i.h.bf16 %v4403_v5  ;;  %v5786_v25 = vpop.permute.xlu1 %4412  ;;  %v4408_v42 = vpop.permute.xlu0 %4407  ;;  %v5789_v51 = vsel %vm939_vm8, %v938_v0, %v4394_v3  ;;  %v4345_v29 = vunpack.i.h.bf16 %v5542_v35 }
  0xd3   : > { %v4581_v56 = vpack.i.bf16 %v1103_v6, %v5660_v12  ;;  %v1097_v58 = vsel %vm955_vm5, %v5623_v31, %v1070_v63  ;;  %v1104_v46 = vsel %vm963_vm9, %v5637_v33, %v5725_v47  ;;  %v8118_v5 = vunpack.i.h.bf16 %v5652_v60 }
  0xd4   : > { %v8176_v20 = vunpack.i.h.bf16 %v5519_v59  ;;  %4572 = vrot.lane.b32.xlu1 %v4571_v18, %s5116_s28  ;;  %v1105_v3 = vsel %vm963_vm9, %v1097_v58, %v5754_v10  ;;  %v5807_v35 = vsel %vm947_vm3, %v487_v19, %v522_v45  ;;  %v8177_v12 = vunpack.i.l.bf16 %v5568_v38 }
  0xd5   : > { %4562 = vrot.lane.b32.xlu0 %v4561_v52, %s5116_s28  ;;  %v1091_v0 = vsel %vm947_vm3, %v1044_v14, %v1049_v13  ;;  %v1092_v59 = vsel %vm947_vm3, %v5745_v40, %v4400_v24  ;;  %v4576_v63 = vpack.i.bf16 %v5656_v9, %v5781_v22  ;;  %v8178_v52 = vunpack.i.h.bf16 %v5526_v15 }
  0xd6   : > { %v452_v2 = vsel %vm8121_vm2, %v8176_v20, %v4404_v28  ;;  %v632_v33 = vsel %vm626_vm10, %v8177_v12, %v4360_v7  ;;  %v1039_v18 = vsel %vm8121_vm2, %v4404_v28, %v4405_v55  ;;  %v4415_v45 = vunpack.i.h.bf16 %v5786_v25  ;;  %v5822_v38 = vpop.permute.xlu1 %4422  ;;  %v5824_v20 = vpop.permute.xlu0 %4417 }
  0xd7   : > { %v1072_v6 = vsel %vm1066_vm4, %v8178_v52, %v1065_v54  ;;  %v4410_v58 = vunpack.i.h.bf16 %v4408_v42  ;;  %v4591_v13 = vpack.i.bf16 %v1105_v3, %v1104_v46  ;;  %v5827_v12 = vsel %vm8120_vm6, %v4344_v62, %v4345_v29 }
  0xd8   : > { %v1098_v24 = vsel %vm955_vm5, %v5807_v35, %v5722_v16  ;;  %v937_v15 = vsel %vm931_vm7, %v5287_v21, %v452_v2  ;;  %v5835_v28 = vsel %vm955_vm5, %v1092_v59, %v1065_v54  ;;  %v4414_v52 = vunpack.i.l.bf16 %v5786_v25  ;;  %4582 = vrot.lane.b32.xlu1 %v4581_v56, %s5116_s28 }
  0xd9   : > { %4577 = vrot.lane.b32.xlu0 %v4576_v63, %s5116_s28  ;;  %v8179_v62 = vunpack.i.l.bf16 %v5652_v60  ;;  %v5849_v16 = vsel %vm8129_vm12, %v5827_v12, %v632_v33  ;;  %v1099_v21 = vsel %vm955_vm5, %v1091_v0, %v1072_v6  ;;  %v5852_v2 = vunpack.i.l.bf16 %v4408_v42 }
  0xda   : > { %v1087_v54 = vsel %vm931_vm7, %v5315_v36, %v1039_v18  ;;  %v1088_v56 = vsel %vm931_vm7, %v5399_v17, %v4405_v55  ;;  %v627_v3 = vsel %vm626_vm10, %v4415_v45, %v5618_v39  ;;  %v4433_v59 = vpop.permute.xlu1 %4432  ;;  %v4428_v63 = vpop.permute.xlu0 %4427  ;;  %v5864_v33 = vsel %vm963_vm9, %v1098_v24, %v5827_v12 }
  0xdb   : > { %v5845_v46 = vsel %vm665_vm11, %v8179_v62, %v8118_v5  ;;  %v588_v62 = vsel %vm8120_vm6, %v4410_v58, %v5590_v8  ;;  %v5867_v42 = vsel %vm939_vm8, %v937_v15, %v487_v19  ;;  %v4435_v0 = vunpack.i.h.bf16 %v4433_v59 }
  0xdc   : > { %v4434_v6 = vunpack.i.l.bf16 %v4433_v59  ;;  %v4430_v18 = vunpack.i.h.bf16 %v4428_v63  ;;  %v4429_v5 = vunpack.i.l.bf16 %v4428_v63  ;;  %v5872_v17 = vsel %vm626_vm10, %v4360_v7, %v4414_v52  ;;  %4587 = vrot.lane.b32.xlu1 %v4586_v49, %s5116_s28 }
  0xdd   : > { %4592 = vrot.lane.b32.xlu0 %v4591_v13, %s5116_s28  ;;  %vm728_vm0 = vcmask 752640   ;;  %v5877_v8 = vsel %vm939_vm8, %v1087_v54, %v1044_v14  ;;  %v5881_v39 = vsel %vm939_vm8, %v1088_v56, %v5745_v40  ;;  %v5888_v7 = vsel %vm8120_vm6, %v4345_v29, %v5852_v2 }
  0xde   : > { %v550_v19 = vsel %vm548_vm15, %v4429_v5, %v4430_v18  ;;  %v549_v55 = vsel %vm548_vm15, %v4434_v6, %v4429_v5  ;;  %v551_v45 = vsel %vm548_vm15, %v4430_v18, %v4435_v0  ;;  %v4443_v49 = vpop.permute.xlu1 %4442  ;;  %v5890_v58 = vpop.permute.xlu0 %4437  ;;  %v5897_v13 = vsel %vm8129_vm12, %v588_v62, %v627_v3 }
  0xdf   : > { %v957_v14 = vsel %vm955_vm5, %v5546_v43, %v550_v19  ;;  %v956_v40 = vsel %vm955_vm5, %v5575_v1, %v549_v55  ;;  %vm760_vm4 = vcmask 523264   ;;  %v4425_v5 = vunpack.i.h.bf16 %v5822_v38 }
  0xe0   : > { %v4420_v24 = vunpack.i.h.bf16 %v5824_v20  ;;  %v4440_v29 = vunpack.i.h.bf16 %v5890_v58  ;;  %v4439_v15 = vunpack.i.l.bf16 %v5890_v58  ;;  %v8125_v54 = vmov 0.0   ;;  %4597 = vrot.lane.b32.xlu1 %v5424_v34, %s5109_s20  ;;  %s8208_s20 = smov 127  }
  0xe1   : > { %1340 = vmatprep.mubr.f32.mxu0 %v8125_v54  ;;  %1411 = vmatprep.mubr.f32.mxu1 %v8125_v54  ;;  %v4445_v43 = vunpack.i.h.bf16 %v4443_v49  ;;  %v965_v1 = vsel %vm963_vm9, %v957_v14, %v5627_v32  ;;  %v964_v56 = vsel %vm963_vm9, %v956_v40, %v588_v62  ;;  %v958_v3 = vsel %vm955_vm5, %v5554_v48, %v551_v45 }
  0xe2   : > { %546 = vrot.lane.b32.xlu0 %v5332_v41, %s5108_s19  ;;  %v4444_v59 = vunpack.i.l.bf16 %v4443_v49  ;;  %v553_v63 = vsel %vm548_vm15, %v4439_v15, %v4440_v29  ;;  %v3844_v6 = vpack.c.bf16 %v965_v1, %v5579_v53  ;;  %v3846_v34 = vpack.c.bf16 %v964_v56, %v5601_v11  ;;  %v5921_v19 = vpop.permute.xlu1 %4452  ;;  %v4448_v32 = vpop.permute.xlu0 %4447 }
  0xe3   : > { %v960_v18 = vsel %vm955_vm5, %v5623_v31, %v553_v63  ;;  %v552_v62 = vsel %vm548_vm15, %v4435_v0, %v4439_v15  ;;  %v5926_v48 = vsel %vm963_vm9, %v1099_v21, %v5888_v7  ;;  %v4631_v55 = vpack.i.bf16 %v5877_v8, %v5867_v42 }
  0xe4   : > { %v4455_v45 = vunpack.i.h.bf16 %v5921_v19  ;;  %v4454_v53 = vunpack.i.l.bf16 %v5921_v19  ;;  %v4449_v11 = vunpack.i.l.bf16 %v4448_v32  ;;  %3845 = vmatprep.subr.bf16.mxu0 %v3844_v6  ;;  %v966_v31 = vsel %vm963_vm9, %v958_v3, %v5675_v37  ;;  %4607 = vrot.lane.b32.xlu1 %v5413_v26, %s5111_s16  ;;  %s8210_s16 = smov 96  }
  0xe5   : > { %v4419_v49 = vunpack.i.l.bf16 %v5824_v20  ;;  %v4450_v14 = vunpack.i.h.bf16 %v4448_v32  ;;  %3847 = vmatpush1.bf16.msra.mxu0 %v3846_v34  ;;  %v959_v21 = vsel %vm955_vm5, %v5614_v23, %v552_v62  ;;  %v5941_v0 = vsel %vm963_vm9, %v960_v18, %v5754_v10 }
  0xe6   : > { %v697_v40 = vsel %vm696_vm13, %v4425_v5, %v5656_v9  ;;  %v730_v15 = vsel %vm728_vm0, %v4444_v59, %v4445_v43  ;;  %v733_v37 = vsel %vm728_vm0, %v4454_v53, %v4455_v45  ;;  %4602 = vrot.lane.b32.xlu0 %v5415_v27, %s8150_s29  ;;  %v666_v26 = vsel %vm665_vm11, %v4420_v24, %v5650_v30  ;;  %v4463_v1 = vpop.permute.xlu1 %4462  ;;  %v4458_v56 = vpop.permute.xlu0 %4457  ;;  %v8180_v24 = vld [vmem:[#allocation7_spill] sm:$0xff] }
  0xe7   : > { %v991_v23 = vsel %vm931_vm7, %v5700_v50, %v733_v37  ;;  %v729_v10 = vsel %vm728_vm0, %v4449_v11, %v4444_v59  ;;  %v967_v9 = vsel %vm963_vm9, %v959_v21, %v5725_v47  ;;  %v3868_v5 = vpack.c.bf16 %v966_v31, %v5582_v61  ;;  %v8182_v31 = vld [vmem:[#allocation11_spill] sm:$0xff]  ;;  %v8185_v37 = vld [vmem:[#allocation10_spill] sm:$0xff] }
  0xe8   : > { %v4465_v3 = vunpack.i.h.bf16 %v4463_v1  ;;  %v4464_v63 = vunpack.i.l.bf16 %v4463_v1  ;;  %v4460_v6 = vunpack.i.h.bf16 %v4458_v56  ;;  %v4459_v34 = vunpack.i.l.bf16 %v4458_v56  ;;  %4617 = vrot.lane.b32.xlu1 %v5451_v57, %s5112_s17  ;;  %s5123_s17 = smov 58  }
  0xe9   : > { %v731_v27 = vsel %vm728_vm0, %v4445_v43, %v4450_v14  ;;  %v3866_v30 = vpack.c.bf16 %v967_v9, %v5669_v44  ;;  %v988_v50 = vsel %vm931_vm7, %v5687_v4, %v730_v15  ;;  %v3890_v59 = vpack.c.bf16 %v5941_v0, %v8180_v24 }
  0xea   : > { %v732_v47 = vsel %vm728_vm0, %v4450_v14, %v4454_v53  ;;  %v8181_v61 = vpack.i.bf16 %v5315_v36, %v5332_v41  ;;  %v5973_v43 = vsel %vm760_vm4, %v4459_v34, %v4460_v6  ;;  %v5976_v44 = vsel %vm760_vm4, %v4464_v63, %v4459_v34  ;;  %v5979_v4 = vpop.permute.xlu0 %4467  ;;  %v5990_v62 = vpop.permute.xlu1 %4472 }
  0xeb   : > { %v987_v57 = vsel %vm931_vm7, %v697_v40, %v729_v10  ;;  %3867 = vmatprep.subr.bf16.mxu1 %v3866_v30  ;;  %v995_v18 = vsel %vm939_vm8, %v988_v50, %v5973_v43  ;;  %v980_v32 = vsel %vm8128_vm14, %v5897_v13, %v666_v26  ;;  %v5988_v41 = vsel %vm760_vm4, %v4460_v6, %v4465_v3  ;;  %v8183_v40 = vld [vmem:[#allocation5_spill] sm:$0xff] }
  0xec   : > { %4612 = vrot.lane.b32.xlu0 %v8181_v61, %s5113_s18  ;;  %v994_v36 = vsel %vm939_vm8, %v987_v57, %v5976_v44  ;;  %3869 = vmatpush1.bf16.msra.mxu1 %v3868_v5  ;;  %v4470_v53 = vunpack.i.h.bf16 %v5979_v4  ;;  %v4469_v11 = vunpack.i.l.bf16 %v5979_v4  ;;  %v3848_v14 = vpack.c.bf16 %v995_v18, %v8182_v31  ;;  %v8184_v13 = vld [vmem:[#allocation9_spill] sm:$0xff]  ;;  %v8187_v5 = vld [vmem:[#allocation6_spill] sm:$0xff] }
  0xed   : > { %v3850_v21 = vpack.c.bf16 %v994_v36, %v980_v32  ;;  %4627 = vrot.lane.b32.xlu1 %v8183_v40, %s8132_s15  ;;  %v990_v15 = vsel %vm931_vm7, %v8184_v13, %v732_v47  ;;  %v989_v26 = vsel %vm931_vm7, %v8185_v37, %v731_v27  ;;  %v8186_v10 = vunpack.i.h.bf16 %v5652_v60  ;;  %s5125_s15 = smov 122  }
  0xee   : > { %v978_v56 = vsel %vm8129_vm12, %v5888_v7, %v5872_v17  ;;  %v765_v9 = vsel %vm760_vm4, %v4469_v11, %v4470_v53  ;;  %3849 = vmatprep.subr.bf16.mxu0 %v3848_v14  ;;  %v6015_v63 = vsel %vm760_vm4, %v4465_v3, %v4469_v11  ;;  %v996_v60 = vsel %vm939_vm8, %v989_v26, %v5988_v41  ;;  %v6024_v27 = vpop.permute.xlu1 %4482  ;;  %v4478_v30 = vpop.permute.xlu0 %4477  ;;  %v8188_v3 = vld [vmem:[#allocation13_spill] sm:$0xff] }
  0xef   : > { %v672_v1 = vsel %vm665_vm11, %v8186_v10, %v4419_v49  ;;  %vm792_vm10 = vcmask 515072   ;;  %v4424_v6 = vunpack.i.l.bf16 %v5822_v38  ;;  %3851 = vmatpush1.bf16.msra.mxu0 %v3850_v21  ;;  %v4636_v17 = vpack.i.bf16 %v5926_v48, %v5864_v33  ;;  %v8189_v33 = vld [vmem:[#allocation12_spill] sm:$0xff] }
  0xf0   : > { %4622 = vrot.lane.b32.xlu0 %v8187_v5, %s5114_s26  ;;  %v997_v34 = vsel %vm939_vm8, %v990_v15, %v6015_v63  ;;  %v6027_v50 = vsel %vm939_vm8, %v991_v23, %v765_v9  ;;  %v6031_v61 = vsel %vm8128_vm14, %v978_v56, %v672_v1  ;;  %v4485_v38 = vunpack.i.h.bf16 %v6024_v27 }
  0xf1   : > { %v3870_v47 = vpack.c.bf16 %v997_v34, %v8188_v3  ;;  %v4484_v57 = vunpack.i.l.bf16 %v6024_v27  ;;  %4637 = vrot.lane.b32.xlu1 %v4636_v17, %s5116_s28  ;;  %v3872_v48 = vpack.c.bf16 %v996_v60, %v8189_v33  ;;  %v1108_v18 = vsel %vm963_vm9, %v5835_v28, %v5852_v2  ;;  %v8190_v28 = vld [vmem:[#allocation8_spill] sm:$0xff] }
  0xf2   : > { %v1110_v23 = vsel %vm8129_vm12, %v5852_v2, %v4414_v52  ;;  %v6053_v36 = vsel %vm8128_vm14, %v5849_v16, %v5845_v46  ;;  %v4390_v52 = vunpack.i.h.bf16 %v8190_v28  ;;  %v6062_v8 = vpop.permute.xlu1 %4492  ;;  %v4641_v31 = vpack.i.bf16 %v1108_v18, %v5881_v39 }
  0xf3   : > { %3871 = vmatprep.subr.bf16.mxu1 %v3870_v47  ;;  %v797_v25 = vsel %vm792_vm10, %v4484_v57, %v4485_v38  ;;  %v4646_v2 = vpack.i.bf16 %v6031_v61, %v6053_v36  ;;  %v1112_v46 = vsel %vm8128_vm14, %v1110_v23, %v4419_v49  ;;  %v4475_v16 = vunpack.i.h.bf16 %v5990_v62  ;;  %v1252_v47 = vld [vmem:[%s8192_s2] sm:$0x3f] }
  0xf4   : > { %4632 = vrot.lane.b32.xlu0 %v4631_v55, %s5116_s28  ;;  %3873 = vmatpush1.bf16.msra.mxu1 %v3872_v48  ;;  %v1005_v11 = vsel %vm947_vm3, %v765_v9, %v797_v25  ;;  %v4488_v55 = vpop.permute.xlu0 %4487  ;;  %v4474_v14 = vunpack.i.l.bf16 %v5990_v62  ;;  %v6072_v21 = vsel %vm696_vm13, %v4390_v52, %v4424_v6  ;;  %v4656_v40 = vpack.i.bf16 %v4424_v6, %v1112_v46 }
  0xf5   : > { %4647 = vrot.lane.b32.xlu1 %v4646_v2, %s5116_s28  ;;  %v8191_v13 = vunpack.i.l.bf16 %v8190_v28  ;;  %v4480_v20 = vunpack.i.h.bf16 %v4478_v30  ;;  %v5118_v37 = vmov 0   ;;  %v4479_v10 = vunpack.i.l.bf16 %v4478_v30 }
  0xf6   : > { %v4503_v15 = vpop.permute.xlu1 %4502  ;;  %4661 = vset.pattern.permute.xlu0 %v5118_v37  ;;  %4962 = vset.pattern.permute.xlu1 %v5118_v37  ;;  %v794_v26 = vsel %vm792_vm10, %v4474_v14, %v4475_v16  ;;  %v4495_v1 = vunpack.i.h.bf16 %v6062_v8  ;;  %v4494_v56 = vunpack.i.l.bf16 %v6062_v8  ;;  %v4490_v9 = vunpack.i.h.bf16 %v4488_v55 }
  0xf7   : > { %v6078_v39 = vsel %vm696_vm13, %v8191_v13, %v4390_v52  ;;  %v4489_v5 = vunpack.i.l.bf16 %v4488_v55  ;;  %vm823_vm11 = vcmask 506880   ;;  %vm854_vm13 = vcmask 498688  }
  0xf8   : > { %4642 = vrot.lane.b32.xlu0 %v4641_v31, %s5116_s28  ;;  %v4498_v49 = vpop.permute.xlu0 %4497  ;;  %v4651_v62 = vpack.i.bf16 %v6072_v21, %v6078_v39  ;;  %v795_v17 = vsel %vm792_vm10, %v4475_v16, %v4480_v20  ;;  %vm885_vm1 = vcmask 490496   ;;  %vm916_vm6 = vcmask 261120  }
  0xf9   : > { %4657 = vrot.lane.b32.xlu1 %v4656_v40, %s5116_s28  ;;  %v4500_v60 = vunpack.i.h.bf16 %v4498_v49  ;;  %v4499_v6 = vunpack.i.l.bf16 %v4498_v49  ;;  %v1002_v30 = vsel %vm947_vm3, %v5973_v43, %v794_v26  ;;  %v796_v33 = vsel %vm792_vm10, %v4480_v20, %v4484_v57 }
  0xfa   : > { %v4513_v34 = vpop.permute.xlu1 %4512  ;;  %v793_v48 = vsel %vm792_vm10, %v4479_v10, %v4474_v14  ;;  %v825_v25 = vsel %vm823_vm11, %v4489_v5, %v4490_v9  ;;  %v4505_v28 = vunpack.i.h.bf16 %v4503_v15  ;;  %v4504_v52 = vunpack.i.l.bf16 %v4503_v15 }
  0xfb   : > { %v856_v2 = vsel %vm854_vm13, %v4494_v56, %v4495_v1  ;;  %v887_v43 = vsel %vm885_vm1, %v4499_v6, %v4500_v60  ;;  %v4515_v8 = vunpack.i.h.bf16 %v4513_v34  ;;  %v4514_v55 = vunpack.i.l.bf16 %v4513_v34 }
  0xfc   : > { %4652 = vrot.lane.b32.xlu0 %v4651_v62, %s5116_s28  ;;  %v6088_v3 = vpop.permute.xlu0 %4507  ;;  %v1004_v14 = vsel %vm947_vm3, %v6015_v63, %v796_v33  ;;  %v1001_v40 = vsel %vm947_vm3, %v5976_v44, %v793_v48  ;;  %v1003_v13 = vsel %vm947_vm3, %v5988_v41, %v795_v17  ;;  %v826_v62 = vsel %vm823_vm11, %v4490_v9, %v4505_v28  ;;  %s5122_s28 = smov 66  }
  0xfd   : > { %v4510_v18 = vunpack.i.h.bf16 %v6088_v3  ;;  %v4509_v23 = vunpack.i.l.bf16 %v6088_v3  ;;  %v1009_v26 = vsel %vm955_vm5, %v1002_v30, %v825_v25  ;;  %v1023_v63 = vsel %vm8129_vm12, %v856_v2, %v887_v43 }
  0xfe   : > { %v4523_v46 = vpop.permute.xlu1 %4522  ;;  %v855_v41 = vsel %vm854_vm13, %v4514_v55, %v4494_v56  ;;  %v857_v17 = vsel %vm854_vm13, %v4495_v1, %v4515_v8  ;;  %v1016_v1 = vsel %vm963_vm9, %v1009_v26, %v856_v2  ;;  %vm1201_vm2 = vcmask 252928  }
  0xff   : > { %v828_v57 = vsel %vm823_vm11, %v4509_v23, %v4510_v18  ;;  %v4525_v20 = vunpack.i.h.bf16 %v4523_v46  ;;  %v4524_v15 = vunpack.i.l.bf16 %v4523_v46  ;;  %v827_v10 = vsel %vm823_vm11, %v4505_v28, %v4509_v23 }
 0x100   : > { %1255 = vperm.xlu0 %4661, %v1252_v47   ;;  %v1012_v31 = vsel %vm955_vm5, %v1005_v11, %v828_v57  ;;  %v6106_v16 = vpop.permute.xlu0 %4517  ;;  %v824_v11 = vsel %vm823_vm11, %v4504_v52, %v4489_v5  ;;  %v1010_v28 = vsel %vm955_vm5, %v1003_v13, %v826_v62 }
 0x101   : > { %v4520_v49 = vunpack.i.h.bf16 %v6106_v16  ;;  %v4519_v37 = vunpack.i.l.bf16 %v6106_v16  ;;  %v886_v34 = vsel %vm885_vm1, %v4524_v15, %v4499_v6  ;;  %v888_v5 = vsel %vm885_vm1, %v4500_v60, %v4525_v20 }
 0x102   : > { %v4533_v47 = vpop.permute.xlu1 %4532  ;;  %v1011_v6 = vsel %vm955_vm5, %v1004_v14, %v827_v10  ;;  %v1008_v60 = vsel %vm955_vm5, %v1001_v40, %v824_v11  ;;  %v1022_v55 = vsel %vm8129_vm12, %v855_v41, %v886_v34  ;;  %v1024_v40 = vsel %vm8129_vm12, %v857_v17, %v888_v5 }
 0x103   : > { %v859_v44 = vsel %vm854_vm13, %v4519_v37, %v4520_v49  ;;  %v858_v30 = vsel %vm854_vm13, %v4515_v8, %v4519_v37  ;;  %v4535_v48 = vunpack.i.h.bf16 %v4533_v47  ;;  %v4534_v23 = vunpack.i.l.bf16 %v4533_v47 }
 0x104   : > { %v6128_v9 = vpop.permute.xlu0 %4527  ;;  %v6132_v33 = vsel %vm963_vm9, %v1012_v31, %v859_v44  ;;  %v1018_v62 = vsel %vm963_vm9, %v1011_v6, %v858_v30  ;;  %v1015_v26 = vsel %vm963_vm9, %v1008_v60, %v855_v41  ;;  %v1017_v10 = vsel %vm963_vm9, %v1010_v28, %v857_v17 }
 0x105   : > { %v8123_v25 = vunpack.i.h.bf16 %v6128_v9  ;;  %v4529_v56 = vunpack.i.l.bf16 %v6128_v9  ;;  %v918_v8 = vsel %vm916_vm6, %v4534_v23, %v4535_v48 }
 0x106   : > { %v6147_v31 = vpop.permute.xlu1 %4542  ;;  %v1030_v46 = vsel %vm8128_vm14, %v1023_v63, %v918_v8 }
 0x107   : > { %v889_v52 = vsel %vm885_vm1, %v4525_v20, %v4529_v56  ;;  %v890_v43 = vsel %vm885_vm1, %v4529_v56, %v8123_v25  ;;  %v8124_v13 = vunpack.i.h.bf16 %v6147_v31  ;;  %v4544_v20 = vunpack.i.l.bf16 %v6147_v31 }
 0x108   : > { %v1026_v57 = vsel %vm8129_vm12, %v859_v44, %v890_v43  ;;  %v4538_v2 = vpop.permute.xlu0 %4537  ;;  %v1025_v14 = vsel %vm8129_vm12, %v858_v30, %v889_v52  ;;  %v3852_v11 = vpack.c.bf16 %v1030_v46, %v1016_v1 }
 0x109   : > { %v4540_v15 = vunpack.i.h.bf16 %v4538_v2  ;;  %v4539_v37 = vunpack.i.l.bf16 %v4538_v2  ;;  %v921_v63 = vsel %vm916_vm6, %v4544_v20, %v8124_v13 }
 0x10a   : > { %3853 = vmatprep.subr.bf16.mxu0 %v3852_v11  ;;  %v6167_v41 = vsel %vm8128_vm14, %v1026_v57, %v921_v63 }
 0x10b   : > { %v920_v44 = vsel %vm916_vm6, %v4540_v15, %v4544_v20  ;;  %v917_v34 = vsel %vm916_vm6, %v4539_v37, %v4534_v23  ;;  %v919_v5 = vsel %vm916_vm6, %v4535_v48, %v4540_v15 }
 0x10c   : > { %v1032_v47 = vsel %vm8128_vm14, %v1025_v14, %v920_v44  ;;  %v1029_v56 = vsel %vm8128_vm14, %v1022_v55, %v917_v34  ;;  %v1031_v30 = vsel %vm8128_vm14, %v1024_v40, %v919_v5  ;;  %vm5119_vm14 = vmmov 1  }
 0x10d   : > { %v3874_v17 = vpack.c.bf16 %v1032_v47, %v1018_v62  ;;  %v3854_v1 = vpack.c.bf16 %v1029_v56, %v1015_v26  ;;  %v3876_v6 = vpack.c.bf16 %v1031_v30, %v1017_v10  ;;  %vm6222_vm12 = vmpackc.low %vm931_vm7, %vm5119_vm14  ;;  %vm1258_vm14 = vcmask 613376  }
 0x10f   : > { %3875 = vmatprep.subr.bf16.mxu1 %v3874_v17  ;;  %3855 = vmatpush1.bf16.msra.mxu0 %v3854_v1 }
 0x110   : > { %3877 = vmatpush1.bf16.msra.mxu1 %v3876_v6 }
 0x13e   : > { %v6171_v48 = vpop.permute.xlu1 %4552  ;;  %v6173_v23 = vpop.permute.xlu0 %4547 }
 0x13f   : > { %v8122_v2 = vunpack.i.h.bf16 %v6171_v48  ;;  %v4554_v46 = vunpack.i.l.bf16 %v6171_v48  ;;  %v4550_v14 = vunpack.i.h.bf16 %v6173_v23  ;;  %v4549_v40 = vunpack.i.l.bf16 %v6173_v23 }
 0x141   : > { %v1226_v47 = vsel %vm1201_vm2, %v4554_v46, %v8122_v2  ;;  %v1224_v56 = vsel %vm1201_vm2, %v4549_v40, %v4550_v14 }
 0x142   : > { %v6175_v28 = vpop.permute.xlu1 %4567 }
 0x143   : > { %v4558_v52 = vpop.permute.xlu0 %4557  ;;  %v4570_v55 = vunpack.i.h.bf16 %v6175_v28  ;;  %v4569_v57 = vunpack.i.l.bf16 %v6175_v28 }
 0x144   : > { %v4560_v20 = vunpack.i.h.bf16 %v4558_v52  ;;  %v4559_v15 = vunpack.i.l.bf16 %v4558_v52 }
 0x145   : > { %v1217_v62 = vsel %vm1201_vm2, %v4569_v57, %v4570_v55 }
 0x146   : > { %v6177_v43 = vpop.permute.xlu1 %4572  ;;  %v1203_v30 = vsel %vm1201_vm2, %v4559_v15, %v4560_v20 }
 0x147   : > { %v4563_v8 = vpop.permute.xlu0 %4562  ;;  %v4575_v63 = vunpack.i.h.bf16 %v6177_v43  ;;  %v4574_v1 = vunpack.i.l.bf16 %v6177_v43 }
 0x148   : > { %v4565_v44 = vunpack.i.h.bf16 %v4563_v8  ;;  %v4564_v34 = vunpack.i.l.bf16 %v4563_v8  ;;  %v3860_v8 = vpack.c.bf16 %v1224_v56, %v1217_v62 }
 0x149   : > { %v1218_v13 = vsel %vm1201_vm2, %v4570_v55, %v4575_v63 }
 0x14a   : > { %v4583_v37 = vpop.permute.xlu1 %4582  ;;  %v1202_v32 = vsel %vm1201_vm2, %v4564_v34, %v4559_v15 }
 0x14b   : > { %v6185_v11 = vpop.permute.xlu0 %4577  ;;  %v4585_v26 = vunpack.i.h.bf16 %v4583_v37  ;;  %v4584_v10 = vunpack.i.l.bf16 %v4583_v37 }
 0x14c   : > { %v8127_v5 = vunpack.i.l.bf16 %v6185_v11  ;;  %v4580_v6 = vunpack.i.h.bf16 %v6185_v11 }
 0x14d   : > { %v1210_v17 = vsel %vm1201_vm2, %v4584_v10, %v4585_v26 }
 0x14e   : > { %v6198_v23 = vpop.permute.xlu1 %4587  ;;  %v3856_v52 = vpack.c.bf16 %v1210_v17, %v1203_v30  ;;  %v1219_v43 = vsel %vm1201_vm2, %v4575_v63, %v8127_v5  ;;  %v1204_v30 = vsel %vm1201_vm2, %v4560_v20, %v4565_v44  ;;  %v1223_v54 = vsel %vm1201_vm2, %v4580_v6, %v4549_v40 }
 0x14f   : > { %v6200_v28 = vpop.permute.xlu0 %4592  ;;  %v4590_v37 = vunpack.i.h.bf16 %v6198_v23  ;;  %v4589_v2 = vunpack.i.l.bf16 %v6198_v23  ;;  %v3882_v6 = vpack.c.bf16 %v1226_v47, %v1219_v43 }
 0x150   : > { %v4595_v60 = vunpack.i.h.bf16 %v6200_v28  ;;  %v4594_v25 = vunpack.i.l.bf16 %v6200_v28  ;;  %3857 = vmatprep.subr.bf16.mxu0 %v3856_v52 }
 0x151   : > { %v1209_v62 = vsel %vm1201_vm2, %v4590_v37, %v4584_v10  ;;  %v1205_v56 = vsel %vm1201_vm2, %v4565_v44, %v4589_v2 }
 0x152   : > { %v1212_v17 = vsel %vm1201_vm2, %v4594_v25, %v4595_v60  ;;  %v1211_v55 = vsel %vm1201_vm2, %v4585_v26, %v4594_v25  ;;  %v4598_v63 = vpop.permute.xlu1 %4597  ;;  %v3858_v5 = vpack.c.bf16 %v1209_v62, %v1202_v32  ;;  %v8195_v25 = vld [vmem:[#allocation14_spill] sm:$0xff]  ;;  %v1216_v62 = vsel %vm1201_vm2, %v4574_v1, %v4569_v57 }
 0x153   : > { %v3878_v15 = vpack.c.bf16 %v1212_v17, %v1205_v56  ;;  %v3880_v10 = vpack.c.bf16 %v1211_v55, %v1204_v30  ;;  %v4600_v44 = vunpack.i.h.bf16 %v4598_v63  ;;  %v4599_v34 = vunpack.i.l.bf16 %v4598_v63 }
 0x154   : > { %v547_v52 = vpop.permute.xlu0 %546  ;;  %3859 = vmatpush1.bf16.msra.mxu0 %v3858_v5  ;;  %v1225_v30 = vsel %vm1201_vm2, %v4550_v14, %v4554_v46 }
 0x155   : > { %v554_v37 = vsel %vm548_vm15, %v4440_v29, %v547_v52  ;;  %v962_v40 = vsel %vm955_vm5, %v8195_v25, %v547_v52  ;;  %3879 = vmatprep.subr.bf16.mxu1 %v3878_v15  ;;  %3862 = vmatprep.subr.msk.bf16.mxu0 %vm6222_vm12, %v3860_v8  ;;  %v735_v29 = vsel %vm728_vm0, %v4599_v34, %v4600_v44 }
 0x156   : > { %v961_v32 = vsel %vm955_vm5, %v5807_v35, %v554_v37  ;;  %v970_v26 = vsel %vm963_vm9, %v962_v40, %v5888_v7  ;;  %3881 = vmatpush1.bf16.msra.mxu1 %v3880_v10  ;;  %v4608_v56 = vpop.permute.xlu1 %4607  ;;  %v3863_v35 = vpack.c.bf16 %v1223_v54, %v1216_v62  ;;  %v3885_v7 = vpack.c.bf16 %v1225_v30, %v1218_v13  ;;  %v6254_v54 = vld [vmem:[%s8196_s1] sm:$0x3f] }
 0x157   : > { %v3911_v58 = vpack.c.bf16 %v970_v26, %v5789_v51  ;;  %3884 = vmatprep.subr.msk.bf16.mxu1 %vm6222_vm12, %v3882_v6  ;;  %v969_v5 = vsel %vm963_vm9, %v961_v32, %v5827_v12  ;;  %v734_v57 = vsel %vm728_vm0, %v4455_v45, %v4599_v34  ;;  %v4610_v51 = vunpack.i.h.bf16 %v4608_v56 }
 0x158   : > { %v4609_v46 = vunpack.i.l.bf16 %v4608_v56  ;;  %v4603_v14 = vpop.permute.xlu0 %4602  ;;  %v3888_v47 = vpack.c.bf16 %v969_v5, %v5867_v42  ;;  %3865 = vmatpush1.bf16.msk.msra.mxu0 %vm6222_vm12, %v3863_v35  ;;  %v993_v12 = vsel %vm931_vm7, %v6072_v21, %v735_v29  ;;  %v8134_v13 = vmov 0.0|0.0  }
 0x159   : > { %v4605_v1 = vunpack.i.h.bf16 %v4603_v14  ;;  %v4604_v8 = vunpack.i.l.bf16 %v4603_v14  ;;  %v992_v17 = vsel %vm931_vm7, %v6078_v39, %v734_v57  ;;  %vm8130_vm7 = vmmov 0  }
 0x15a   : > { %3887 = vmatpush1.bf16.msk.msra.mxu1 %vm6222_vm12, %v3885_v7  ;;  %3889 = vmatprep.subr.bf16.mxu0 %v3888_v47  ;;  %v799_v42 = vsel %vm792_vm10, %v4609_v46, %v4610_v51  ;;  %v4618_v45 = vpop.permute.xlu1 %4617  ;;  %v798_v21 = vsel %vm792_vm10, %v4485_v38, %v4609_v46  ;;  %v8198_v32 = vpack.c.bf16 %v6027_v50, %v5781_v22  ;;  %v8199_v6 = vunpack.i.h.bf16 %v6147_v31 }
 0x15b   : > { %v767_v19 = vsel %vm760_vm4, %v4604_v8, %v4605_v1  ;;  %3910 = vmatprep.subr.bf16.mxu1 %v8134_v13  ;;  %v766_v43 = vsel %vm760_vm4, %v4470_v53, %v4604_v8  ;;  %v4620_v55 = vunpack.i.h.bf16 %v4618_v45  ;;  %v4619_v63 = vunpack.i.l.bf16 %v4618_v45  ;;  %3519 = vmatmul.mubr.msk.f32.vlgmr.msra.gmra.mrb[0].mxu0 %vm1258_vm14, %v6254_v54 }
 0x15c   : > { %v999_v15 = vsel %vm939_vm8, %v992_v17, %v766_v43  ;;  %3891 = vmatpush1.bf16.msra.mxu0 %v3890_v59  ;;  %v1000_v53 = vsel %vm939_vm8, %v993_v12, %v767_v19  ;;  %v1007_v27 = vsel %vm947_vm3, %v767_v19, %v799_v42  ;;  %v8200_v62 = vunpack.i.h.bf16 %v6128_v9 }
 0x15d   : > { %3522 = vmatmul.mubr.msk.f32.vlgmr.msra.gmra.mrb[0].mxu1 %vm1258_vm14, %v6254_v54  ;;  %v3892_v4 = vpack.c.bf16 %v999_v15, %v6053_v36  ;;  %v861_v38 = vsel %vm854_vm13, %v4619_v63, %v4620_v55  ;;  %v3914_v39 = vpack.c.bf16 %v1000_v53, %v6031_v61  ;;  %v860_v34 = vsel %vm854_vm13, %v4520_v49, %v4619_v63 }
 0x15e   : > { %v4613_v52 = vpop.permute.xlu0 %4612  ;;  %3912 = vmatpush3.bf16.msra.mxu1 %v3911_v58  ;;  %v1006_v36 = vsel %vm947_vm3, %v766_v43, %v798_v21  ;;  %v8197_v49 = vmov 0.0   ;;  %vm8201_vm0 = vcmask 1041408   ;;  %vm8203_vm13 = vcmask 1044480  }
 0x15f   : > { %v4615_v10 = vunpack.i.h.bf16 %v4613_v52  ;;  %v4614_v44 = vunpack.i.l.bf16 %v4613_v52  ;;  %3893 = vmatprep.subr.bf16.mxu0 %v3892_v4  ;;  %v4628_v59 = vpop.permute.xlu1 %4627  ;;  %3913 = vmatprep.subr.bf16.mxu1 %v8134_v13  ;;  %vm8202_vm10 = vmmov %vm8201_vm0  ;;  %v8205_v63 = vpack.c.bf16 %v6167_v41, %v6132_v33  ;;  %v8206_v33 = vunpack.i.l.bf16 %v6185_v11 }
 0x160   : > { %v4630_v25 = vunpack.i.h.bf16 %v4628_v59  ;;  %v4629_v61 = vunpack.i.l.bf16 %v4628_v59  ;;  %3762 = vmatprep.mubr.msk.f32.mxu1 %vm8130_vm7, %v8197_v49  ;;  %1482 = vmatprep.mubr.f32.mxu0 %v8197_v49  ;;  %vm8204_vm7 = vmmov %vm8203_vm13 }
 0x161   : > { %v829_v0 = vsel %vm823_vm11, %v4510_v18, %v4614_v44  ;;  %v830_v24 = vsel %vm823_vm11, %v4614_v44, %v4615_v10  ;;  %3895 = vmatpush1.bf16.msra.mxu0 %v8198_v32 }
 0x162   : > { %v1014_v37 = vsel %vm955_vm5, %v1007_v27, %v830_v24  ;;  %v4623_v40 = vpop.permute.xlu0 %4622  ;;  %v1013_v16 = vsel %vm955_vm5, %v1006_v36, %v829_v0  ;;  %v923_v26 = vsel %vm916_vm6, %v4629_v61, %v4630_v25  ;;  %3915 = vmatpush3.bf16.msra.mxu1 %v3914_v39  ;;  %v922_v30 = vsel %vm916_vm6, %v8199_v6, %v4629_v61 }
 0x163   : > { %v4625_v3 = vunpack.i.h.bf16 %v4623_v40  ;;  %v4624_v18 = vunpack.i.l.bf16 %v4623_v40  ;;  %v4638_v56 = vpop.permute.xlu1 %4637  ;;  %3916 = vmatprep.subr.bf16.mxu1 %v8134_v13  ;;  %v1020_v35 = vsel %vm963_vm9, %v1013_v16, %v860_v34  ;;  %v1021_v22 = vsel %vm963_vm9, %v1014_v37, %v861_v38 }
 0x164   : > { %v4640_v7 = vunpack.i.h.bf16 %v4638_v56  ;;  %v4639_v5 = vunpack.i.l.bf16 %v4638_v56  ;;  %v8207_v24 = vunpack.i.h.bf16 %v6171_v48 }
 0x165   : > { %v891_v58 = vsel %vm885_vm1, %v8200_v62, %v4624_v18  ;;  %v892_v29 = vsel %vm885_vm1, %v4624_v18, %v4625_v3 }
 0x166   : > { %v1028_v50 = vsel %vm8201_vm0, %v861_v38, %v892_v29  ;;  %v4633_v31 = vpop.permute.xlu0 %4632  ;;  %v1027_v57 = vsel %vm8202_vm10, %v860_v34, %v891_v58  ;;  %v1214_v8 = vsel %vm1201_vm2, %v4639_v5, %v4640_v7  ;;  %v1213_v19 = vsel %vm1201_vm2, %v4595_v60, %v4639_v5 }
 0x167   : > { %v4635_v51 = vunpack.i.h.bf16 %v4633_v31  ;;  %v4634_v9 = vunpack.i.l.bf16 %v4633_v31  ;;  %v1034_v46 = vsel %vm8203_vm13, %v1027_v57, %v922_v30  ;;  %v1035_v14 = vsel %vm8204_vm7, %v1028_v50, %v923_v26  ;;  %v4648_v12 = vpop.permute.xlu1 %4647 }
 0x168   : > { %v3896_v47 = vpack.c.bf16 %v1034_v46, %v1020_v35  ;;  %v3917_v1 = vpack.c.bf16 %v1035_v14, %v1021_v22  ;;  %v4649_v52 = vunpack.i.l.bf16 %v4648_v12  ;;  %v4650_v28 = vunpack.i.h.bf16 %v4648_v12 }
 0x169   : > { %v1207_v42 = vsel %vm1201_vm2, %v4634_v9, %v4635_v51  ;;  %v1206_v45 = vsel %vm1201_vm2, %v4589_v2, %v4634_v9  ;;  %vm8217_vm10 = vcmask 785408  }
 0x16a   : > { %v4643_v43 = vpop.permute.xlu0 %4642  ;;  %3897 = vmatprep.subr.bf16.mxu0 %v3896_v47  ;;  %3918 = vmatpush3.bf16.msra.mxu1 %v3917_v1  ;;  %v3900_v17 = vpack.c.bf16 %v1214_v8, %v1207_v42  ;;  %v3902_v15 = vpack.c.bf16 %v1213_v19, %v1206_v45  ;;  %v1220_v41 = vsel %vm1201_vm2, %v8206_v33, %v4649_v52  ;;  %vm8218_vm13 = vmmov %vm8217_vm10 }
 0x16b   : > { %v4645_v21 = vunpack.i.h.bf16 %v4643_v43  ;;  %v4644_v55 = vunpack.i.l.bf16 %v4643_v43  ;;  %3899 = vmatpush1.bf16.msra.mxu0 %v8205_v63  ;;  %3919 = vmatprep.subr.bf16.mxu1 %v8134_v13  ;;  %v4658_v2 = vpop.permute.xlu1 %4657  ;;  %v1221_v34 = vsel %vm1201_vm2, %v4649_v52, %v4650_v28 }
 0x16c   : > { %3901 = vmatprep.subr.bf16.mxu0 %v3900_v17  ;;  %v4660_v10 = vunpack.i.h.bf16 %v4658_v2  ;;  %v4659_v44 = vunpack.i.l.bf16 %v4658_v2 }
 0x16d   : > { %v1215_v60 = vsel %vm1201_vm2, %v4640_v7, %v4645_v21  ;;  %v1208_v23 = vsel %vm1201_vm2, %v4635_v51, %v4644_v55 }
 0x16e   : > { %v4653_v4 = vpop.permute.xlu0 %4652  ;;  %v3920_v53 = vpack.c.bf16 %v1215_v60, %v1208_v23  ;;  %v1222_v39 = vsel %vm1201_vm2, %v4650_v28, %v4659_v44 }
 0x16f   : > { %v4655_v27 = vunpack.i.h.bf16 %v4653_v4  ;;  %v4654_v38 = vunpack.i.l.bf16 %v4653_v4  ;;  %3903 = vmatpush1.bf16.msra.mxu0 %v3902_v15 }
 0x170   : > { %3921 = vmatpush3.bf16.msra.mxu1 %v3920_v53 }
 0x171   : > { %v1229_v0 = vsel %vm1201_vm2, %v4655_v27, %v4660_v10  ;;  %v1227_v59 = vsel %vm1201_vm2, %v8207_v24, %v4654_v38  ;;  %v1228_v36 = vsel %vm1201_vm2, %v4654_v38, %v4655_v27  ;;  %3922 = vmatprep.subr.bf16.mxu1 %v8134_v13  ;;  %vm8209_vm2 = vcmask 1039360  }
 0x172   : > { %v3923_v37 = vpack.c.bf16 %v1229_v0, %v1222_v39  ;;  %v3907_v25 = vpack.c.bf16 %v1227_v59, %v1220_v41  ;;  %v3904_v11 = vpack.c.bf16 %v1228_v36, %v1221_v34  ;;  %vm8211_vm9 = vmmov %vm8209_vm2 }
 0x173   : > { %vm8214_vm7 = vmmov %vm8209_vm2 }
 0x174   : > { %3906 = vmatprep.subr.msk.bf16.mxu0 %vm6222_vm12, %v3904_v11  ;;  %3925 = vmatpush3.bf16.msk.msra.mxu1 %vm6222_vm12, %v3923_v37  ;;  %vm8215_vm0 = vmmov %vm8209_vm2 }
 0x175   : > { %3909 = vmatpush1.bf16.msk.msra.mxu0 %vm6222_vm12, %v3907_v25  ;;  %vm8212_vm12 = vmmov %vm8209_vm2 }
 0x177   : > { %3763 = vmatmul.mubr.msk.f32.vlgmr.msra.gmra.mrb[2].mxu1 %vm1258_vm14, %v6254_v54 }
 0x178   : > { %3525 = vmatmul.mubr.msk.f32.vlgmr.msra.gmra.mrb[2].mxu0 %vm1258_vm14, %v6254_v54  ;;  %vm8213_vm14 = vmmov %vm8209_vm2 }
 0x17f   : > { %v1256_v48 = vpop.permute.xlu0 %1255 }
 0x22e   : > { %v1342_v61 = vpop.f32.mrb[0].mxu0 }
 0x22f   : > { %v1344_v16 = vpop.f32.mrb[1].mxu0  ;;  %v1343_v30 = vadd.f32 %v1342_v61, %v1256_v48 }
 0x230   : > { %v1413_v40 = vpop.f32.mrb[0].mxu1  ;;  %v1345_v62 = vadd.f32 %v1344_v16, %v1256_v48 }
 0x231   : > { %v1414_v3 = vadd.f32 %v1413_v40, %v1256_v48  ;;  %v1415_v18 = vpop.f32.mrb[1].mxu1  ;;  %v1559_v7 = vmax.f32 %v1343_v30, 0.0 }
 0x232   : > { %v1416_v32 = vadd.f32 %v1415_v18, %v1256_v48  ;;  %v1560_v5 = vmax.f32 %v1345_v62, 0.0 }
 0x233   : > { %v1561_v26 = vmax.f32 %v1414_v3, 0.0 }
 0x234   : > { %v1562_v6 = vmax.f32 %v1416_v32, 0.0  ;;  %v4662_v51 = vpack.i.bf16 %v1559_v7, %v1560_v5 }
 0x235   : > { %1577 = vrot.lane.b32.xlu1 %v1561_v26, %s8208_s20 }
 0x239   : > { %1579 = vrot.lane.b32.xlu1 %v1562_v6, %s8208_s20 }
 0x24a   : > { %v1555_v20 = vpop.f32.mrb[2].mxu1 }
 0x24b   : > { %v1484_v58 = vpop.f32.mrb[2].mxu0  ;;  %v3764_v29 = vpop.f32.mrb[3].mxu1  ;;  %v1556_v22 = vadd.f32 %v1555_v20, %v1256_v48 }
 0x24c   : > { %v1485_v56 = vadd.f32 %v1484_v58, %v1256_v48  ;;  %v1486_v54 = vpop.f32.mrb[3].mxu0 }
 0x24d   : > { %v1487_v35 = vadd.f32 %v1486_v54, %v1256_v48  ;;  %v1565_v57 = vmax.f32 %v1556_v22, 0.0 }
 0x24e   : > { %v1563_v50 = vmax.f32 %v1485_v56, 0.0 }
 0x24f   : > { %v1564_v31 = vmax.f32 %v1487_v35, 0.0 }
 0x250   : > { %1581 = vrot.lane.b32.xlu0 %v1563_v50, %s8208_s20 }
 0x251   : > { %1583 = vrot.lane.b32.xlu1 %v1564_v31, %s8208_s20 }
 0x254   : > { %1585 = vrot.lane.b32.xlu0 %v1565_v57, %s8208_s20 }
 0x255   : > { %4663 = vrot.lane.b32.xlu1 %v4662_v51, %s8208_s20  ;;  %s5124_s20 = smov 120  }
 0x2a7   : > { %v1578_v9 = vpop.permute.xlu1 %1577 }
 0x2ab   : > { %v1580_v46 = vpop.permute.xlu1 %1579 }
 0x2ac   : > { %v1589_v14 = vsel %vm8209_vm2, %v1578_v9, %v1580_v46  ;;  %vm8219_vm2 = vmmov %vm8217_vm10 }
 0x2ad   : > { %v1602_v47 = vmax.f32 %v1561_v26, %v1589_v14 }
 0x2af   : > { %1618 = vrot.lane.b32.xlu0 %v1602_v47, %s8210_s16 }
 0x2c2   : > { %v1582_v1 = vpop.permute.xlu0 %1581 }
 0x2c3   : > { %v1590_v8 = vsel %vm8211_vm9, %v1580_v46, %v1582_v1  ;;  %v1584_v12 = vpop.permute.xlu1 %1583  ;;  %vm8221_vm9 = vmmov %vm8219_vm2 }
 0x2c4   : > { %v1591_v42 = vsel %vm8212_vm12, %v1582_v1, %v1584_v12  ;;  %v1603_v19 = vmax.f32 %v1562_v6, %v1590_v8  ;;  %vm8222_vm12 = vmmov %vm8219_vm2 }
 0x2c5   : > { %v1604_v45 = vmax.f32 %v1563_v50, %v1591_v42 }
 0x2c6   : > { %v1586_v43 = vpop.permute.xlu0 %1585  ;;  %1620 = vrot.lane.b32.xlu1 %v1603_v19, %s8210_s16 }
 0x2c7   : > { %v1592_v17 = vsel %vm8213_vm14, %v1584_v12, %v1586_v43  ;;  %1622 = vrot.lane.b32.xlu0 %v1604_v45, %s8210_s16  ;;  %v4664_v21 = vpop.permute.xlu1 %4663  ;;  %v1606_v15 = vmax.f32 %v1565_v57, %v1586_v43  ;;  %vm8223_vm14 = vmmov %vm8219_vm2 }
 0x2c8   : > { %v4666_v55 = vunpack.i.h.bf16 %v4664_v21  ;;  %v4665_v63 = vunpack.i.l.bf16 %v4664_v21  ;;  %v1605_v52 = vmax.f32 %v1564_v31, %v1592_v17 }
 0x2ca   : > { %1624 = vrot.lane.b32.xlu1 %v1605_v52, %s8210_s16  ;;  %v1587_v28 = vsel %vm8214_vm7, %v4666_v55, %v4665_v63  ;;  %v1588_v60 = vsel %vm8215_vm0, %v4665_v63, %v1578_v9  ;;  %vm8229_vm7 = vcmask 1041408   ;;  %vm1828_vm0 = vcmask 474112  }
 0x2cb   : > { %v1600_v23 = vmax.f32 %v1559_v7, %v1587_v28  ;;  %v1601_v2 = vmax.f32 %v1560_v5, %v1588_v60 }
 0x2cd   : > { %v4667_v10 = vpack.i.bf16 %v1600_v23, %v1601_v2 }
 0x2ce   : > { %1626 = vrot.lane.b32.xlu1 %v1606_v15, %s8210_s16 }
 0x2cf   : > { %4668 = vrot.lane.b32.xlu0 %v4667_v10, %s8210_s16 }
 0x321   : > { %v1619_v4 = vpop.permute.xlu0 %1618 }
 0x338   : > { %v1621_v44 = vpop.permute.xlu1 %1620 }
 0x339   : > { %v1623_v27 = vpop.permute.xlu0 %1622  ;;  %v1630_v3 = vsel %vm8219_vm2, %v1619_v4, %v1621_v44  ;;  %vm8233_vm2 = vcmask 1031168  }
 0x33a   : > { %v6404_v32 = vmax.f32 %v1602_v47, %v1630_v3  ;;  %v1631_v20 = vsel %vm8221_vm9, %v1621_v44, %v1623_v27  ;;  %vm8234_vm9 = vmmov %vm8233_vm2 }
 0x33b   : > { %v6415_v58 = vmax.f32 %v1603_v19, %v1631_v20 }
 0x33c   : > { %v1625_v53 = vpop.permute.xlu1 %1624  ;;  %v1655_v5 = vrot.slane %v6404_v32, 2  ;;  %v1703_v51 = vrot.slane %v6404_v32, 6  ;;  %v6463_v19 = vrot.slane %v6404_v32, 4 }
 0x33d   : > { %v1632_v62 = vsel %vm8223_vm14, %v1623_v27, %v1625_v53  ;;  %v4697_v22 = vpack.i.bf16 %v6415_v58, %v6404_v32  ;;  %v1656_v1 = vrot.slane %v6415_v58, 2  ;;  %v1704_v63 = vrot.slane %v6415_v58, 6  ;;  %vm8235_vm14 = vmmov %vm8233_vm2 }
 0x33e   : > { %v6424_v35 = vmax.f32 %v1604_v45, %v1632_v62  ;;  %v6466_v45 = vrot.slane %v6415_v58, 4 }
 0x33f   : > { %v4727_v42 = vpack.i.bf16 %v1656_v1, %v1655_v5  ;;  %v4747_v28 = vpack.i.bf16 %v1704_v63, %v1703_v51 }
 0x340   : > { %v1627_v38 = vpop.permute.xlu1 %1626  ;;  %v1657_v14 = vrot.slane %v6424_v35, 2  ;;  %v6458_v8 = vrot.slane %v6424_v35, 4  ;;  %v1705_v43 = vrot.slane %v6424_v35, 6  ;;  %v4737_v21 = vpack.i.bf16 %v6466_v45, %v6463_v19 }
 0x341   : > { %v6369_v33 = vmax.f32 %v1606_v15, %v1627_v38  ;;  %v4669_v41 = vpop.permute.xlu0 %4668  ;;  %v1633_v30 = vsel %vm8222_vm12, %v1625_v53, %v1627_v38  ;;  %v4797_v53 = vpack.i.bf16 %v6463_v19, %v6424_v35  ;;  %vm1716_vm12 = vcmask 998400  }
 0x342   : > { %v4671_v39 = vunpack.i.h.bf16 %v4669_v41  ;;  %v4670_v34 = vunpack.i.l.bf16 %v4669_v41  ;;  %v6417_v29 = vmax.f32 %v1605_v52, %v1633_v30 }
 0x343   : > { %8216 = vst [vmem:[#allocation7_spill] sm:$0xff] %v6369_v33  ;;  %2064 = vrot.lane.b32.xlu1 %v6369_v33, %s5122_s28  ;;  %v2037_v37 = vrot.slane %v6369_v33, 4  ;;  %v2027_v11 = vrot.slane %v6369_v33, 2  ;;  %v6402_v18 = vrot.slane %v6369_v33, 6 }
 0x344   : > { %v1629_v0 = vsel %vm8217_vm10, %v4670_v34, %v1619_v4  ;;  %v1628_v59 = vsel %vm8218_vm13, %v4671_v39, %v4670_v34  ;;  %v6432_v50 = vpack.i.bf16 %v6417_v29, %v6424_v35  ;;  %v6475_v55 = vrot.slane %v6417_v29, 2 }
 0x345   : > { %v6374_v24 = vmax.f32 %v1601_v2, %v1629_v0  ;;  %v6387_v48 = vmax.f32 %v1600_v23, %v1628_v59  ;;  %8220 = vst [vmem:[#allocation11_spill] sm:$0xff] %v6402_v18  ;;  %v6482_v60 = vrot.slane %v6417_v29, 4  ;;  %v1793_v10 = vrot.slane %v6417_v29, 6 }
 0x346   : > { %8225 = vst [vmem:[#allocation5_spill] sm:$0xff] %v6475_v55  ;;  %v4762_v52 = vpack.i.bf16 %v6475_v55, %v1657_v14  ;;  %v4767_v15 = vpack.i.bf16 %v2027_v11, %v6475_v55  ;;  %vm1736_vm10 = vcmask 982016   ;;  %vm2066_vm13 = vcmask 539648  }
 0x347   : > { %2095 = vrot.lane.b32.xlu1 %v6369_v33, %s5123_s17  ;;  %v6380_v36 = vrot.slane %v6374_v24, 4  ;;  %v6384_v25 = vrot.slane %v6374_v24, 2  ;;  %v6396_v16 = vrot.slane %v6374_v24, 6  ;;  %v1677_v6 = vrot.slane %v6387_v48, 4  ;;  %8226 = vst [vmem:[#allocation9_spill] sm:$0xff] %v6482_v60 }
 0x348   : > { %v4692_v56 = vpack.i.bf16 %v6404_v32, %v6374_v24  ;;  %v1701_v7 = vrot.slane %v6387_v48, 6  ;;  %v1653_v57 = vrot.slane %v6387_v48, 2  ;;  %v4707_v9 = vpack.i.bf16 %v6415_v58, %v6387_v48 }
 0x349   : > { %v4677_v61 = vpack.i.bf16 %v6380_v36, %v2037_v37  ;;  %v4672_v40 = vpack.i.bf16 %v6384_v25, %v2027_v11  ;;  %v4682_v26 = vpack.i.bf16 %v6396_v16, %v6402_v18  ;;  %v4687_v54 = vpack.i.bf16 %v6404_v32, %v1677_v6 }
 0x34a   : > { %v4717_v31 = vpack.i.bf16 %v1655_v5, %v1701_v7  ;;  %v4722_v46 = vpack.i.bf16 %v1703_v51, %v1653_v57  ;;  %v4732_v47 = vpack.i.bf16 %v6384_v25, %v1657_v14  ;;  %v4742_v12 = vpack.i.bf16 %v6380_v36, %v6458_v8 }
 0x34b   : > { %4678 = vrot.lane.b32.xlu1 %v4677_v61, %s5113_s18  ;;  %4673 = vrot.lane.b32.xlu0 %v4672_v40, %s8150_s29  ;;  %v4752_v17 = vpack.i.bf16 %v6396_v16, %v1705_v43  ;;  %v4772_v23 = vpack.i.bf16 %v2037_v37, %v6482_v60  ;;  %v4782_v2 = vpack.i.bf16 %v6482_v60, %v6458_v8 }
 0x34c   : > { %v4792_v44 = vpack.i.bf16 %v1793_v10, %v1705_v43  ;;  %v4802_v4 = vpack.i.bf16 %v6387_v48, %v6374_v24  ;;  %v4817_v27 = vpack.i.bf16 %v6374_v24, %v6415_v58  ;;  %v4807_v38 = vpack.i.bf16 %v6402_v18, %v1793_v10 }
 0x34d   : > { %v4812_v41 = vpack.i.bf16 %v1655_v5, %v6384_v25  ;;  %v4827_v39 = vpack.i.bf16 %v1656_v1, %v1653_v57  ;;  %v4832_v34 = vpack.i.bf16 %v6396_v16, %v1704_v63  ;;  %v4837_v0 = vpack.i.bf16 %v6384_v25, %v1656_v1 }
 0x34e   : > { %v4842_v59 = vpack.i.bf16 %v6380_v36, %v6466_v45 }
 0x34f   : > { %1820 = vrot.lane.b32.xlu1 %v6404_v32, %s5123_s17  ;;  %4683 = vrot.lane.b32.xlu0 %v4682_v26, %s5114_s26 }
 0x353   : > { %4693 = vrot.lane.b32.xlu0 %v4692_v56, %s5124_s20  ;;  %4688 = vrot.lane.b32.xlu1 %v4687_v54, %s5108_s19 }
 0x357   : > { %4698 = vrot.lane.b32.xlu0 %v4697_v22, %s5122_s28  ;;  %4703 = vrot.lane.b32.xlu1 %v6432_v50, %s5122_s28  ;;  %s8224_s28 = smov 126  }
 0x35b   : > { %1822 = vrot.lane.b32.xlu0 %v6415_v58, %s5123_s17  ;;  %1824 = vrot.lane.b32.xlu1 %v6424_v35, %s5123_s17 }
 0x35f   : > { %1826 = vrot.lane.b32.xlu0 %v6417_v29, %s5123_s17  ;;  %4718 = vrot.lane.b32.xlu1 %v4717_v31, %s5125_s15 }
 0x363   : > { %4708 = vrot.lane.b32.xlu0 %v4707_v9, %s5124_s20  ;;  %4723 = vrot.lane.b32.xlu1 %v4722_v46, %s8150_s29 }
 0x367   : > { %4733 = vrot.lane.b32.xlu1 %v4732_v47, %s8224_s28  ;;  %4713 = vrot.lane.b32.xlu0 %v4722_v46, %s8224_s28 }
 0x36b   : > { %4743 = vrot.lane.b32.xlu1 %v4742_v12, %s5108_s19  ;;  %4728 = vrot.lane.b32.xlu0 %v4727_v42, %s8224_s28 }
 0x36f   : > { %4753 = vrot.lane.b32.xlu1 %v4752_v17, %s5125_s15  ;;  %4738 = vrot.lane.b32.xlu0 %v4737_v21, %s5108_s19 }
 0x373   : > { %4763 = vrot.lane.b32.xlu1 %v4762_v52, %s8150_s29  ;;  %4748 = vrot.lane.b32.xlu0 %v4747_v28, %s5125_s15 }
 0x377   : > { %4773 = vrot.lane.b32.xlu1 %v4772_v23, %s5108_s19  ;;  %4758 = vrot.lane.b32.xlu0 %v4727_v42, %s8150_s29 }
 0x37b   : > { %4783 = vrot.lane.b32.xlu1 %v4782_v2, %s5113_s18  ;;  %4768 = vrot.lane.b32.xlu0 %v4767_v15, %s8224_s28 }
 0x37f   : > { %4793 = vrot.lane.b32.xlu1 %v4792_v44, %s5114_s26  ;;  %4778 = vrot.lane.b32.xlu0 %v4737_v21, %s5113_s18 }
 0x383   : > { %1794 = vrot.lane.b32.xlu1 %v1701_v7, %s5114_s26  ;;  %4788 = vrot.lane.b32.xlu0 %v4747_v28, %s5114_s26  ;;  %s5126_s26 = smov 56  }
 0x387   : > { %4803 = vrot.lane.b32.xlu1 %v4802_v4, %s5123_s17  ;;  %4798 = vrot.lane.b32.xlu0 %v4797_v53, %s5124_s20 }
 0x38b   : > { %4818 = vrot.lane.b32.xlu1 %v4817_v27, %s5108_s19  ;;  %4808 = vrot.lane.b32.xlu0 %v4807_v38, %s5125_s15 }
 0x38f   : > { %4823 = vrot.lane.b32.xlu1 %v6432_v50, %s5108_s19  ;;  %4813 = vrot.lane.b32.xlu0 %v4812_v41, %s5126_s26  ;;  %s3542_s19 = sshll.u32 %s5214_s25, 4  ;;  %s5127_s25 = smov [#allocation2]  }
 0x390   : > { %s8043_s0 = scalar_lea.hbm %s8097_s12, %s3542_s19  ;;  %s5040_s2 = sshll.u32 %s5127_s25, 4  ;;  %s5041_s2 = int_to_ptr.vmem [resolvable:$false] %s5040_s2 }
 0x393   : > { %4828 = vrot.lane.b32.xlu1 %v4827_v39, %s5126_s26  ;;  %4833 = vrot.lane.b32.xlu0 %v4832_v34, %s8224_s28 }
 0x397   : > { %1847 = vrot.lane.b32.xlu1 %v1657_v14, %s5126_s26  ;;  %4838 = vrot.lane.b32.xlu0 %v4837_v0, %s5125_s15 }
 0x39b   : > { %4848 = vrot.lane.b32.xlu1 %v4832_v34, %s8150_s29  ;;  %4843 = vrot.lane.b32.xlu0 %v4842_v59, %s5124_s20 }
 0x39f   : > { %4863 = vrot.lane.b32.xlu1 %v4782_v2, %s5124_s20  ;;  %4853 = vrot.lane.b32.xlu0 %v4792_v44, %s8224_s28 }
 0x3a3   : > { %4858 = vrot.lane.b32.xlu0 %v4762_v52, %s5125_s15  ;;  %s8298_s15 = smov 64  }
 0x3a7   : > { %4868 = vrot.lane.b32.xlu0 %v4792_v44, %s8150_s29 }
 0x3b5   : > { %v2065_v37 = vpop.permute.xlu1 %2064 }
 0x3b9   : > { %v6532_v25 = vpop.permute.xlu1 %2095 }
 0x3bd   : > { %v6534_v11 = vpop.permute.xlu1 %4678  ;;  %v6536_v61 = vpop.permute.xlu0 %4673 }
 0x3be   : > { %v6539_v40 = vunpack.i.l.bf16 %v6534_v11  ;;  %v6542_v16 = vunpack.i.l.bf16 %v6536_v61  ;;  %v8239_v33 = vunpack.i.h.bf16 %v6536_v61 }
 0x3c0   : > { %v6546_v3 = vsel %vm939_vm8, %v2065_v37, %v6542_v16  ;;  %v6551_v26 = vsel %vm955_vm5, %v6542_v16, %v6539_v40 }
 0x3c1   : > { %8227 = vst [vmem:[#allocation10_spill] sm:$0xff] %v6546_v3  ;;  %8228 = vst [vmem:[#allocation6_spill] sm:$0xff] %v6551_v26  ;;  %v6553_v20 = vpop.permute.xlu1 %1820  ;;  %v6555_v30 = vpop.permute.xlu0 %4683 }
 0x3c2   : > { %v8136_v62 = vunpack.i.l.bf16 %v6555_v30 }
 0x3c4   : > { %v6562_v56 = vsel %vm8229_vm7, %v6539_v40, %v8136_v62  ;;  %vm8236_vm7 = vmmov %vm8233_vm2 }
 0x3c5   : > { %8230 = vst [vmem:[#allocation13_spill] sm:$0xff] %v6562_v56  ;;  %v6566_v22 = vpop.permute.xlu0 %4693  ;;  %v6568_v50 = vpop.permute.xlu1 %4688 }
 0x3c6   : > { %v8138_v12 = vunpack.i.h.bf16 %v6566_v22  ;;  %v8139_v42 = vunpack.i.l.bf16 %v6566_v22  ;;  %v4690_v27 = vunpack.i.l.bf16 %v6568_v50 }
 0x3c8   : > { %v6606_v53 = vsel %vm1736_vm10, %v8139_v42, %v8138_v12 }
 0x3c9   : > { %v6570_v7 = vpop.permute.xlu0 %4698  ;;  %v4704_v5 = vpop.permute.xlu1 %4703 }
 0x3ca   : > { %v4701_v43 = vunpack.i.h.bf16 %v6570_v7  ;;  %v8137_v17 = vunpack.i.l.bf16 %v6570_v7  ;;  %v4706_v21 = vunpack.i.h.bf16 %v4704_v5  ;;  %v4705_v28 = vunpack.i.l.bf16 %v4704_v5 }
 0x3cc   : > { %v6612_v38 = vsel %vm2066_vm13, %v8137_v17, %v4701_v43  ;;  %v6615_v41 = vsel %vm2066_vm13, %v4706_v21, %v2065_v37  ;;  %v6618_v0 = vsel %vm2066_vm13, %v4701_v43, %v4705_v28  ;;  %v6621_v54 = vsel %vm2066_vm13, %v4705_v28, %v4706_v21 }
 0x3cd   : > { %v1823_v31 = vpop.permute.xlu0 %1822  ;;  %v1825_v57 = vpop.permute.xlu1 %1824  ;;  %vm8237_vm13 = vcmask 1041408  }
 0x3ce   : > { %v6574_v51 = vsel %vm1828_vm0, %v6553_v20, %v1823_v31  ;;  %v6624_v62 = vsel %vm1828_vm0, %v1823_v31, %v1825_v57 }
 0x3cf   : > { %2229 = vrot.lane.b32.xlu0 %v6574_v51, %s5113_s18 }
 0x3d1   : > { %v6578_v9 = vpop.permute.xlu0 %1826  ;;  %v6580_v46 = vpop.permute.xlu1 %4718 }
 0x3d2   : > { %8231 = vst [vmem:[#allocation12_spill] sm:$0xff] %v6578_v9  ;;  %v6584_v14 = vsel %vm1828_vm0, %v1825_v57, %v6578_v9 }
 0x3d3   : > { %8232 = vst [vmem:[#allocation8_spill] sm:$0xff] %v6584_v14  ;;  %v4720_v14 = vunpack.i.l.bf16 %v6580_v46 }
 0x3d5   : > { %v6586_v47 = vpop.permute.xlu0 %4708  ;;  %v6588_v1 = vpop.permute.xlu1 %4723 }
 0x3d6   : > { %v4725_v21 = vunpack.i.l.bf16 %v6588_v1  ;;  %v8240_v9 = vunpack.i.h.bf16 %v6586_v47 }
 0x3d9   : > { %v4734_v63 = vpop.permute.xlu1 %4733  ;;  %v6594_v52 = vpop.permute.xlu0 %4713 }
 0x3da   : > { %v4736_v44 = vunpack.i.h.bf16 %v4734_v63  ;;  %v4715_v4 = vunpack.i.l.bf16 %v6594_v52  ;;  %v6626_v10 = vunpack.i.l.bf16 %v4734_v63 }
 0x3dc   : > { %v1668_v43 = vsel %vm8233_vm2, %v4715_v4, %v4736_v44  ;;  %vm8242_vm2 = vmmov %vm8237_vm13 }
 0x3dd   : > { %v4744_v39 = vpop.permute.xlu1 %4743  ;;  %v4729_v34 = vpop.permute.xlu0 %4728 }
 0x3de   : > { %v4746_v59 = vunpack.i.h.bf16 %v4744_v39  ;;  %v4731_v5 = vunpack.i.h.bf16 %v4729_v34  ;;  %v4730_v13 = vunpack.i.l.bf16 %v4729_v34  ;;  %v6628_v23 = vunpack.i.l.bf16 %v4744_v39 }
 0x3df   : > { %v4710_v34 = vunpack.i.l.bf16 %v6586_v47 }
 0x3e0   : > { %v1670_v17 = vsel %vm8234_vm9, %v4730_v13, %v4731_v5  ;;  %v1671_v31 = vsel %vm8235_vm14, %v4731_v5, %v6626_v10  ;;  %v6641_v39 = vsel %vm548_vm15, %v4690_v27, %v4746_v59  ;;  %v1669_v15 = vsel %vm8236_vm7, %v4736_v44, %v4730_v13  ;;  %vm8244_vm9 = vmmov %vm8242_vm2 }
 0x3e1   : > { %v4754_v57 = vpop.permute.xlu1 %4753  ;;  %v4739_v63 = vpop.permute.xlu0 %4738  ;;  %v1969_v28 = vsel %vm939_vm8, %v6404_v32, %v1670_v17  ;;  %v1967_v5 = vsel %vm939_vm8, %v6387_v48, %v1668_v43  ;;  %v6653_v42 = vsel %vm955_vm5, %v6626_v10, %v6628_v23  ;;  %v1972_v56 = vsel %vm955_vm5, %v1668_v43, %v6641_v39  ;;  %vm8245_vm14 = vmmov %vm8242_vm2 }
 0x3e2   : > { %v6643_v37 = vunpack.i.l.bf16 %v4754_v57  ;;  %v4741_v4 = vunpack.i.h.bf16 %v4739_v63  ;;  %v4740_v12 = vunpack.i.l.bf16 %v4739_v63  ;;  %v4872_v2 = vpack.i.bf16 %v1969_v28, %v1677_v6  ;;  %vm8246_vm7 = vmmov %vm8242_vm2 }
 0x3e3   : > { %v1970_v6 = vsel %vm939_vm8, %v6415_v58, %v1671_v31  ;;  %v4756_v55 = vunpack.i.h.bf16 %v4754_v57  ;;  %v1968_v58 = vsel %vm939_vm8, %v6374_v24, %v1669_v15  ;;  %v6686_v43 = vsel %vm760_vm4, %v4725_v21, %v8239_v33 }
 0x3e4   : > { %v6658_v32 = vsel %vm8237_vm13, %v6628_v23, %v6643_v37  ;;  %v6662_v27 = vsel %vm548_vm15, %v4741_v4, %v6628_v23  ;;  %v1693_v13 = vsel %vm548_vm15, %v4746_v59, %v4740_v12  ;;  %v1694_v48 = vsel %vm548_vm15, %v4740_v12, %v4741_v4  ;;  %4873 = vrot.lane.b32.xlu0 %v4872_v2, %s5113_s18 }
 0x3e5   : > { %v6669_v44 = vpop.permute.xlu1 %4763  ;;  %v4749_v63 = vpop.permute.xlu0 %4748  ;;  %v1975_v49 = vsel %vm955_vm5, %v1671_v31, %v6662_v27  ;;  %v1973_v26 = vsel %vm955_vm5, %v1669_v15, %v1693_v13  ;;  %v1974_v12 = vsel %vm955_vm5, %v1670_v17, %v1694_v48  ;;  %v8238_v31 = vunpack.i.l.bf16 %v6566_v22 }
 0x3e6   : > { %v4751_v59 = vunpack.i.h.bf16 %v4749_v63  ;;  %v4750_v60 = vunpack.i.l.bf16 %v4749_v63  ;;  %v3962_v2 = vpack.c.bf16 %v1975_v49, %v1970_v6  ;;  %v4882_v4 = vpack.i.bf16 %v1968_v58, %v1975_v49 }
 0x3e7   : > { %v3926_v18 = vpack.c.bf16 %v1973_v26, %v1968_v58  ;;  %v1737_v3 = vsel %vm1736_vm10, %v4710_v34, %v8238_v31  ;;  %v3928_v57 = vpack.c.bf16 %v1972_v56, %v1967_v5  ;;  %v4726_v63 = vunpack.i.h.bf16 %v6588_v1 }
 0x3e8   : > { %v1719_v24 = vsel %vm1716_vm12, %v4750_v60, %v4751_v59  ;;  %3963 = vmatprep.subr.bf16.mxu1 %v3962_v2  ;;  %v4877_v17 = vpack.i.bf16 %v1974_v12, %v1970_v6  ;;  %4883 = vrot.lane.b32.xlu0 %v4882_v4, %s5113_s18  ;;  %v3964_v58 = vpack.c.bf16 %v1974_v12, %v1969_v28  ;;  %v8241_v34 = vunpack.i.h.bf16 %v6566_v22 }
 0x3e9   : > { %v4774_v49 = vpop.permute.xlu1 %4773  ;;  %v4759_v15 = vpop.permute.xlu0 %4758  ;;  %v4765_v33 = vunpack.i.l.bf16 %v6669_v44  ;;  %v6700_v56 = vsel %vm8242_vm2, %v1694_v48, %v1719_v24  ;;  %3927 = vmatprep.subr.bf16.mxu0 %v3926_v18  ;;  %v1717_v5 = vsel %vm1716_vm12, %v4720_v14, %v4756_v55  ;;  %v1718_v6 = vsel %vm1716_vm12, %v4756_v55, %v4750_v60 }
 0x3ea   : > { %v6696_v31 = vsel %vm1736_vm10, %v8241_v34, %v8240_v9  ;;  %v4761_v21 = vunpack.i.h.bf16 %v4759_v15  ;;  %4878 = vrot.lane.b32.xlu1 %v4877_v17, %s5113_s18  ;;  %v4887_v28 = vpack.i.bf16 %v6700_v56, %v1973_v26  ;;  %v6706_v12 = vunpack.i.l.bf16 %v4759_v15  ;;  %3929 = vmatpush1.bf16.msra.mxu0 %v3928_v57 }
 0x3eb   : > { %v4766_v22 = vunpack.i.h.bf16 %v6669_v44  ;;  %v4775_v9 = vunpack.i.l.bf16 %v4774_v49  ;;  %3965 = vmatpush1.bf16.msra.mxu1 %v3964_v58  ;;  %v1982_v18 = vsel %vm939_vm8, %v1737_v3, %v6686_v43  ;;  %v1720_v55 = vsel %vm1716_vm12, %v4751_v59, %v6643_v37 }
 0x3ec   : > { %v6710_v2 = vsel %vm760_vm4, %v4761_v21, %v4765_v33  ;;  %v1762_v60 = vsel %vm760_vm4, %v6706_v12, %v4761_v21  ;;  %v8243_v44 = vunpack.i.h.bf16 %v6536_v61  ;;  %v1978_v59 = vsel %vm8244_vm9, %v1693_v13, %v1718_v6  ;;  %vm8253_vm9 = vmmov %vm8246_vm7 }
 0x3ed   : > { %v6718_v26 = vpop.permute.xlu1 %4783  ;;  %v4769_v14 = vpop.permute.xlu0 %4768  ;;  %v2109_v48 = vsel %vm939_vm8, %v6618_v0, %v6710_v2  ;;  %v1977_v24 = vsel %vm8245_vm14, %v6641_v39, %v1717_v5  ;;  %v2108_v0 = vsel %vm939_vm8, %v6612_v38, %v1762_v60  ;;  %v6743_v15 = vsel %vm939_vm8, %v6424_v35, %v6626_v10  ;;  %vm8254_vm14 = vmmov %vm8246_vm7 }
 0x3ee   : > { %v6727_v4 = vsel %vm760_vm4, %v8243_v44, %v6706_v12  ;;  %v6729_v3 = vunpack.i.h.bf16 %v4769_v14  ;;  %v4770_v57 = vunpack.i.l.bf16 %v4769_v14  ;;  %4888 = vrot.lane.b32.xlu1 %v4887_v28, %s5113_s18  ;;  %v4897_v17 = vpack.i.bf16 %v1978_v59, %v2109_v48 }
 0x3ef   : > { %v1983_v61 = vsel %vm939_vm8, %v6606_v53, %v6727_v4  ;;  %v6747_v13 = vsel %vm760_vm4, %v4766_v22, %v6542_v16  ;;  %v6749_v39 = vunpack.i.h.bf16 %v4774_v49  ;;  %v6753_v58 = vsel %vm548_vm15, %v6628_v23, %v4775_v9 }
 0x3f0   : > { %v6757_v38 = vsel %vm8246_vm7, %v6662_v27, %v1720_v55  ;;  %vm8247_vm13 = vcmask 1031168   ;;  %v3932_v5 = vpack.c.bf16 %v1982_v18, %v1977_v24  ;;  %v4785_v6 = vunpack.i.l.bf16 %v6718_v26 }
 0x3f1   : > { %v2032_v53 = vsel %vm8247_vm13, %v6626_v10, %v4770_v57  ;;  %vm8248_vm2 = vmmov %vm8247_vm13  ;;  %v4892_v21 = vpack.i.bf16 %v2108_v0, %v6757_v38  ;;  %v6764_v16 = vpop.permute.xlu1 %4793  ;;  %v4779_v49 = vpop.permute.xlu0 %4778  ;;  %v3930_v23 = vpack.c.bf16 %v1983_v61, %v1978_v59  ;;  %v8249_v27 = vunpack.i.l.bf16 %v6570_v7 }
 0x3f2   : > { %v2033_v34 = vsel %vm8248_vm2, %v4770_v57, %v6729_v3  ;;  %v4781_v28 = vunpack.i.h.bf16 %v4779_v49  ;;  %4898 = vrot.lane.b32.xlu1 %v4897_v17, %s5113_s18  ;;  %v6773_v10 = vunpack.i.l.bf16 %v4779_v49  ;;  %v2101_v18 = vsel %vm955_vm5, %v2032_v53, %v6753_v58  ;;  %vm8258_vm2 = vmmov %vm8246_vm7 }
 0x3f3   : > { %v2107_v55 = vsel %vm939_vm8, %v8249_v27, %v6706_v12  ;;  %4893 = vrot.lane.b32.xlu0 %v4892_v21, %s5113_s18  ;;  %v2099_v14 = vsel %vm939_vm8, %v6417_v29, %v2033_v34  ;;  %v2098_v48 = vsel %vm939_vm8, %v6424_v35, %v2032_v53  ;;  %v6782_v44 = vsel %vm760_vm4, %v4765_v33, %v4766_v22 }
 0x3f4   : > { %v6786_v7 = vsel %vm548_vm15, %v4775_v9, %v6749_v39  ;;  %3931 = vmatprep.subr.bf16.mxu0 %v3930_v23  ;;  %v4907_v57 = vpack.i.bf16 %v2101_v18, %v2099_v14  ;;  %v4902_v59 = vpack.i.bf16 %v2098_v48, %v2107_v55  ;;  %v4795_v24 = vunpack.i.l.bf16 %v6764_v16 }
 0x3f5   : > { %v1786_v29 = vsel %vm823_vm11, %v4781_v28, %v4785_v6  ;;  %v1785_v17 = vsel %vm823_vm11, %v6773_v10, %v4781_v28  ;;  %3933 = vmatpush1.bf16.msra.mxu0 %v3932_v5  ;;  %v1795_v0 = vpop.permute.xlu1 %1794  ;;  %v4789_v35 = vpop.permute.xlu0 %4788  ;;  %v2102_v33 = vsel %vm955_vm5, %v2033_v34, %v6786_v7  ;;  %v8250_v22 = vunpack.i.h.bf16 %v6555_v30 }
 0x3f6   : > { %v4791_v61 = vunpack.i.h.bf16 %v4789_v35  ;;  %v4790_v53 = vunpack.i.l.bf16 %v4789_v35  ;;  %v6800_v21 = vsel %vm955_vm5, %v1762_v60, %v1785_v17  ;;  %v4786_v49 = vunpack.i.h.bf16 %v6718_v26  ;;  %4908 = vrot.lane.b32.xlu1 %v4907_v57, %s5113_s18 }
 0x3f7   : > { %v6797_v9 = vsel %vm885_vm1, %v1795_v0, %v8250_v22  ;;  %4903 = vrot.lane.b32.xlu0 %v4902_v59, %s5113_s18  ;;  %v4912_v5 = vpack.i.bf16 %v6800_v21, %v2102_v33  ;;  %v8251_v34 = vunpack.i.h.bf16 %v6534_v11  ;;  %v1984_v28 = vsel %vm939_vm8, %v6696_v31, %v1762_v60 }
 0x3f8   : > { %v1809_v27 = vsel %vm885_vm1, %v4791_v61, %v4795_v24  ;;  %v8252_v55 = vmov %v8250_v22  ;;  %v1808_v14 = vsel %vm885_vm1, %v4790_v53, %v4791_v61  ;;  %v1990_v18 = vsel %vm955_vm5, %v6710_v2, %v1786_v29 }
 0x3f9   : > { %v1784_v23 = vsel %vm823_vm11, %v8251_v34, %v6773_v10  ;;  %v1807_v26 = vsel %vm885_vm1, %v8252_v55, %v4790_v53  ;;  %v4804_v48 = vpop.permute.xlu1 %4803  ;;  %v6819_v57 = vpop.permute.xlu0 %4798  ;;  %v6822_v59 = vsel %vm8253_vm9, %v1785_v17, %v1808_v14  ;;  %v1995_v0 = vsel %vm8254_vm14, %v1786_v29, %v1809_v27  ;;  %vm8259_vm9 = vmmov %vm8258_vm2 }
 0x3fa   : > { %v2113_v31 = vsel %vm955_vm5, %v6706_v12, %v6773_v10  ;;  %v1993_v60 = vsel %vm8246_vm7, %v1784_v23, %v1807_v26  ;;  %vm1851_vm13 = vcmask 457728   ;;  %v4806_v35 = vunpack.i.h.bf16 %v4804_v48  ;;  %vm8260_vm14 = vmmov %vm8258_vm2 }
 0x3fb   : > { %v4805_v33 = vunpack.i.l.bf16 %v4804_v48  ;;  %v4800_v22 = vunpack.i.l.bf16 %v6819_v57  ;;  %v1988_v61 = vsel %vm955_vm5, %v6727_v4, %v1784_v23  ;;  %v4796_v34 = vunpack.i.h.bf16 %v6764_v16  ;;  %4913 = vrot.lane.b32.xlu0 %v4912_v5, %s5113_s18  ;;  %vm8261_vm7 = vmmov %vm8258_vm2 }
 0x3fc   : > { %v4917_v29 = vpack.i.bf16 %v6822_v59, %v1990_v18  ;;  %v4922_v17 = vpack.i.bf16 %v2113_v31, %v1995_v0  ;;  %v3934_v27 = vpack.c.bf16 %v1993_v60, %v1988_v61  ;;  %v8255_v26 = vunpack.i.h.bf16 %v6586_v47 }
 0x3fd   : > { %v6836_v12 = vsel %vm1828_vm0, %v4806_v35, %v4805_v33  ;;  %v1830_v55 = vsel %vm1828_vm0, %v4805_v33, %v6553_v20  ;;  %v6845_v4 = vsel %vm939_vm8, %v4800_v22, %v6782_v44  ;;  %v4716_v16 = vunpack.i.h.bf16 %v6594_v52  ;;  %v6852_v48 = vpop.permute.xlu1 %4818  ;;  %v6854_v31 = vpop.permute.xlu0 %4808 }
 0x3fe   : > { %v1740_v14 = vsel %vm1736_vm10, %v8255_v26, %v4800_v22  ;;  %v1787_v5 = vsel %vm823_vm11, %v4785_v6, %v4786_v49  ;;  %v4002_v23 = vpack.c.bf16 %v6845_v4, %v6658_v32  ;;  %4918 = vrot.lane.b32.xlu1 %v4917_v29, %s5113_s18  ;;  %3935 = vmatprep.subr.bf16.mxu0 %v3934_v27  ;;  %v4821_v60 = vunpack.i.h.bf16 %v6852_v48 }
 0x3ff   : > { %v1985_v47 = vsel %vm939_vm8, %v1740_v14, %v6710_v2  ;;  %v4820_v35 = vunpack.i.l.bf16 %v6852_v48  ;;  %v4811_v33 = vunpack.i.h.bf16 %v6854_v31  ;;  %v4810_v6 = vunpack.i.l.bf16 %v6854_v31  ;;  %4923 = vrot.lane.b32.xlu0 %v4922_v17, %s5113_s18  ;;  %v8274_v31 = vld [vmem:[#allocation7_spill] sm:$0xff] }
 0x400   : > { %v2085_v22 = vsel %vm823_vm11, %v4786_v49, %v6539_v40  ;;  %v1810_v61 = vsel %vm885_vm1, %v4795_v24, %v4796_v34  ;;  %v3966_v29 = vpack.c.bf16 %v1985_v47, %v6757_v38  ;;  %v2111_v2 = vsel %vm939_vm8, %v6615_v41, %v6747_v13 }
 0x401   : > { %v8256_v27 = vunpack.i.h.bf16 %v6568_v50  ;;  %v2051_v24 = vsel %vm1716_vm12, %v6643_v37, %v4810_v6  ;;  %v3968_v38 = vpack.c.bf16 %v1984_v28, %v6700_v56  ;;  %v2052_v41 = vsel %vm1716_vm12, %v4810_v6, %v4811_v33  ;;  %v6888_v49 = vpop.permute.xlu1 %4823  ;;  %v4814_v17 = vpop.permute.xlu0 %4813 }
 0x402   : > { %3967 = vmatprep.subr.bf16.mxu1 %v3966_v29  ;;  %v3970_v47 = vpack.c.bf16 %v1995_v0, %v1990_v18  ;;  %v2104_v50 = vsel %vm8258_vm2, %v6753_v58, %v2051_v24  ;;  %v2116_v37 = vsel %vm8259_vm9, %v6773_v10, %v4790_v53  ;;  %v4816_v56 = vunpack.i.h.bf16 %v4814_v17 }
 0x403   : > { %v6873_v26 = vsel %vm548_vm15, %v4821_v60, %v8256_v27  ;;  %v8257_v14 = vmov %v8256_v27  ;;  %v6894_v60 = vsel %vm955_vm5, %v6782_v44, %v1787_v5  ;;  %v4815_v28 = vunpack.i.l.bf16 %v4814_v17  ;;  %3969 = vmatpush1.bf16.msra.mxu1 %v3968_v38 }
 0x404   : > { %v6880_v40 = vsel %vm548_vm15, %v8257_v14, %v4820_v35  ;;  %v2110_v6 = vsel %vm939_vm8, %v6621_v54, %v6782_v44  ;;  %3971 = vmatprep.subr.bf16.mxu1 %v3970_v47  ;;  %v4927_v29 = vpack.i.bf16 %v2104_v50, %v2116_v37  ;;  %v2105_v18 = vsel %vm8260_vm14, %v6786_v7, %v2052_v41 }
 0x405   : > { %v6904_v58 = vsel %vm8261_vm7, %v1787_v5, %v1810_v61  ;;  %v2114_v0 = vsel %vm955_vm5, %v6747_v13, %v2085_v22  ;;  %v1853_v10 = vsel %vm1851_vm13, %v4815_v28, %v4816_v56  ;;  %v4932_v53 = vpack.i.bf16 %v2110_v6, %v2105_v18  ;;  %v4829_v54 = vpop.permute.xlu1 %4828  ;;  %v6913_v44 = vpop.permute.xlu0 %4833 }
 0x406   : > { %v3972_v27 = vpack.c.bf16 %v6822_v59, %v6800_v21  ;;  %v4937_v14 = vpack.i.bf16 %v6894_v60, %v2111_v2  ;;  %4928 = vrot.lane.b32.xlu1 %v4927_v29, %s5113_s18  ;;  %v4942_v7 = vpack.i.bf16 %v6904_v58, %v2114_v0  ;;  %v8262_v5 = vunpack.i.l.bf16 %v6555_v30  ;;  %v6932_v30 = vld [vmem:[%s8263_s3 + $0x8] sm:$0xff] }
 0x407   : > { %v6920_v13 = vsel %vm939_vm8, %v1830_v55, %v1853_v10  ;;  %v6924_v24 = vsel %vm955_vm5, %v1853_v10, %v6463_v19  ;;  %4933 = vrot.lane.b32.xlu0 %v4932_v53, %s5113_s18  ;;  %v4831_v21 = vunpack.i.h.bf16 %v4829_v54  ;;  %v4830_v59 = vunpack.i.l.bf16 %v4829_v54 }
 0x408   : > { %v2091_v61 = vsel %vm885_vm1, %v4796_v34, %v8262_v5  ;;  %v4836_v2 = vunpack.i.h.bf16 %v6913_v44  ;;  %v4835_v38 = vunpack.i.l.bf16 %v6913_v44  ;;  %3973 = vmatpush1.bf16.msra.mxu1 %v3972_v27  ;;  %vm8264_vm1 = vmmov %vm8258_vm2  ;;  %v3938_v55 = vpack.c.bf16 %v6924_v24, %v6920_v13 }
 0x409   : > { %v2117_v34 = vsel %vm8264_vm1, %v2085_v22, %v2091_v61  ;;  %vm2320_vm2 = vcmask 179200   ;;  %v3999_v41 = vpack.c.bf16 %v6653_v42, %v6743_v15  ;;  %v1852_v17 = vsel %vm1851_vm13, %v4830_v59, %v4815_v28  ;;  %v6952_v37 = vpop.permute.xlu1 %1847  ;;  %v6954_v28 = vpop.permute.xlu0 %4838  ;;  %vm8269_vm7 = vmmov %vm8264_vm1 }
 0x40a   : > { %v1854_v47 = vsel %vm1851_vm13, %v4816_v56, %v4831_v21  ;;  %vm8265_vm9 = vcmask 1031168   ;;  %3530 = vmatprep.mubr.msk.f32.mxu0 %vm2320_vm2, %v6932_v30  ;;  %4938 = vrot.lane.b32.xlu1 %v4937_v14, %s5113_s18  ;;  %v6962_v52 = vsel %vm939_vm8, %v6836_v12, %v1852_v17  ;;  %v4801_v29 = vunpack.i.h.bf16 %v6819_v57 }
 0x40b   : > { %v1877_v50 = vsel %vm8265_vm9, %v4836_v2, %v4716_v16  ;;  %vm8266_vm14 = vmmov %vm8265_vm9  ;;  %v1999_v56 = vsel %vm939_vm8, %v6574_v51, %v1854_v47  ;;  %v2004_v6 = vsel %vm955_vm5, %v1854_v47, %v6466_v45  ;;  %4943 = vrot.lane.b32.xlu0 %v4942_v7, %s5113_s18  ;;  %v1855_v18 = vsel %vm1851_vm13, %v4831_v21, %v6952_v37 }
 0x40c   : > { %v1878_v22 = vsel %vm8266_vm14, %v4716_v16, %v4835_v38  ;;  %v6966_v16 = vsel %vm955_vm5, %v1852_v17, %v6380_v36  ;;  %v4841_v51 = vunpack.i.h.bf16 %v6954_v28  ;;  %v4840_v0 = vunpack.i.l.bf16 %v6954_v28  ;;  %3534 = vmatprep.mubr.msk.f32.mxu1 %vm2320_vm2, %v6932_v30 }
 0x40d   : > { %v2000_v12 = vsel %vm939_vm8, %v6624_v62, %v1855_v18  ;;  %v2005_v10 = vsel %vm955_vm5, %v1855_v18, %v6458_v8  ;;  %v3976_v53 = vpack.c.bf16 %v2004_v6, %v1999_v56  ;;  %v3940_v57 = vpack.c.bf16 %v6966_v16, %v6962_v52  ;;  %v6995_v21 = vpop.permute.xlu1 %4848  ;;  %v6997_v59 = vpop.permute.xlu0 %4843 }
 0x40e   : > { %v8267_v27 = vunpack.i.h.bf16 %v6580_v46  ;;  %v3974_v5 = vpack.c.bf16 %v2005_v10, %v2000_v12  ;;  %v6992_v61 = vsel %vm8269_vm7, %v6463_v19, %v1878_v22  ;;  %2223 = vrot.lane.b32.xlu1 %v2117_v34, %s5113_s18  ;;  %v7005_v46 = vsel %vm8264_vm1, %v6380_v36, %v1877_v50  ;;  %v8270_v36 = vld [vmem:[#allocation12_spill] sm:$0xff] }
 0x40f   : > { %v4005_v19 = vpack.c.bf16 %v6904_v58, %v6894_v60  ;;  %2227 = vrot.lane.b32.xlu0 %v6553_v20, %s5113_s18  ;;  %v4851_v34 = vunpack.i.h.bf16 %v6995_v21  ;;  %v4850_v47 = vunpack.i.l.bf16 %v6995_v21  ;;  %v4845_v22 = vunpack.i.l.bf16 %v6997_v59 }
 0x410   : > { %v1915_v14 = vsel %vm1716_vm12, %v4841_v51, %v8267_v27  ;;  %v8268_v54 = vmov %v8267_v27  ;;  %3975 = vmatprep.subr.bf16.mxu1 %v3974_v5  ;;  %vm8276_vm7 = vcmask 1031168  }
 0x411   : > { %v1916_v7 = vsel %vm1716_vm12, %v8268_v54, %v4840_v0  ;;  %v7009_v17 = vsel %vm939_vm8, %v6873_v26, %v1915_v14  ;;  %v2097_v26 = vsel %vm1828_vm0, %v8270_v36, %v6532_v25  ;;  %3977 = vmatpush1.bf16.msra.mxu1 %v3976_v53  ;;  %v1957_v56 = vsel %vm760_vm4, %v4851_v34, %v4726_v63  ;;  %v4854_v12 = vpop.permute.xlu0 %4853  ;;  %vm8271_vm0 = vmmov %vm8264_vm1  ;;  %v4864_v21 = vpop.permute.xlu1 %4863  ;;  %v8275_v34 = vld [vmem:[#allocation10_spill] sm:$0xff]  ;;  %v8277_v36 = vld [vmem:[#allocation8_spill] sm:$0xff] }
 0x412   : > { %v7001_v2 = vsel %vm939_vm8, %v6880_v40, %v1916_v7  ;;  %v4846_v40 = vunpack.i.h.bf16 %v6997_v59  ;;  %v3944_v20 = vpack.c.bf16 %v7009_v17, %v7005_v46  ;;  %v1958_v6 = vsel %vm760_vm4, %v4726_v63, %v4850_v47  ;;  %2231 = vrot.lane.b32.xlu1 %v6624_v62, %s5113_s18  ;;  %vm8272_vm9 = vmmov %vm8271_vm0 }
 0x413   : > { %v3942_v50 = vpack.c.bf16 %v7001_v2, %v6992_v61  ;;  %v1935_v51 = vsel %vm1736_vm10, %v4801_v29, %v4845_v22  ;;  %vm8273_vm14 = vmmov %vm8271_vm0  ;;  %v4825_v62 = vunpack.i.l.bf16 %v6888_v49  ;;  %2235 = vrot.lane.b32.xlu0 %v2097_v26, %s5113_s18  ;;  %v4855_v54 = vunpack.i.l.bf16 %v4854_v12 }
 0x414   : > { %v1934_v18 = vsel %vm1736_vm10, %v4846_v40, %v4801_v29  ;;  %v7037_v10 = vsel %vm955_vm5, %v1916_v7, %v1935_v51  ;;  %v7040_v53 = vsel %vm8271_vm0, %v1935_v51, %v1958_v6  ;;  %v2106_v63 = vsel %vm8273_vm14, %v6749_v39, %v4811_v33  ;;  %vm8278_vm1 = vmmov %vm8276_vm7 }
 0x415   : > { %v7043_v27 = vsel %vm955_vm5, %v1915_v14, %v1934_v18  ;;  %v7046_v1 = vsel %vm8272_vm9, %v1934_v18, %v1957_v56  ;;  %v4856_v29 = vunpack.i.h.bf16 %v4854_v12  ;;  %v4826_v7 = vunpack.i.h.bf16 %v6888_v49  ;;  %v4859_v26 = vpop.permute.xlu0 %4858  ;;  %v8279_v18 = vld [vmem:[#allocation11_spill] sm:$0xff]  ;;  %v8280_v12 = vld [vmem:[#allocation9_spill] sm:$0xff]  ;;  %vm8283_vm9 = vmmov %vm8271_vm0 }
 0x416   : > { %v3946_v14 = vpack.c.bf16 %v7040_v53, %v7037_v10  ;;  %v3948_v5 = vpack.c.bf16 %v7046_v1, %v7043_v27  ;;  %v2100_v59 = vsel %vm939_vm8, %v8274_v31, %v6729_v3  ;;  %v2103_v33 = vsel %vm955_vm5, %v6729_v3, %v6749_v39  ;;  %2233 = vrot.lane.b32.xlu1 %v8277_v36, %s5113_s18  ;;  %vm8285_vm14 = vmmov %vm8271_vm0 }
 0x417   : > { %v4952_v40 = vpack.i.bf16 %v8275_v34, %v2106_v63  ;;  %v1879_v49 = vsel %vm8276_vm7, %v4835_v38, %v4855_v54  ;;  %v1898_v56 = vsel %vm548_vm15, %v4820_v35, %v4825_v62  ;;  %v1880_v6 = vsel %vm8278_vm1, %v4855_v54, %v4856_v29  ;;  %1955 = vrot.lane.b32.xlu0 %v8279_v18, %s8150_s29  ;;  %vm8299_vm7 = vmmov %vm8278_vm1  ;;  %s8302_s29 = smov 32  }
 0x418   : > { %v7077_v3 = vunpack.i.h.bf16 %v4859_v26  ;;  %v4860_v39 = vunpack.i.l.bf16 %v4859_v26  ;;  %v1899_v44 = vsel %vm548_vm15, %v4825_v62, %v4826_v7  ;;  %v7080_v51 = vunpack.i.h.bf16 %v4864_v21  ;;  %vm8281_vm15 = vmmov %vm8271_vm0 }
 0x419   : > { %v4865_v38 = vunpack.i.l.bf16 %v4864_v21  ;;  %v7084_v63 = vsel %vm8271_vm0, %v8280_v12, %v4856_v29  ;;  %v2009_v62 = vsel %vm8281_vm15, %v6466_v45, %v1879_v49  ;;  %v8282_v29 = vld [vmem:[#allocation5_spill] sm:$0xff]  ;;  %v7101_v31 = vpop.permute.xlu0 %4868  ;;  %v4947_v18 = vpack.i.bf16 %v2103_v33, %v2100_v59 }
 0x41a   : > { %v7088_v48 = vsel %vm939_vm8, %v4826_v7, %v7077_v3  ;;  %v1917_v35 = vsel %vm1716_vm12, %v4840_v0, %v4860_v39  ;;  %v1918_v54 = vsel %vm1716_vm12, %v4860_v39, %v7077_v3  ;;  %1849 = vrot.lane.b32.xlu1 %v8282_v29, %s5126_s26  ;;  %v2010_v7 = vsel %vm8283_vm9, %v6458_v8, %v1880_v6  ;;  %vm8284_vm12 = vmmov %vm8271_vm0 }
 0x41b   : > { %v4011_v21 = vpack.c.bf16 %v7088_v48, %v7084_v63  ;;  %v2015_v28 = vsel %vm939_vm8, %v1899_v44, %v1918_v54  ;;  %v2014_v0 = vsel %vm939_vm8, %v1898_v56, %v1917_v35  ;;  %4953 = vrot.lane.b32.xlu0 %v4952_v40, %s5113_s18  ;;  %v4871_v34 = vunpack.i.h.bf16 %v7101_v31  ;;  %v2309_v44 = vld [vmem:[%s8089_s4 + $0x8] sm:$0xff] }
 0x41c   : > { %v4870_v45 = vunpack.i.l.bf16 %v7101_v31  ;;  %v3978_v49 = vpack.c.bf16 %v2015_v28, %v2010_v7  ;;  %v3980_v26 = vpack.c.bf16 %v2014_v0, %v2009_v62  ;;  %v1937_v39 = vsel %vm1736_vm10, %v4865_v38, %v7080_v51 }
 0x41d   : > { %v1936_v29 = vsel %vm1736_vm10, %v4845_v22, %v4865_v38  ;;  %v2020_v40 = vsel %vm955_vm5, %v1918_v54, %v1937_v39  ;;  %v8286_v38 = vld [vmem:[#allocation13_spill] sm:$0xff]  ;;  %v8287_v54 = vld [vmem:[#allocation6_spill] sm:$0xff]  ;;  %v8289_v0 = vunpack.i.h.bf16 %v6534_v11  ;;  %vm8290_vm10 = vmmov %vm8271_vm0  ;;  %v2021_v60 = vsel %vm955_vm5, %v7077_v3, %v7080_v51 }
 0x41e   : > { %v1959_v8 = vsel %vm760_vm4, %v4850_v47, %v4870_v45  ;;  %v1960_v56 = vsel %vm760_vm4, %v4870_v45, %v4871_v34  ;;  %3979 = vmatprep.subr.bf16.mxu1 %v3978_v49  ;;  %4948 = vrot.lane.b32.xlu1 %v4947_v18, %s5113_s18  ;;  %v2019_v59 = vsel %vm955_vm5, %v1917_v35, %v1936_v29  ;;  %v2308_v35 = vld [vmem:[%s8089_s4] sm:$0xff]  ;;  %vm2759_vm15 = vcmask 138240  }
 0x41f   : > { %3981 = vmatpush1.bf16.msra.mxu1 %v3980_v26  ;;  %v2025_v6 = vsel %vm8284_vm12, %v1937_v39, %v1960_v56  ;;  %v2024_v33 = vsel %vm8285_vm14, %v1936_v29, %v1959_v8  ;;  %2237 = vrot.lane.b32.xlu0 %v6532_v25, %s5113_s18  ;;  %v8288_v62 = vpack.i.bf16 %v8286_v38, %v8287_v54  ;;  %vm8303_vm9 = vcmask 785408  }
 0x420   : > { %v3982_v47 = vpack.c.bf16 %v2025_v6, %v2020_v40  ;;  %v3984_v22 = vpack.c.bf16 %v2024_v33, %v2019_v59  ;;  %vm8304_vm12 = vmmov %vm8303_vm9  ;;  %vm8305_vm14 = vmmov 0  }
 0x422   : > { %3983 = vmatprep.subr.bf16.mxu1 %v3982_v47  ;;  %4958 = vrot.lane.b32.xlu1 %v8288_v62, %s5113_s18  ;;  %s404_s18 = sand.u32 1, %s5090_s22  }
 0x423   : > { %3985 = vmatpush1.bf16.msra.mxu1 %v3984_v22  ;;  %2317 = vperm.xlu0 %4661, %v2309_v44   ;;  %s405_s17 = scalar_lea.vmem [#allocation2], %s404_s18 }
 0x426   : > { %2312 = vperm.xlu1 %4962, %v2308_v35  }
 0x441   : > { %v7134_v25 = vpop.permute.xlu0 %2229 }
 0x456   : > { %v4874_v7 = vpop.permute.xlu0 %4873 }
 0x457   : > { %v4875_v28 = vunpack.i.l.bf16 %v4874_v7 }
 0x459   : > { %v1783_v45 = vsel %vm823_vm11, %v4875_v28, %v8289_v0 }
 0x45a   : > { %v1987_v49 = vsel %vm955_vm5, %v6686_v43, %v1783_v45  ;;  %v1992_v26 = vsel %vm8290_vm10, %v1783_v45, %v6797_v9  ;;  %v4884_v29 = vpop.permute.xlu0 %4883  ;;  %v4876_v43 = vunpack.i.h.bf16 %v4874_v7 }
 0x45b   : > { %v3936_v18 = vpack.c.bf16 %v1992_v26, %v1987_v49  ;;  %v4885_v11 = vunpack.i.l.bf16 %v4884_v29  ;;  %v4886_v16 = vunpack.i.h.bf16 %v4884_v29 }
 0x45c   : > { %v4879_v39 = vpop.permute.xlu1 %4878 }
 0x45d   : > { %3937 = vmatpush1.bf16.msra.mxu0 %v3936_v18  ;;  %v4880_v8 = vunpack.i.l.bf16 %v4879_v39  ;;  %v4881_v40 = vunpack.i.h.bf16 %v4879_v39 }
 0x45e   : > { %3939 = vmatprep.subr.bf16.mxu0 %v3938_v55 }
 0x45f   : > { %v2240_v13 = vsel %vm823_vm11, %v4876_v43, %v4880_v8  ;;  %v2245_v52 = vsel %vm823_vm11, %v4881_v40, %v4885_v11 }
 0x460   : > { %v4889_v56 = vpop.permute.xlu1 %4888  ;;  %v3950_v47 = vpack.c.bf16 %v2245_v52, %v2240_v13 }
 0x461   : > { %3941 = vmatpush1.bf16.msra.mxu0 %v3940_v57  ;;  %v4890_v9 = vunpack.i.l.bf16 %v4889_v56  ;;  %v4891_v57 = vunpack.i.h.bf16 %v4889_v56 }
 0x462   : > { %3943 = vmatprep.subr.bf16.mxu0 %v3942_v50 }
 0x463   : > { %v2244_v61 = vsel %vm823_vm11, %v4890_v9, %v4881_v40 }
 0x464   : > { %v7152_v6 = vpop.permute.xlu1 %4898 }
 0x465   : > { %v7154_v59 = vpop.permute.xlu0 %4893  ;;  %v4900_v24 = vunpack.i.l.bf16 %v7152_v6  ;;  %3945 = vmatpush1.bf16.msra.mxu0 %v3944_v20  ;;  %v4901_v22 = vunpack.i.h.bf16 %v7152_v6  ;;  %v2239_v20 = vsel %vm823_vm11, %v4886_v16, %v4876_v43 }
 0x466   : > { %v4896_v55 = vunpack.i.h.bf16 %v7154_v59  ;;  %v4895_v33 = vunpack.i.l.bf16 %v7154_v59  ;;  %3947 = vmatprep.subr.bf16.mxu0 %v3946_v14  ;;  %v3952_v38 = vpack.c.bf16 %v2244_v61, %v2239_v20 }
 0x467   : > { %v2249_v54 = vsel %vm823_vm11, %v4901_v22, %v4891_v57 }
 0x468   : > { %v7168_v2 = vpop.permute.xlu1 %4908  ;;  %v2250_v46 = vsel %vm823_vm11, %v4891_v57, %v4895_v33  ;;  %v2255_v17 = vsel %vm823_vm11, %v4896_v55, %v4900_v24 }
 0x469   : > { %v4904_v50 = vpop.permute.xlu0 %4903  ;;  %3949 = vmatpush1.bf16.msra.mxu0 %v3948_v5  ;;  %v4911_v10 = vunpack.i.h.bf16 %v7168_v2  ;;  %v4910_v53 = vunpack.i.l.bf16 %v7168_v2  ;;  %v3954_v5 = vpack.c.bf16 %v2255_v17, %v2250_v46 }
 0x46a   : > { %v4905_v44 = vunpack.i.l.bf16 %v4904_v50  ;;  %v4906_v14 = vunpack.i.h.bf16 %v4904_v50  ;;  %3951 = vmatprep.subr.bf16.mxu0 %v3950_v47 }
 0x46b   : > { %v2246_v35 = vsel %vm823_vm11, %v4885_v11, %v4911_v10 }
 0x46c   : > { %v2254_v27 = vsel %vm823_vm11, %v4905_v44, %v4896_v55  ;;  %v2241_v7 = vsel %vm823_vm11, %v4880_v8, %v4906_v14  ;;  %v2242_v45 = vsel %vm823_vm11, %v4906_v14, %v4910_v53 }
 0x46d   : > { %v7184_v1 = vpop.permute.xlu0 %4913  ;;  %3953 = vmatpush1.bf16.msra.mxu0 %v3952_v38  ;;  %v3956_v28 = vpack.c.bf16 %v2254_v27, %v2249_v54  ;;  %v3988_v40 = vpack.c.bf16 %v2246_v35, %v2241_v7 }
 0x46e   : > { %v4915_v62 = vunpack.i.l.bf16 %v7184_v1  ;;  %3955 = vmatprep.subr.bf16.mxu0 %v3954_v5  ;;  %v4916_v49 = vunpack.i.h.bf16 %v7184_v1 }
 0x470   : > { %v4919_v0 = vpop.permute.xlu1 %4918  ;;  %v2247_v39 = vsel %vm823_vm11, %v4911_v10, %v4915_v62 }
 0x471   : > { %v4921_v26 = vunpack.i.h.bf16 %v4919_v0  ;;  %v4920_v18 = vunpack.i.l.bf16 %v4919_v0  ;;  %v4924_v29 = vpop.permute.xlu0 %4923  ;;  %v3986_v56 = vpack.c.bf16 %v2247_v39, %v2242_v45  ;;  %3957 = vmatpush1.bf16.msra.mxu0 %v3956_v28 }
 0x472   : > { %v4925_v11 = vunpack.i.l.bf16 %v4924_v29  ;;  %v4926_v13 = vunpack.i.h.bf16 %v4924_v29 }
 0x473   : > { %v2260_v8 = vsel %vm823_vm11, %v4916_v49, %v4920_v18  ;;  %3987 = vmatprep.subr.bf16.mxu1 %v3986_v56  ;;  %v7239_v56 = vld [vmem:[%s8263_s3] sm:$0xff] }
 0x474   : > { %3989 = vmatpush1.bf16.msra.mxu1 %v3988_v40  ;;  %v2265_v43 = vsel %vm823_vm11, %v4921_v26, %v4925_v11  ;;  %v2259_v50 = vsel %vm823_vm11, %v4926_v13, %v4916_v49  ;;  %v7247_v40 = vld [vmem:[%s8263_s3 + $0x18] sm:$0xff]  ;;  %v2306_v13 = vld [vmem:[%s8263_s3 + $0x10] sm:$0xff]  ;;  %s5042_s3 = scalar_lea.vmem %s5041_s2, 32 }
 0x475   : > { %v3958_v9 = vpack.c.bf16 %v2265_v43, %v2260_v8  ;;  %v8291_v43 = vmov 0.0|0.0  }
 0x477   : > { %3959 = vmatprep.subr.bf16.mxu0 %v3958_v9 }
 0x478   : > { %v4929_v55 = vpop.permute.xlu1 %4928 }
 0x479   : > { %v4930_v52 = vunpack.i.l.bf16 %v4929_v55  ;;  %v7199_v16 = vpop.permute.xlu0 %4933  ;;  %v4931_v57 = vunpack.i.h.bf16 %v4929_v55 }
 0x47a   : > { %v4936_v61 = vunpack.i.h.bf16 %v7199_v16  ;;  %v4935_v22 = vunpack.i.l.bf16 %v7199_v16 }
 0x47b   : > { %v2264_v47 = vsel %vm823_vm11, %v4930_v52, %v4921_v26  ;;  %v2251_v14 = vsel %vm823_vm11, %v4895_v33, %v4931_v57 }
 0x47c   : > { %v3960_v44 = vpack.c.bf16 %v2264_v47, %v2259_v50  ;;  %v7205_v46 = vpop.permute.xlu1 %4938  ;;  %v2256_v38 = vsel %vm823_vm11, %v4900_v24, %v4936_v61  ;;  %v2252_v54 = vsel %vm823_vm11, %v4931_v57, %v4935_v22  ;;  %v8293_v50 = vmov 0.0  }
 0x47d   : > { %v4941_v17 = vunpack.i.h.bf16 %v7205_v46  ;;  %v4940_v20 = vunpack.i.l.bf16 %v7205_v46  ;;  %v7209_v10 = vpop.permute.xlu0 %4943  ;;  %v3992_v7 = vpack.c.bf16 %v2256_v38, %v2251_v14 }
 0x47e   : > { %v4946_v27 = vunpack.i.h.bf16 %v7209_v10  ;;  %v4945_v5 = vunpack.i.l.bf16 %v7209_v10  ;;  %3961 = vmatpush1.bf16.msra.mxu0 %v3960_v44 }
 0x47f   : > { %v2257_v35 = vsel %vm823_vm11, %v4936_v61, %v4940_v20  ;;  %v2261_v28 = vsel %vm823_vm11, %v4920_v18, %v4941_v17 }
 0x480   : > { %v7225_v59 = vpop.permute.xlu1 %2223  ;;  %v3990_v33 = vpack.c.bf16 %v2257_v35, %v2252_v54  ;;  %v2262_v6 = vsel %vm823_vm11, %v4941_v17, %v4945_v5  ;;  %v2266_v0 = vsel %vm823_vm11, %v4925_v11, %v4946_v27 }
 0x481   : > { %v2267_v24 = vsel %vm823_vm11, %v4946_v27, %v7225_v59  ;;  %v2228_v49 = vpop.permute.xlu0 %2227  ;;  %v3996_v39 = vpack.c.bf16 %v2266_v0, %v2261_v28 }
 0x482   : > { %v3994_v45 = vpack.c.bf16 %v2267_v24, %v2262_v6  ;;  %3991 = vmatprep.subr.bf16.mxu1 %v3990_v33  ;;  %v2269_v18 = vsel %vm823_vm11, %v2228_v49, %v7134_v25 }
 0x483   : > { %3993 = vmatpush1.bf16.msra.mxu1 %v3992_v7 }
 0x484   : > { %v2232_v26 = vpop.permute.xlu1 %2231  ;;  %3995 = vmatprep.subr.bf16.mxu1 %v3994_v45 }
 0x485   : > { %v2270_v29 = vsel %vm823_vm11, %v7134_v25, %v2232_v26  ;;  %v7250_v11 = vpop.permute.xlu0 %2235 }
 0x486   : > { %3528 = vmatprep.subr.msk.mxu0 %vm939_vm8, %v2270_v29 }
 0x487   : > { %3529 = vmatpush1.msk.msra.mxu0 %vm939_vm8, %v2269_v18  ;;  %3997 = vmatpush1.bf16.msra.mxu1 %v3996_v39 }
 0x488   : > { %v2234_v8 = vpop.permute.xlu1 %2233  ;;  %2402 = vmatmul.mubr.f32.vlgmr.msra.gmra.mrb[4].mxu0 %v7239_v56  ;;  %3998 = vmatprep.subr.bf16.mxu0 %v8291_v43 }
 0x489   : > { %v2271_v9 = vsel %vm823_vm11, %v2232_v26, %v2234_v8  ;;  %v2272_v25 = vsel %vm823_vm11, %v2234_v8, %v7250_v11  ;;  %4000 = vmatpush1.bf16.msra.mxu0 %v3999_v41  ;;  %3531 = vmatprep.mubr.msk.f32.mxu0 %vm2320_vm2, %v7247_v40  ;;  %v1956_v32 = vpop.permute.xlu0 %1955 }
 0x48a   : > { %3532 = vmatprep.subr.msk.mxu1 %vm939_vm8, %v2272_v25  ;;  %4001 = vmatprep.subr.bf16.mxu0 %v8291_v43 }
 0x48b   : > { %3533 = vmatpush1.msk.msra.mxu1 %vm939_vm8, %v2271_v9 }
 0x48c   : > { %v1850_v55 = vpop.permute.xlu1 %1849  ;;  %2408 = vmatmul.mubr.f32.gmra.mrb[6].mxu0 %v2306_v13  ;;  %2479 = vmatmul.mubr.f32.vlgmr.msra.gmra.mrb[4].mxu1 %v7239_v56 }
 0x48d   : > { %v1856_v42 = vsel %vm1851_vm13, %v6952_v37, %v1850_v55  ;;  %4003 = vmatpush1.bf16.msra.mxu0 %v4002_v23  ;;  %3535 = vmatprep.mubr.msk.f32.mxu1 %vm2320_vm2, %v7247_v40  ;;  %v1961_v23 = vsel %vm760_vm4, %v4871_v34, %v1956_v32  ;;  %vm8292_vm13 = vmmov %vm8271_vm0  ;;  %v4954_v52 = vpop.permute.xlu0 %4953 }
 0x48e   : > { %4004 = vmatprep.subr.bf16.mxu0 %v8291_v43  ;;  %3537 = vmatprep.mubr.msk.f32.mxu0 %vm2320_vm2, %v6932_v30  ;;  %v2001_v15 = vsel %vm939_vm8, %v8277_v36, %v1856_v42  ;;  %v2006_v41 = vsel %vm955_vm5, %v1856_v42, %v8280_v12  ;;  %v2026_v37 = vsel %vm8292_vm13, %v7080_v51, %v1961_v23  ;;  %v4955_v31 = vunpack.i.l.bf16 %v4954_v52  ;;  %v2708_v42 = vld [vmem:[%s8090_s5 + $0x80] sm:$0xff]  ;;  %v2710_v23 = vld [vmem:[%s8090_s5 + $0x90] sm:$0xff]  ;;  %vm8294_vm5 = vmmov %vm8278_vm1 }
 0x48f   : > { %v4008_v4 = vpack.c.bf16 %v2006_v41, %v2001_v15  ;;  %v4014_v58 = vpack.c.bf16 %v2026_v37, %v2021_v60  ;;  %v2709_v15 = vld [vmem:[%s8090_s5 + $0x88] sm:$0xff]  ;;  %v2692_v41 = vld [vmem:[%s8090_s5] sm:$0xff]  ;;  %v2695_v60 = vld [vmem:[%s8090_s5 + $0x18] sm:$0xff] }
 0x490   : > { %2485 = vmatmul.mubr.f32.gmra.mrb[6].mxu1 %v2306_v13  ;;  %v4949_v30 = vpop.permute.xlu1 %4948  ;;  %v2253_v51 = vsel %vm823_vm11, %v4935_v22, %v4955_v31  ;;  %v4025_v32 = vpack.c.bf16 %v2709_v15, %v2708_v42  ;;  %v2713_v31 = vld [vmem:[%s8090_s5 + $0xa8] sm:$0xff]  ;;  %vm8300_vm0 = vmmov %vm8278_vm1 }
 0x491   : > { %4006 = vmatpush1.bf16.msra.mxu0 %v4005_v19  ;;  %v4951_v36 = vunpack.i.h.bf16 %v4949_v30  ;;  %v4950_v12 = vunpack.i.l.bf16 %v4949_v30  ;;  %v4956_v19 = vunpack.i.h.bf16 %v4954_v52  ;;  %v2238_v16 = vpop.permute.xlu0 %2237  ;;  %v2711_v30 = vld [vmem:[%s8090_s5 + $0x98] sm:$0xff]  ;;  %v2694_v52 = vld [vmem:[%s8090_s5 + $0x10] sm:$0xff]  ;;  %v2705_v42 = vld [vmem:[%s8090_s5 + $0x68] sm:$0xff] }
 0x492   : > { %4007 = vmatprep.subr.bf16.mxu0 %v8291_v43  ;;  %v2273_v47 = vsel %vm823_vm11, %v7250_v11, %v2238_v16  ;;  %4026 = vmatprep.subr.bf16.mxu1 %v4025_v32  ;;  %v2699_v16 = vld [vmem:[%s8090_s5 + $0x38] sm:$0xff] }
 0x493   : > { %v2243_v34 = vsel %vm823_vm11, %v4910_v53, %v4950_v12  ;;  %v2248_v57 = vsel %vm823_vm11, %v4915_v62, %v4951_v36  ;;  %v2258_v3 = vsel %vm823_vm11, %v4940_v20, %v4956_v19  ;;  %v4029_v12 = vpack.c.bf16 %v2711_v30, %v2710_v23  ;;  %v2723_v32 = vld [vmem:[%s8090_s5 + $0xf8] sm:$0xff] }
 0x494   : > { %v4959_v61 = vpop.permute.xlu1 %4958  ;;  %v4017_v63 = vpack.c.bf16 %v2248_v57, %v2243_v34  ;;  %v4020_v2 = vpack.c.bf16 %v2258_v3, %v2253_v51  ;;  %v2696_v3 = vld [vmem:[%s8090_s5 + $0x20] sm:$0xff]  ;;  %v2697_v51 = vld [vmem:[%s8090_s5 + $0x28] sm:$0xff] }
 0x495   : > { %4009 = vmatpush1.bf16.msra.mxu0 %v4008_v4  ;;  %v4961_v48 = vunpack.i.h.bf16 %v4959_v61  ;;  %v2693_v4 = vld [vmem:[%s8090_s5 + $0x8] sm:$0xff] }
 0x496   : > { %4010 = vmatprep.subr.bf16.mxu0 %v8291_v43  ;;  %v4027_v36 = vpack.c.bf16 %v2693_v4, %v2692_v41  ;;  %v2722_v41 = vld [vmem:[%s8090_s5 + $0xf0] sm:$0xff] }
 0x497   : > { %v2268_v53 = vsel %vm823_vm11, %v7225_v59, %v4961_v48  ;;  %v2706_v4 = vld [vmem:[%s8090_s5 + $0x70] sm:$0xff]  ;;  %v4053_v30 = vpack.c.bf16 %v2723_v32, %v2722_v41 }
 0x498   : > { %4028 = vmatpush3.bf16.msra.mxu1 %v4027_v36  ;;  %v2707_v36 = vld [vmem:[%s8090_s5 + $0x78] sm:$0xff] }
 0x499   : > { %4012 = vmatpush1.bf16.msra.mxu0 %v4011_v21  ;;  %v4960_v21 = vunpack.i.l.bf16 %v4959_v61  ;;  %v4031_v61 = vpack.c.bf16 %v2695_v60, %v2694_v52  ;;  %4030 = vmatprep.subr.bf16.mxu1 %v4029_v12 }
 0x49a   : > { %4013 = vmatprep.subr.bf16.mxu0 %v8291_v43 }
 0x49b   : > { %v2263_v1 = vsel %vm823_vm11, %v4945_v5, %v4960_v21  ;;  %v2714_v21 = vld [vmem:[%s8090_s5 + $0xb0] sm:$0xff]  ;;  %vm8296_vm11 = vmmov %vm8278_vm1 }
 0x49c   : > { %v4023_v62 = vpack.c.bf16 %v2268_v53, %v2263_v1  ;;  %4032 = vmatpush3.bf16.msra.mxu1 %v4031_v61  ;;  %v4035_v53 = vpack.c.bf16 %v2697_v51, %v2696_v3  ;;  %v2741_v61 = vld [vmem:[%s8090_s5 + $0x188] sm:$0xff] }
 0x49d   : > { %4015 = vmatpush1.bf16.msra.mxu0 %v4014_v58  ;;  %v2712_v58 = vld [vmem:[%s8090_s5 + $0xa0] sm:$0xff] }
 0x49e   : > { %4016 = vmatprep.subr.bf16.mxu0 %v8291_v43 }
 0x4a1   : > { %4018 = vmatpush1.bf16.msra.mxu0 %v4017_v63  ;;  %v4033_v63 = vpack.c.bf16 %v2713_v31, %v2712_v58  ;;  %v4055_v58 = vpack.c.bf16 %v2707_v36, %v2706_v4  ;;  %v2744_v36 = vld [vmem:[%s8090_s5 + $0x1a0] sm:$0xff] }
 0x4a2   : > { %4019 = vmatprep.subr.bf16.mxu0 %v8291_v43  ;;  %v2318_v54 = vpop.permute.xlu0 %2317 }
 0x4a3   : > { %4034 = vmatprep.subr.bf16.mxu1 %v4033_v63 }
 0x4a4   : > { %4036 = vmatpush3.bf16.msra.mxu1 %v4035_v53 }
 0x4a5   : > { %4021 = vmatpush1.bf16.msra.mxu0 %v4020_v2  ;;  %v2313_v44 = vpop.permute.xlu1 %2312  ;;  %v2715_v2 = vld [vmem:[%s8090_s5 + $0xb8] sm:$0xff] }
 0x4a6   : > { %4022 = vmatprep.subr.bf16.mxu0 %v8291_v43  ;;  %v4037_v1 = vpack.c.bf16 %v2715_v2, %v2714_v21 }
 0x4a8   : > { %4038 = vmatprep.subr.bf16.mxu1 %v4037_v1 }
 0x4a9   : > { %4024 = vmatpush1.bf16.msra.mxu0 %v4023_v62  ;;  %v2698_v62 = vld [vmem:[%s8090_s5 + $0x30] sm:$0xff] }
 0x4aa   : > { %2527 = vmatprep.subr.mxu0 %v8293_v50 }
 0x4ad   : > { %3536 = vmatpush1.msk.msra.mxu0 %vm939_vm8, %v2273_v47  ;;  %v2716_v47 = vld [vmem:[%s8090_s5 + $0xc0] sm:$0xff]  ;;  %vm8295_vm8 = vmmov %vm8278_vm1 }
 0x4ae   : > { %2556 = vmatmul.mubr.f32.vlgmr.msra.gmra.mrb[8].mxu0 %v7239_v56 }
 0x4af   : > { %3538 = vmatprep.mubr.msk.f32.mxu0 %vm2320_vm2, %v7247_v40  ;;  %vm8297_vm2 = vmmov %vm8278_vm1 }
 0x4b2   : > { %2561 = vmatmul.mubr.f32.gmra.mrb[10].mxu0 %v2306_v13 }
 0x55b   : > { %v2403_v22 = vpop.f32.mrb[4].mxu0 }
 0x55c   : > { %v2405_v46 = vpop.f32.mrb[5].mxu0  ;;  %v7329_v14 = vadd.f32 %v2403_v22, %v2313_v44  ;;  %v2717_v22 = vld [vmem:[%s8090_s5 + $0xc8] sm:$0xff] }
 0x55d   : > { %v7327_v17 = vadd.f32 %v2405_v46, %v2313_v44  ;;  %v4041_v46 = vpack.c.bf16 %v2717_v22, %v2716_v47 }
 0x55e   : > { %v2566_v24 = vmax.f32 %v7329_v14, 0.0 }
 0x55f   : > { %v2409_v20 = vpop.f32.mrb[6].mxu0  ;;  %v2480_v10 = vpop.f32.mrb[4].mxu1  ;;  %v2567_v59 = vmax.f32 %v7327_v17, 0.0 }
 0x560   : > { %v7331_v38 = vadd.f32 %v2480_v10, %v2313_v44  ;;  %v2411_v27 = vpop.f32.mrb[7].mxu0  ;;  %v2482_v5 = vpop.f32.mrb[5].mxu1  ;;  %v7339_v6 = vadd.f32 %v2409_v20, %v2318_v54  ;;  %v2700_v20 = vld [vmem:[%s8090_s5 + $0x40] sm:$0xff]  ;;  %v2701_v10 = vld [vmem:[%s8090_s5 + $0x48] sm:$0xff] }
 0x561   : > { %v7333_v35 = vadd.f32 %v2482_v5, %v2313_v44  ;;  %v7337_v7 = vadd.f32 %v2411_v27, %v2318_v54  ;;  %v2718_v27 = vld [vmem:[%s8090_s5 + $0xd0] sm:$0xff]  ;;  %v2719_v5 = vld [vmem:[%s8090_s5 + $0xd8] sm:$0xff] }
 0x562   : > { %v2568_v33 = vmax.f32 %v7331_v38, 0.0  ;;  %v2571_v40 = vmax.f32 %v7339_v6, 0.0 }
 0x563   : > { %v2569_v28 = vmax.f32 %v7333_v35, 0.0  ;;  %v2486_v0 = vpop.f32.mrb[6].mxu1  ;;  %v2572_v56 = vmax.f32 %v7337_v7, 0.0  ;;  %v2757_v7 = vld [vmem:[%s8090_s5 + $0x208] sm:$0xff] }
 0x564   : > { %v4963_v45 = vpack.i.bf16 %v2568_v33, %v2567_v59  ;;  %v7347_v49 = vadd.f32 %v2486_v0, %v2318_v54  ;;  %v2488_v26 = vpop.f32.mrb[7].mxu1  ;;  %v4045_v0 = vpack.c.bf16 %v2719_v5, %v2718_v27 }
 0x565   : > { %v4968_v39 = vpack.i.bf16 %v2566_v24, %v2569_v28  ;;  %v7353_v29 = vadd.f32 %v2488_v26, %v2318_v54  ;;  %v2703_v26 = vld [vmem:[%s8090_s5 + $0x58] sm:$0xff] }
 0x566   : > { %v2573_v18 = vmax.f32 %v7347_v49, 0.0  ;;  %4964 = vrot.lane.b32.xlu1 %v4963_v45, %s8224_s28  ;;  %v2702_v45 = vld [vmem:[%s8090_s5 + $0x50] sm:$0xff] }
 0x567   : > { %v2574_v11 = vmax.f32 %v7353_v29, 0.0  ;;  %4969 = vrot.lane.b32.xlu0 %v4968_v39, %s8224_s28  ;;  %v4047_v39 = vpack.c.bf16 %v2703_v26, %v2702_v45  ;;  %v2758_v49 = vld [vmem:[%s8090_s5 + $0x210] sm:$0x1] }
 0x568   : > { %v4973_v8 = vpack.i.bf16 %v2573_v18, %v2572_v56 }
 0x569   : > { %v4978_v9 = vpack.i.bf16 %v2571_v40, %v2574_v11 }
 0x56a   : > { %4974 = vrot.lane.b32.xlu1 %v4973_v8, %s8224_s28  ;;  %v2720_v8 = vld [vmem:[%s8090_s5 + $0xe0] sm:$0xff] }
 0x56b   : > { %4979 = vrot.lane.b32.xlu0 %v4978_v9, %s8224_s28  ;;  %v2721_v9 = vld [vmem:[%s8090_s5 + $0xe8] sm:$0xff] }
 0x581   : > { %v2557_v25 = vpop.f32.mrb[8].mxu0 }
 0x582   : > { %v7371_v13 = vadd.f32 %v2557_v25, %v2313_v44  ;;  %v2559_v55 = vpop.f32.mrb[9].mxu0  ;;  %v4039_v44 = vpack.c.bf16 %v2699_v16, %v2698_v62  ;;  %v2704_v25 = vld [vmem:[%s8090_s5 + $0x60] sm:$0xff] }
 0x583   : > { %v4049_v55 = vpack.c.bf16 %v2721_v9, %v2720_v8  ;;  %v4051_v15 = vpack.c.bf16 %v2705_v42, %v2704_v25 }
 0x584   : > { %v2570_v37 = vmax.f32 %v7371_v13, 0.0  ;;  %4040 = vmatpush3.bf16.msra.mxu1 %v4039_v44 }
 0x585   : > { %v2562_v19 = vpop.f32.mrb[10].mxu0  ;;  %4042 = vmatprep.subr.bf16.mxu1 %v4041_v46  ;;  %v2756_v46 = vld [vmem:[%s8090_s5 + $0x200] sm:$0xff] }
 0x586   : > { %v7404_v34 = vadd.f32 %v2562_v19, %v2318_v54  ;;  %2594 = vrot.lane.b32.xlu1 %v2570_v37, %s8224_s28  ;;  %v2564_v57 = vpop.f32.mrb[11].mxu0  ;;  %v4043_v54 = vpack.c.bf16 %v2701_v10, %v2700_v20 }
 0x587   : > { %v2740_v57 = vld [vmem:[%s8090_s5 + $0x180] sm:$0xff] }
 0x588   : > { %v2575_v48 = vmax.f32 %v7404_v34, 0.0  ;;  %4044 = vmatpush3.bf16.msra.mxu1 %v4043_v54  ;;  %v4057_v3 = vpack.c.bf16 %v2741_v61, %v2740_v57  ;;  %v2725_v34 = vld [vmem:[%s8090_s5 + $0x108] sm:$0xff]  ;;  %v2746_v61 = vld [vmem:[%s8090_s5 + $0x1b0] sm:$0xff] }
 0x589   : > { %4046 = vmatprep.subr.bf16.mxu1 %v4045_v0  ;;  %v2729_v57 = vld [vmem:[%s8090_s5 + $0x128] sm:$0xff] }
 0x58a   : > { %2604 = vrot.lane.b32.xlu0 %v2575_v48, %s8224_s28  ;;  %s3456_s28 = sshll.u32 %s405_s17, 4  ;;  %s8045_s28 = int_to_ptr.vmem [resolvable:$true] %s3456_s28 }
 0x58b   : > { %s5036_s1 = scalar_lea.vmem %s8045_s28, 16  ;;  %p5043_p0 = scmp.lt.s32.totalorder %s8045_s28, %s5041_s2 }
 0x58c   : > { %4048 = vmatpush3.bf16.msra.mxu1 %v4047_v39  ;;  %p5037_p11 = scmp.ne.s32.totalorder %s8045_s28, %s5036_s1  ;;  %p5044_p1 = scmp.lt.s32.totalorder %s5042_s3, %s5036_s1 }
 0x58d   : > { %4050 = vmatprep.subr.bf16.mxu1 %v4049_v55 }
 0x58e   : > { %p5038_p12 = pnand %p5037_p11, %p5231_p5  ;;  %p5045_p2 = por %p5044_p1, %p5043_p0 }
 0x590   : > { %4052 = vmatpush3.bf16.msra.mxu1 %v4051_v15  ;;  %p5039_p13 = pneg %p5038_p12 }
 0x591   : > { %4054 = vmatprep.subr.bf16.mxu1 %v4053_v30  ;;  %v2727_v30 = vld [vmem:[%s8090_s5 + $0x118] sm:$0xff] }
 0x592   : > { %p5046_p3 = pnand %p5045_p2, %p5039_p13 }
 0x594   : > { %4056 = vmatpush3.bf16.msra.mxu1 %v4055_v58 }
 0x595   : > { %4058 = vmatprep.subr.bf16.mxu1 %v4057_v3 }
 0x5d8   : > { %v4965_v23 = vpop.permute.xlu1 %4964 }
 0x5d9   : > { %v4967_v12 = vunpack.i.h.bf16 %v4965_v23  ;;  %v4966_v52 = vunpack.i.l.bf16 %v4965_v23  ;;  %v4970_v60 = vpop.permute.xlu0 %4969  ;;  %v2726_v23 = vld [vmem:[%s8090_s5 + $0x110] sm:$0xff] }
 0x5da   : > { %v4972_v19 = vunpack.i.h.bf16 %v4970_v60  ;;  %v4971_v31 = vunpack.i.l.bf16 %v4970_v60  ;;  %v4063_v58 = vpack.c.bf16 %v2727_v30, %v2726_v23 }
 0x5db   : > { %v2607_v63 = vsel %vm8294_vm5, %v4966_v52, %v4967_v12 }
 0x5dc   : > { %v7488_v51 = vmax.f32 %v2567_v59, %v2607_v63  ;;  %v2606_v21 = vsel %vm8295_vm8, %v4972_v19, %v4966_v52  ;;  %v2608_v2 = vsel %vm8296_vm11, %v4967_v12, %v4971_v31  ;;  %v4975_v53 = vpop.permute.xlu1 %4974  ;;  %v2745_v12 = vld [vmem:[%s8090_s5 + $0x1a8] sm:$0xff]  ;;  %v2747_v63 = vld [vmem:[%s8090_s5 + $0x1b8] sm:$0xff] }
 0x5dd   : > { %v2624_v1 = vmax.f32 %v2566_v24, %v2606_v21  ;;  %v7496_v62 = vmax.f32 %v2568_v33, %v2608_v2  ;;  %v4977_v16 = vunpack.i.h.bf16 %v4975_v53  ;;  %v4976_v47 = vunpack.i.l.bf16 %v4975_v53  ;;  %v4980_v22 = vpop.permute.xlu0 %4979  ;;  %v2730_v21 = vld [vmem:[%s8090_s5 + $0x130] sm:$0xff]  ;;  %v2731_v2 = vld [vmem:[%s8090_s5 + $0x138] sm:$0xff]  ;;  %v2748_v53 = vld [vmem:[%s8090_s5 + $0x1c0] sm:$0xff] }
 0x5de   : > { %v4981_v44 = vunpack.i.l.bf16 %v4980_v22  ;;  %v4982_v20 = vunpack.i.h.bf16 %v4980_v22  ;;  %v4065_v19 = vpack.c.bf16 %v2745_v12, %v2744_v36  ;;  %v2732_v22 = vld [vmem:[%s8090_s5 + $0x140] sm:$0xff] }
 0x5df   : > { %v2611_v17 = vsel %vm8297_vm2, %v4976_v47, %v4977_v16  ;;  %2644 = vrot.lane.b32.xlu0 %v2624_v1, %s8298_s15  ;;  %v4983_v59 = vpack.i.bf16 %v7496_v62, %v7488_v51 }
 0x5e0   : > { %v2630_v14 = vmax.f32 %v2572_v56, %v2611_v17  ;;  %v2612_v24 = vsel %vm8299_vm7, %v4977_v16, %v4981_v44  ;;  %v4089_v56 = vpack.c.bf16 %v2757_v7, %v2756_v46  ;;  %v4071_v16 = vpack.c.bf16 %v2731_v2, %v2730_v21  ;;  %v2750_v17 = vld [vmem:[%s8090_s5 + $0x1d0] sm:$0xff]  ;;  %v2735_v46 = vld [vmem:[%s8090_s5 + $0x158] sm:$0xff]  ;;  %v2752_v7 = vld [vmem:[%s8090_s5 + $0x1e0] sm:$0xff] }
 0x5e1   : > { %v7507_v38 = vmax.f32 %v2573_v18, %v2612_v24  ;;  %4984 = vrot.lane.b32.xlu1 %v4983_v59, %s8298_s15  ;;  %v2610_v18 = vsel %vm8278_vm1, %v4982_v20, %v4976_v47  ;;  %v2751_v59 = vld [vmem:[%s8090_s5 + $0x1d8] sm:$0xff]  ;;  %v3080_v2 = vld [vmem:[%s8091_s6 + $0xa0] sm:$0xff] }
 0x5e2   : > { %4090 = vmatprep.subr.bf16.mxu0 %v4089_v56  ;;  %v7535_v0 = vmax.f32 %v2571_v40, %v2610_v18  ;;  %v4077_v24 = vpack.c.bf16 %v2751_v59, %v2750_v17  ;;  %v2736_v18 = vld [vmem:[%s8090_s5 + $0x160] sm:$0xff]  ;;  %v3094_v59 = vld [vmem:[%s8091_s6 + $0x110] sm:$0xff] }
 0x5e3   : > { %v4988_v33 = vpack.i.bf16 %v7507_v38, %v2630_v14  ;;  %4092 = vmatpush3.bf16.msra.mxu0 %v4089_v56  ;;  %v2753_v56 = vld [vmem:[%s8090_s5 + $0x1e8] sm:$0xff] }
 0x5e4   : > { %3769 = vmatprep.subr.msk.mxu0 %vm947_vm3, %v2758_v49 }
 0x5e5   : > { %4989 = vrot.lane.b32.xlu1 %v4988_v33, %s8298_s15  ;;  %v2734_v33 = vld [vmem:[%s8090_s5 + $0x150] sm:$0xff] }
 0x5e6   : > { %v4079_v20 = vpack.c.bf16 %v2735_v46, %v2734_v33  ;;  %v3083_v46 = vld [vmem:[%s8091_s6 + $0xb8] sm:$0xff] }
 0x5e7   : > { %3770 = vmatpush3.msk.msra.mxu0 %vm947_vm3, %v2758_v49  ;;  %vm8301_vm3 = vmmov %vm8300_vm0  ;;  %v4081_v49 = vpack.c.bf16 %v2753_v56, %v2752_v7  ;;  %v3112_v56 = vld [vmem:[%s8091_s6 + $0x1a0] sm:$0xff] }
 0x5f8   : > { %v2595_v10 = vpop.permute.xlu1 %2594 }
 0x5f9   : > { %v2609_v27 = vsel %vm8300_vm0, %v4971_v31, %v2595_v10  ;;  %v7527_v5 = vmax.f32 %v2570_v37, %v2595_v10  ;;  %v2724_v37 = vld [vmem:[%s8090_s5 + $0x100] sm:$0xff]  ;;  %v2737_v10 = vld [vmem:[%s8090_s5 + $0x168] sm:$0xff] }
 0x5fa   : > { %v7531_v54 = vmax.f32 %v2569_v28, %v2609_v27  ;;  %v4059_v15 = vpack.c.bf16 %v2725_v34, %v2724_v37  ;;  %v2728_v31 = vld [vmem:[%s8090_s5 + $0x120] sm:$0xff] }
 0x5fb   : > { %2652 = vrot.lane.b32.xlu1 %v7527_v5, %s8298_s15  ;;  %v4067_v3 = vpack.c.bf16 %v2729_v57, %v2728_v31  ;;  %v3108_v31 = vld [vmem:[%s8091_s6 + $0x180] sm:$0xff]  ;;  %v3109_v57 = vld [vmem:[%s8091_s6 + $0x188] sm:$0xff] }
 0x5fc   : > { %v4993_v45 = vpack.i.bf16 %v7531_v54, %v7535_v0  ;;  %v2605_v26 = vpop.permute.xlu0 %2604 }
 0x5fd   : > { %v2613_v39 = vsel %vm8301_vm3, %v4981_v44, %v2605_v26  ;;  %v7544_v13 = vmax.f32 %v2575_v48, %v2605_v26  ;;  %v2743_v48 = vld [vmem:[%s8090_s5 + $0x198] sm:$0xff]  ;;  %v2733_v44 = vld [vmem:[%s8090_s5 + $0x148] sm:$0xff] }
 0x5fe   : > { %4994 = vrot.lane.b32.xlu0 %v4993_v45, %s8298_s15  ;;  %v7551_v35 = vmax.f32 %v2574_v11, %v2613_v39  ;;  %v2742_v11 = vld [vmem:[%s8090_s5 + $0x190] sm:$0xff]  ;;  %v2755_v26 = vld [vmem:[%s8090_s5 + $0x1f8] sm:$0xff] }
 0x5ff   : > { %2662 = vrot.lane.b32.xlu1 %v7544_v13, %s8298_s15  ;;  %v4061_v4 = vpack.c.bf16 %v2743_v48, %v2742_v11  ;;  %v2754_v45 = vld [vmem:[%s8090_s5 + $0x1f0] sm:$0xff]  ;;  %v2739_v11 = vld [vmem:[%s8090_s5 + $0x178] sm:$0xff] }
 0x600   : > { %v4085_v34 = vpack.c.bf16 %v2755_v26, %v2754_v45  ;;  %v3097_v26 = vld [vmem:[%s8091_s6 + $0x128] sm:$0xff] }
 0x602   : > { %2660 = vrot.lane.b32.xlu0 %v7551_v35, %s8298_s15 }
 0x651   : > { %v2645_v29 = vpop.permute.xlu0 %2644 }
 0x653   : > { %v7555_v6 = vpop.permute.xlu1 %4984 }
 0x654   : > { %v4987_v28 = vunpack.i.h.bf16 %v7555_v6  ;;  %v4986_v40 = vunpack.i.l.bf16 %v7555_v6  ;;  %v3076_v6 = vld [vmem:[%s8091_s6 + $0x80] sm:$0xff] }
 0x656   : > { %v2664_v8 = vsel %vm760_vm4, %v2645_v29, %v4986_v40  ;;  %v2665_v9 = vsel %vm760_vm4, %v4986_v40, %v4987_v28  ;;  %v4083_v40 = vpack.c.bf16 %v2737_v10, %v2736_v18  ;;  %v2738_v29 = vld [vmem:[%s8090_s5 + $0x170] sm:$0xff] }
 0x657   : > { %v2682_v25 = vmax.f32 %v2624_v1, %v2664_v8  ;;  %v7575_v55 = vpop.permute.xlu1 %4989  ;;  %v2683_v42 = vmax.f32 %v7488_v51, %v2665_v9  ;;  %v4069_v51 = vpack.c.bf16 %v2747_v63, %v2746_v61  ;;  %v2749_v1 = vld [vmem:[%s8090_s5 + $0x1c8] sm:$0xff]  ;;  %v3092_v61 = vld [vmem:[%s8091_s6 + $0x100] sm:$0xff]  ;;  %v3066_v10 = vld [vmem:[%s8091_s6 + $0x30] sm:$0xff] }
 0x658   : > { %v4992_v41 = vunpack.i.h.bf16 %v7575_v55  ;;  %v4991_v32 = vunpack.i.l.bf16 %v7575_v55  ;;  %v4073_v47 = vpack.c.bf16 %v2749_v1, %v2748_v53  ;;  %v3093_v63 = vld [vmem:[%s8091_s6 + $0x108] sm:$0xff]  ;;  %v3064_v1 = vld [vmem:[%s8091_s6 + $0x20] sm:$0xff] }
 0x659   : > { %2833 = vmatprep.mubr.f32.mxu1 %v2683_v42  ;;  %v4087_v42 = vpack.c.bf16 %v2739_v11, %v2738_v29  ;;  %v4127_v21 = vpack.c.bf16 %v3093_v63, %v3092_v61  ;;  %v3081_v53 = vld [vmem:[%s8091_s6 + $0xa8] sm:$0xff]  ;;  %v3115_v29 = vld [vmem:[%s8091_s6 + $0x1b8] sm:$0xff] }
 0x65a   : > { %2834 = vmatmul.mubr.f32.vlgmr.msra.gmra.mrb[8].mxu1 %v2682_v25  ;;  %v2669_v52 = vsel %vm760_vm4, %v4991_v32, %v4992_v41 }
 0x65b   : > { %4060 = vmatpush3.bf16.msra.mxu1 %v4059_v15  ;;  %v2688_v60 = vmax.f32 %v2630_v14, %v2669_v52  ;;  %v4075_v14 = vpack.c.bf16 %v2733_v44, %v2732_v22  ;;  %v3110_v22 = vld [vmem:[%s8091_s6 + $0x190] sm:$0xff]  ;;  %v3111_v44 = vld [vmem:[%s8091_s6 + $0x198] sm:$0xff] }
 0x65c   : > { %4062 = vmatprep.subr.bf16.mxu1 %v4061_v4  ;;  %v4129_v17 = vpack.c.bf16 %v3111_v44, %v3110_v22 }
 0x65d   : > { %2838 = vmatprep.mubr.f32.mxu1 %v2688_v60 }
 0x65f   : > { %4064 = vmatpush3.bf16.msra.mxu1 %v4063_v58  ;;  %v3062_v58 = vld [vmem:[%s8091_s6 + $0x10] sm:$0xff] }
 0x660   : > { %4066 = vmatprep.subr.bf16.mxu1 %v4065_v19  ;;  %v3063_v19 = vld [vmem:[%s8091_s6 + $0x18] sm:$0xff] }
 0x663   : > { %4068 = vmatpush3.bf16.msra.mxu1 %v4067_v3  ;;  %v4099_v3 = vpack.c.bf16 %v3063_v19, %v3062_v58 }
 0x664   : > { %4070 = vmatprep.subr.bf16.mxu1 %v4069_v51  ;;  %v4125_v51 = vpack.c.bf16 %v3109_v57, %v3108_v31 }
 0x667   : > { %4072 = vmatpush3.bf16.msra.mxu1 %v4071_v16  ;;  %v4101_v16 = vpack.c.bf16 %v3081_v53, %v3080_v2  ;;  %v3073_v53 = vld [vmem:[%s8091_s6 + $0x68] sm:$0xff] }
 0x668   : > { %4074 = vmatprep.subr.bf16.mxu1 %v4073_v47  ;;  %v3065_v47 = vld [vmem:[%s8091_s6 + $0x28] sm:$0xff] }
 0x669   : > { %v4103_v7 = vpack.c.bf16 %v3065_v47, %v3064_v1  ;;  %v3118_v1 = vld [vmem:[%s8091_s6 + $0x1d0] sm:$0xff] }
 0x66b   : > { %4076 = vmatpush3.bf16.msra.mxu1 %v4075_v14  ;;  %v3095_v14 = vld [vmem:[%s8091_s6 + $0x118] sm:$0xff] }
 0x66c   : > { %4078 = vmatprep.subr.bf16.mxu1 %v4077_v24  ;;  %v3082_v24 = vld [vmem:[%s8091_s6 + $0xb0] sm:$0xff]  ;;  %v4131_v33 = vpack.c.bf16 %v3095_v14, %v3094_v59  ;;  %v3103_v14 = vld [vmem:[%s8091_s6 + $0x158] sm:$0xff] }
 0x66d   : > { %v2653_v27 = vpop.permute.xlu1 %2652  ;;  %v4105_v18 = vpack.c.bf16 %v3083_v46, %v3082_v24  ;;  %v3102_v59 = vld [vmem:[%s8091_s6 + $0x150] sm:$0xff] }
 0x66e   : > { %v2686_v39 = vmax.f32 %v7527_v5, %v2653_v27  ;;  %v3090_v46 = vld [vmem:[%s8091_s6 + $0xf0] sm:$0xff] }
 0x66f   : > { %4080 = vmatpush3.bf16.msra.mxu1 %v4079_v20  ;;  %v3113_v20 = vld [vmem:[%s8091_s6 + $0x1a8] sm:$0xff] }
 0x670   : > { %v4995_v37 = vpop.permute.xlu0 %4994  ;;  %3771 = vmatprep.mubr.msk.f32.mxu0 %vm2759_vm15, %v2686_v39  ;;  %4082 = vmatprep.subr.bf16.mxu1 %v4081_v49  ;;  %v3096_v49 = vld [vmem:[%s8091_s6 + $0x120] sm:$0xff]  ;;  %v4133_v45 = vpack.c.bf16 %v3113_v20, %v3112_v56  ;;  %v3074_v56 = vld [vmem:[%s8091_s6 + $0x70] sm:$0xff] }
 0x671   : > { %v4997_v48 = vunpack.i.h.bf16 %v4995_v37  ;;  %v4996_v8 = vunpack.i.l.bf16 %v4995_v37  ;;  %v2663_v9 = vpop.permute.xlu1 %2662  ;;  %v3084_v39 = vld [vmem:[%s8091_s6 + $0xc0] sm:$0xff]  ;;  %v3114_v37 = vld [vmem:[%s8091_s6 + $0x1b0] sm:$0xff] }
 0x672   : > { %v2691_v5 = vmax.f32 %v7544_v13, %v2663_v9 }
 0x673   : > { %4084 = vmatpush3.bf16.msra.mxu1 %v4083_v40  ;;  %v2668_v25 = vsel %vm760_vm4, %v4996_v8, %v4991_v32  ;;  %v2667_v15 = vsel %vm760_vm4, %v4997_v48, %v2653_v27  ;;  %v2666_v13 = vsel %vm760_vm4, %v4987_v28, %v4997_v48  ;;  %v3077_v28 = vld [vmem:[%s8091_s6 + $0x88] sm:$0xff]  ;;  %v3067_v27 = vld [vmem:[%s8091_s6 + $0x38] sm:$0xff]  ;;  %v3068_v48 = vld [vmem:[%s8091_s6 + $0x40] sm:$0xff]  ;;  %v4137_v8 = vpack.c.bf16 %v3115_v29, %v3114_v37 }
 0x674   : > { %v2661_v4 = vpop.permute.xlu0 %2660  ;;  %3772 = vmatmul.mubr.msk.f32.vlgmr.msra.gmra.mrb[12].mxu0 %vm2759_vm15, %v2691_v5  ;;  %v2687_v23 = vmax.f32 %v7535_v0, %v2668_v25  ;;  %4086 = vmatprep.subr.bf16.mxu1 %v4085_v34  ;;  %v2685_v30 = vmax.f32 %v7531_v54, %v2667_v15  ;;  %v2684_v32 = vmax.f32 %v7496_v62, %v2666_v13  ;;  %v3060_v62 = vld [vmem:[%s8091_s6] sm:$0xff]  ;;  %v3085_v40 = vld [vmem:[%s8091_s6 + $0xc8] sm:$0xff]  ;;  %v3099_v5 = vld [vmem:[%s8091_s6 + $0x138] sm:$0xff] }
 0x675   : > { %v2671_v36 = vsel %vm760_vm4, %v2661_v4, %v2663_v9  ;;  %v2670_v12 = vsel %vm760_vm4, %v4992_v41, %v2661_v4  ;;  %v4093_v55 = vpack.c.bf16 %v3077_v28, %v3076_v6  ;;  %v3079_v41 = vld [vmem:[%s8091_s6 + $0x98] sm:$0xff]  ;;  %v4135_v34 = vpack.c.bf16 %v3097_v26, %v3096_v49  ;;  %v3098_v9 = vld [vmem:[%s8091_s6 + $0x130] sm:$0xff]  ;;  %v3116_v15 = vld [vmem:[%s8091_s6 + $0x1c0] sm:$0xff] }
 0x676   : > { %2839 = vmatmul.mubr.f32.gmra.mrb[10].mxu1 %v2687_v23  ;;  %v2690_v0 = vmax.f32 %v7551_v35, %v2671_v36  ;;  %v2689_v54 = vmax.f32 %v7507_v38, %v2670_v12  ;;  %v3061_v35 = vld [vmem:[%s8091_s6 + $0x8] sm:$0xff]  ;;  %v3078_v38 = vld [vmem:[%s8091_s6 + $0x90] sm:$0xff]  ;;  %v4107_v11 = vpack.c.bf16 %v3067_v27, %v3066_v10  ;;  %v4109_v25 = vpack.c.bf16 %v3085_v40, %v3084_v39  ;;  %v3100_v12 = vld [vmem:[%s8091_s6 + $0x140] sm:$0xff] }
 0x677   : > { %4088 = vmatpush3.bf16.msra.mxu1 %v4087_v42  ;;  %2908 = vmatprep.mubr.f32.mxu1 %v2685_v30  ;;  %v4095_v52 = vpack.c.bf16 %v3061_v35, %v3060_v62  ;;  %v4097_v60 = vpack.c.bf16 %v3079_v41, %v3078_v38  ;;  %v3069_v42 = vld [vmem:[%s8091_s6 + $0x48] sm:$0xff]  ;;  %v3086_v23 = vld [vmem:[%s8091_s6 + $0xd0] sm:$0xff]  ;;  %v3087_v30 = vld [vmem:[%s8091_s6 + $0xd8] sm:$0xff]  ;;  %v4139_v13 = vpack.c.bf16 %v3099_v5, %v3098_v9 }
 0x678   : > { %4094 = vmatprep.subr.bf16.mxu0 %v4093_v55  ;;  %4126 = vmatprep.subr.bf16.mxu1 %v4125_v51  ;;  %v3117_v4 = vld [vmem:[%s8091_s6 + $0x1c8] sm:$0xff]  ;;  %v4111_v36 = vpack.c.bf16 %v3069_v42, %v3068_v48  ;;  %v3070_v6 = vld [vmem:[%s8091_s6 + $0x50] sm:$0xff]  ;;  %v3071_v28 = vld [vmem:[%s8091_s6 + $0x58] sm:$0xff] }
 0x679   : > { %4096 = vmatpush3.bf16.msra.mxu0 %v4095_v52  ;;  %v4115_v55 = vpack.c.bf16 %v3071_v28, %v3070_v6  ;;  %v3089_v51 = vld [vmem:[%s8091_s6 + $0xe8] sm:$0xff]  ;;  %v3075_v10 = vld [vmem:[%s8091_s6 + $0x78] sm:$0xff]  ;;  %v3120_v27 = vld [vmem:[%s8091_s6 + $0x1e0] sm:$0xff] }
 0x67a   : > { %2909 = vmatmul.mubr.f32.vlgmr.msra.gmra.mrb[12].mxu1 %v2684_v32  ;;  %4098 = vmatprep.subr.bf16.mxu0 %v4097_v60  ;;  %v4141_v32 = vpack.c.bf16 %v3117_v4, %v3116_v15  ;;  %v4123_v26 = vpack.c.bf16 %v3075_v10, %v3074_v56  ;;  %v3104_v40 = vld [vmem:[%s8091_s6 + $0x160] sm:$0xff]  ;;  %v3105_v37 = vld [vmem:[%s8091_s6 + $0x168] sm:$0xff]  ;;  %v3122_v42 = vld [vmem:[%s8091_s6 + $0x1f0] sm:$0xff] }
 0x67b   : > { %2913 = vmatprep.mubr.f32.mxu1 %v2690_v0  ;;  %4128 = vmatpush3.bf16.msra.mxu1 %v4127_v21  ;;  %v3101_v0 = vld [vmem:[%s8091_s6 + $0x148] sm:$0xff]  ;;  %v3072_v21 = vld [vmem:[%s8091_s6 + $0x60] sm:$0xff]  ;;  %v4151_v9 = vpack.c.bf16 %v3105_v37, %v3104_v40  ;;  %v3123_v15 = vld [vmem:[%s8091_s6 + $0x1f8] sm:$0xff] }
 0x67c   : > { %4130 = vmatprep.subr.bf16.mxu1 %v4129_v17  ;;  %v4143_v62 = vpack.c.bf16 %v3101_v0, %v3100_v12  ;;  %v4119_v44 = vpack.c.bf16 %v3073_v53, %v3072_v21  ;;  %v3106_v4 = vld [vmem:[%s8091_s6 + $0x170] sm:$0xff]  ;;  %v3269_v56 = vld [vmem:[%s8093_s8 + $0x18] sm:$0xff] }
 0x67d   : > { %4100 = vmatpush3.bf16.msra.mxu0 %v4099_v3  ;;  %v3088_v3 = vld [vmem:[%s8091_s6 + $0xe0] sm:$0xff] }
 0x67e   : > { %2914 = vmatmul.mubr.f32.gmra.mrb[14].mxu1 %v2689_v54  ;;  %4102 = vmatprep.subr.bf16.mxu0 %v4101_v16  ;;  %v4113_v54 = vpack.c.bf16 %v3087_v30, %v3086_v23  ;;  %v4117_v2 = vpack.c.bf16 %v3089_v51, %v3088_v3  ;;  %v3119_v16 = vld [vmem:[%s8091_s6 + $0x1d8] sm:$0xff]  ;;  %v3266_v3 = vld [vmem:[%s8093_s8] sm:$0xff]  ;;  %v3267_v51 = vld [vmem:[%s8093_s8 + $0x8] sm:$0xff] }
 0x67f   : > { %4132 = vmatpush3.bf16.msra.mxu1 %v4131_v33  ;;  %v4145_v17 = vpack.c.bf16 %v3119_v16, %v3118_v1  ;;  %v4147_v33 = vpack.c.bf16 %v3103_v14, %v3102_v59 }
 0x680   : > { %4134 = vmatprep.subr.bf16.mxu1 %v4133_v45  ;;  %v3121_v45 = vld [vmem:[%s8091_s6 + $0x1e8] sm:$0xff] }
 0x681   : > { %4104 = vmatpush3.bf16.msra.mxu0 %v4103_v7  ;;  %v3091_v7 = vld [vmem:[%s8091_s6 + $0xf8] sm:$0xff]  ;;  %v4149_v39 = vpack.c.bf16 %v3121_v45, %v3120_v27 }
 0x682   : > { %4106 = vmatprep.subr.bf16.mxu0 %v4105_v18  ;;  %v4121_v18 = vpack.c.bf16 %v3091_v7, %v3090_v46  ;;  %v3268_v7 = vld [vmem:[%s8093_s8 + $0x10] sm:$0xff] }
 0x683   : > { %4136 = vmatpush3.bf16.msra.mxu1 %v4135_v34  ;;  %v4161_v40 = vpack.c.bf16 %v3269_v56, %v3268_v7  ;;  %v3369_v56 = vld [vmem:[%s8095_s10 + $0x78] sm:$0xff] }
 0x684   : > { %4138 = vmatprep.subr.bf16.mxu1 %v4137_v8 }
 0x685   : > { %4108 = vmatpush3.bf16.msra.mxu0 %v4107_v11 }
 0x686   : > { %4110 = vmatprep.subr.bf16.mxu0 %v4109_v25 }
 0x687   : > { %4140 = vmatpush3.bf16.msra.mxu1 %v4139_v13 }
 0x688   : > { %4142 = vmatprep.subr.bf16.mxu1 %v4141_v32  ;;  %v3107_v32 = vld [vmem:[%s8091_s6 + $0x178] sm:$0xff] }
 0x689   : > { %4112 = vmatpush3.bf16.msra.mxu0 %v4111_v36  ;;  %v4153_v36 = vpack.c.bf16 %v3123_v15, %v3122_v42  ;;  %v3274_v15 = vld [vmem:[%s8093_s8 + $0x40] sm:$0xff] }
 0x68a   : > { %4114 = vmatprep.subr.bf16.mxu0 %v4113_v54  ;;  %v4155_v54 = vpack.c.bf16 %v3107_v32, %v3106_v4  ;;  %v3275_v4 = vld [vmem:[%s8093_s8 + $0x48] sm:$0xff] }
 0x68b   : > { %4144 = vmatpush3.bf16.msra.mxu1 %v4143_v62  ;;  %v3279_v32 = vld [vmem:[%s8093_s8 + $0x68] sm:$0xff] }
 0x68c   : > { %4146 = vmatprep.subr.bf16.mxu1 %v4145_v17 }
 0x68d   : > { %4116 = vmatpush3.bf16.msra.mxu0 %v4115_v55 }
 0x68e   : > { %4118 = vmatprep.subr.bf16.mxu0 %v4117_v2 }
 0x68f   : > { %4148 = vmatpush3.bf16.msra.mxu1 %v4147_v33 }
 0x690   : > { %4150 = vmatprep.subr.bf16.mxu1 %v4149_v39 }
 0x691   : > { %4120 = vmatpush3.bf16.msra.mxu0 %v4119_v44 }
 0x692   : > { %4122 = vmatprep.subr.bf16.mxu0 %v4121_v18 }
 0x693   : > { %4152 = vmatpush3.bf16.msra.mxu1 %v4151_v9 }
 0x694   : > { %4154 = vmatprep.subr.bf16.mxu1 %v4153_v36  ;;  %v3278_v36 = vld [vmem:[%s8093_s8 + $0x60] sm:$0xff] }
 0x695   : > { %4124 = vmatpush3.bf16.msra.mxu0 %v4123_v26 }
 0x696   : > { %4157 = vmatprep.subr.bf16.mxu0 %v8291_v43 }
 0x697   : > { %4156 = vmatpush3.bf16.msra.mxu1 %v4155_v54  ;;  %v3281_v54 = vld [vmem:[%s8093_s8 + $0x78] sm:$0xff] }
 0x698   : > { %4181 = vmatprep.subr.bf16.mxu1 %v8291_v43 }
 0x72d   : > { %v3589_v35 = vpop.f32.mrb[8].mxu1 }
 0x72e   : > { %v3590_v38 = vpop.f32.mrb[9].mxu1 }
 0x72f   : > { %v3591_v41 = vadd.f32 %v3590_v38, %v3589_v35 }
 0x747   : > { %v3773_v52 = vpop.f32.mrb[12].mxu0 }
 0x748   : > { %v2985_v60 = vpop.f32.mrb[13].mxu0 }
 0x749   : > { %v3592_v58 = vpop.f32.mrb[10].mxu1 }
 0x74a   : > { %v3593_v19 = vpop.f32.mrb[11].mxu1 }
 0x74b   : > { %v3594_v31 = vadd.f32 %v3593_v19, %v3592_v58 }
 0x74d   : > { %v3627_v57 = vpop.f32.mrb[12].mxu1 }
 0x74e   : > { %v3628_v61 = vpop.f32.mrb[13].mxu1 }
 0x74f   : > { %v3629_v63 = vadd.f32 %v3628_v61, %v3627_v57 }
 0x751   : > { %v2911_v47 = vadd.f32 %v3629_v63, %v3591_v41  ;;  %v3630_v22 = vpop.f32.mrb[14].mxu1 }
 0x752   : > { %v3631_v24 = vpop.f32.mrb[15].mxu1 }
 0x753   : > { %v7848_v20 = vadd.f32 %v2985_v60, %v2911_v47  ;;  %v3632_v49 = vadd.f32 %v3631_v24, %v3630_v22  ;;  %v4158_v22 = vpack.c.bf16 %v3267_v51, %v3266_v3  ;;  %v3364_v51 = vld [vmem:[%s8095_s10 + $0x50] sm:$0xff] }
 0x755   : > { %v2916_v34 = vadd.f32 %v3632_v49, %v3594_v31  ;;  %v2999_v29 = vrot.slane %v7848_v20, 2  ;;  %v3013_v11 = vrot.slane %v7848_v20, 6  ;;  %v2995_v48 = vrot.slane %v7848_v20, 1 }
 0x756   : > { %v3009_v8 = vrot.slane %v7848_v20, 5  ;;  %v3003_v30 = vrot.slane %v7848_v20, 3  ;;  %v3017_v13 = vrot.slane %v7848_v20, 7  ;;  %v3007_v57 = vrot.slane %v7848_v20, 4 }
 0x757   : > { %v7869_v5 = vadd.f32 %v3773_v52, %v2916_v34  ;;  %v5003_v25 = vpack.i.bf16 %v2999_v29, %v3013_v11  ;;  %v3270_v29 = vld [vmem:[%s8093_s8 + $0x20] sm:$0xff]  ;;  %v3271_v11 = vld [vmem:[%s8093_s8 + $0x28] sm:$0xff] }
 0x758   : > { %v4998_v23 = vpack.i.bf16 %v2995_v48, %v3009_v8  ;;  %v5008_v55 = vpack.i.bf16 %v3003_v30, %v3017_v13  ;;  %v4164_v9 = vpack.c.bf16 %v3271_v11, %v3270_v29  ;;  %v3277_v30 = vld [vmem:[%s8093_s8 + $0x58] sm:$0xff] }
 0x759   : > { %5004 = vrot.lane.b32.xlu1 %v5003_v25, %s8298_s15  ;;  %v3022_v12 = vrot.slane %v7869_v5, 1  ;;  %v3036_v0 = vrot.slane %v7869_v5, 5  ;;  %v3030_v28 = vrot.slane %v7869_v5, 3  ;;  %v3044_v62 = vrot.slane %v7869_v5, 7  ;;  %v3273_v25 = vld [vmem:[%s8093_s8 + $0x38] sm:$0xff] }
 0x75a   : > { %4999 = vrot.lane.b32.xlu0 %v4998_v23, %s8302_s29  ;;  %v3026_v35 = vrot.slane %v7869_v5, 2  ;;  %v3040_v38 = vrot.slane %v7869_v5, 6  ;;  %v3034_v10 = vrot.slane %v7869_v5, 4  ;;  %v4170_v23 = vpack.c.bf16 %v3275_v4, %v3274_v15 }
 0x75b   : > { %v5013_v6 = vpack.i.bf16 %v3022_v12, %v3036_v0  ;;  %v5023_v41 = vpack.i.bf16 %v3030_v28, %v3044_v62  ;;  %v3280_v12 = vld [vmem:[%s8093_s8 + $0x70] sm:$0xff]  ;;  %v4176_v0 = vpack.c.bf16 %v3279_v32, %v3278_v36  ;;  %v3355_v28 = vld [vmem:[%s8095_s10 + $0x8] sm:$0xff] }
 0x75c   : > { %v5018_v52 = vpack.i.bf16 %v3026_v35, %v3040_v38  ;;  %v3356_v62 = vld [vmem:[%s8095_s10 + $0x10] sm:$0xff]  ;;  %v3357_v38 = vld [vmem:[%s8095_s10 + $0x18] sm:$0xff] }
 0x75d   : > { %5014 = vrot.lane.b32.xlu1 %v5013_v6, %s8302_s29  ;;  %v3354_v6 = vld [vmem:[%s8095_s10] sm:$0xff]  ;;  %s3444_s29 = scalar_lea.sflag [#allocation3], %s404_s18 }
 0x75e   : > { %5009 = vrot.lane.b32.xlu0 %v5008_v55, %s8210_s16  ;;  %v4179_v55 = vpack.c.bf16 %v3281_v54, %v3280_v12  ;;  %v4182_v35 = vpack.c.bf16 %v3355_v28, %v3354_v6 }
 0x761   : > { %5024 = vrot.lane.b32.xlu1 %v5023_v41, %s8210_s16  ;;  %v4185_v41 = vpack.c.bf16 %v3357_v38, %v3356_v62 }
 0x762   : > { %5019 = vrot.lane.b32.xlu0 %v5018_v52, %s8298_s15  ;;  %v3358_v52 = vld [vmem:[%s8095_s10 + $0x20] sm:$0xff] }
 0x7cb   : > { %v5005_v60 = vpop.permute.xlu1 %5004 }
 0x7cc   : > { %v5000_v58 = vpop.permute.xlu0 %4999  ;;  %v5007_v61 = vunpack.i.h.bf16 %v5005_v60  ;;  %v5006_v63 = vunpack.i.l.bf16 %v5005_v60  ;;  %v3359_v60 = vld [vmem:[%s8095_s10 + $0x28] sm:$0xff] }
 0x7cd   : > { %v5002_v19 = vunpack.i.h.bf16 %v5000_v58  ;;  %v5001_v31 = vunpack.i.l.bf16 %v5000_v58  ;;  %v4188_v58 = vpack.c.bf16 %v3359_v60, %v3358_v52 }
 0x7cf   : > { %v3048_v21 = vsel %vm916_vm6, %v7848_v20, %v5002_v19  ;;  %v5015_v2 = vpop.permute.xlu1 %5014  ;;  %v3051_v53 = vsel %vm916_vm6, %v3007_v57, %v5001_v31  ;;  %v3360_v19 = vld [vmem:[%s8095_s10 + $0x30] sm:$0xff]  ;;  %v3361_v31 = vld [vmem:[%s8095_s10 + $0x38] sm:$0xff] }
 0x7d0   : > { %v5010_v1 = vpop.permute.xlu0 %5009  ;;  %v5017_v44 = vunpack.i.h.bf16 %v5015_v2  ;;  %v5016_v17 = vunpack.i.l.bf16 %v5015_v2  ;;  %v3052_v59 = vsel %vm760_vm4, %v3051_v53, %v5006_v63  ;;  %v3049_v14 = vsel %vm760_vm4, %v3048_v21, %v5007_v61  ;;  %v3362_v61 = vld [vmem:[%s8095_s10 + $0x40] sm:$0xff]  ;;  %v3363_v63 = vld [vmem:[%s8095_s10 + $0x48] sm:$0xff]  ;;  %v3365_v21 = vld [vmem:[%s8095_s10 + $0x58] sm:$0xff] }
 0x7d1   : > { %v5012_v16 = vunpack.i.h.bf16 %v5010_v1  ;;  %v5011_v47 = vunpack.i.l.bf16 %v5010_v1  ;;  %v4191_v57 = vpack.c.bf16 %v3361_v31, %v3360_v19  ;;  %v4194_v3 = vpack.c.bf16 %v3363_v63, %v3362_v61  ;;  %v3366_v53 = vld [vmem:[%s8095_s10 + $0x60] sm:$0xff]  ;;  %v3367_v1 = vld [vmem:[%s8095_s10 + $0x68] sm:$0xff] }
 0x7d2   : > { %v3054_v26 = vsel %vm916_vm6, %v7869_v5, %v5017_v44  ;;  %v3057_v39 = vsel %vm916_vm6, %v3034_v10, %v5016_v17  ;;  %vm8306_vm6 = vmmov %vm8303_vm9  ;;  %v3272_v5 = vld [vmem:[%s8093_s8 + $0x30] sm:$0xff]  ;;  %v4197_v2 = vpack.c.bf16 %v3365_v21, %v3364_v51  ;;  %v3124_v17 = vld [vmem:[%s8092_s7] sm:$0x1] }
 0x7d3   : > { %v5025_v24 = vpop.permute.xlu1 %5024  ;;  %v3053_v33 = vsel %vm8303_vm9, %v3052_v59, %v5011_v47  ;;  %v3050_v46 = vsel %vm8304_vm12, %v3049_v14, %v5012_v16  ;;  %vm8307_vm10 = vmmov %vm8306_vm6  ;;  %v4167_v42 = vpack.c.bf16 %v3273_v25, %v3272_v5  ;;  %v4200_v16 = vpack.c.bf16 %v3367_v1, %v3366_v53 }
 0x7d4   : > { %v5027_v20 = vunpack.i.h.bf16 %v5025_v24  ;;  %v5026_v49 = vunpack.i.l.bf16 %v5025_v24  ;;  %v5020_v18 = vpop.permute.xlu0 %5019  ;;  %3189 = vmatprep.mubr.f32.mxu0 %v3053_v33 }
 0x7d5   : > { %v5022_v27 = vunpack.i.h.bf16 %v5020_v18  ;;  %v5021_v45 = vunpack.i.l.bf16 %v5020_v18  ;;  %3190 = vmatmul.mubr.f32.vlgmr.msra.gmra.mrb[14].mxu0 %v3050_v46 }
 0x7d6   : > { %4159 = vmatpush3.bf16.msra.mxu0 %v4158_v22  ;;  %3806 = vmatprep.mubr.msk.f32.mxu0 %vm8305_vm14, %v8293_v50 }
 0x7d7   : > { %v3055_v37 = vsel %vm760_vm4, %v3054_v26, %v5022_v27  ;;  %v3058_v34 = vsel %vm760_vm4, %v3057_v39, %v5021_v45  ;;  %4160 = vmatprep.subr.bf16.mxu0 %v8291_v43  ;;  %v3370_v26 = vld [vmem:[%s8096_s11] sm:$0x1]  ;;  %vm3441_vm4 = vcmask 73728  }
 0x7d8   : > { %v3059_v48 = vsel %vm8306_vm6, %v3058_v34, %v5026_v49  ;;  %v3056_v8 = vsel %vm8307_vm10, %v3055_v37, %v5027_v20  ;;  %v3282_v49 = vld [vmem:[%s8094_s9] sm:$0x1] }
 0x7d9   : > { %3259 = vmatprep.mubr.f32.mxu1 %v3059_v48 }
 0x7da   : > { %3260 = vmatmul.mubr.f32.vlgmr.msra.gmra.mrb[16].mxu1 %v3056_v8  ;;  %4162 = vmatpush3.bf16.msra.mxu0 %v4161_v40 }
 0x7db   : > { %4163 = vmatprep.subr.bf16.mxu0 %v8291_v43  ;;  %3841 = vmatprep.mubr.msk.f32.mxu1 %vm8305_vm14, %v8293_v50  ;;  %v3276_v50 = vld [vmem:[%s8093_s8 + $0x50] sm:$0xff] }
 0x7dc   : > { %v4173_v13 = vpack.c.bf16 %v3277_v30, %v3276_v50  ;;  %4183 = vmatpush3.bf16.msra.mxu1 %v4182_v35 }
 0x7dd   : > { %4184 = vmatprep.subr.bf16.mxu1 %v8291_v43 }
 0x7de   : > { %4165 = vmatpush3.bf16.msra.mxu0 %v4164_v9 }
 0x7df   : > { %4166 = vmatprep.subr.bf16.mxu0 %v8291_v43 }
 0x7e0   : > { %4186 = vmatpush3.bf16.msra.mxu1 %v4185_v41 }
 0x7e1   : > { %4187 = vmatprep.subr.bf16.mxu1 %v8291_v43 }
 0x7e2   : > { %4168 = vmatpush3.bf16.msra.mxu0 %v4167_v42 }
 0x7e3   : > { %4169 = vmatprep.subr.bf16.mxu0 %v8291_v43 }
 0x7e4   : > { %4189 = vmatpush3.bf16.msra.mxu1 %v4188_v58 }
 0x7e5   : > { %4190 = vmatprep.subr.bf16.mxu1 %v8291_v43 }
 0x7e6   : > { %4171 = vmatpush3.bf16.msra.mxu0 %v4170_v23 }
 0x7e7   : > { %4172 = vmatprep.subr.bf16.mxu0 %v8291_v43 }
 0x7e8   : > { %4192 = vmatpush3.bf16.msra.mxu1 %v4191_v57 }
 0x7e9   : > { %4193 = vmatprep.subr.bf16.mxu1 %v8291_v43 }
 0x7ea   : > { %4174 = vmatpush3.bf16.msra.mxu0 %v4173_v13 }
 0x7eb   : > { %4175 = vmatprep.subr.bf16.mxu0 %v8291_v43 }
 0x7ec   : > { %4195 = vmatpush3.bf16.msra.mxu1 %v4194_v3 }
 0x7ed   : > { %4196 = vmatprep.subr.bf16.mxu1 %v8291_v43 }
 0x7ee   : > { %4177 = vmatpush3.bf16.msra.mxu0 %v4176_v0 }
 0x7ef   : > { %4178 = vmatprep.subr.bf16.mxu0 %v8291_v43 }
 0x7f0   : > { %4198 = vmatpush3.bf16.msra.mxu1 %v4197_v2 }
 0x7f1   : > { %4199 = vmatprep.subr.bf16.mxu1 %v8291_v43 }
 0x7f2   : > { %4180 = vmatpush3.bf16.msra.mxu0 %v4179_v55 }
 0x7f4   : > { %4201 = vmatpush3.bf16.msra.mxu1 %v4200_v16 }
 0x7f5   : > { %4202 = vmatprep.subr.bf16.mxu1 %v8291_v43  ;;  %v3368_v43 = vld [vmem:[%s8095_s10 + $0x70] sm:$0xff] }
 0x7f6   : > { %v4203_v20 = vpack.c.bf16 %v3369_v56, %v3368_v43 }
 0x7f8   : > { %4204 = vmatpush3.bf16.msra.mxu1 %v4203_v20 }
 0x8a8   : > { %v3670_v47 = vpop.f32.mrb[14].mxu0 }
 0x8a9   : > { %v3671_v22 = vpop.f32.mrb[15].mxu0 }
 0x8aa   : > { %v3672_v44 = vadd.f32 %v3671_v22, %v3670_v47 }
 0x8ac   : > { %v3192_v24 = vadd.f32 %v3672_v44, %v3124_v17 }
 0x8ad   : > { %v3705_v59 = vpop.f32.mrb[16].mxu1 }
 0x8ae   : > { %v3706_v14 = vpop.f32.mrb[17].mxu1 }
 0x8af   : > { %v3707_v33 = vadd.f32 %v3706_v14, %v3705_v59 }
 0x8b1   : > { %v3262_v46 = vadd.f32 %v3707_v33, %v3192_v24 }
 0x8b3   : > { %v3265_v7 = vmax.f32 %v3262_v46, 0.0 }
 0x8b5   : > { %3807 = vmatmul.mubr.f32.vlgmr.msra.gmra.mrb[16].mxu0 %v3265_v7 }
 0x988   : > { %v3349_v18 = vpop.f32.mrb[16].mxu0 }
 0x989   : > { %v3350_v10 = vadd.f32 %v3349_v18, %v3282_v49  ;;  %v3808_v27 = vpop.f32.mrb[17].mxu0 }
 0x98b   : > { %v3353_v45 = vmax.f32 %v3350_v10, 0.0 }
 0x98d   : > { %3842 = vmatmul.mubr.f32.vlgmr.msra.gmra.mrb[18].mxu1 %v3353_v45 }
 0xa60   : > { %v3437_v39 = vpop.f32.mrb[18].mxu1 }
 0xa61   : > { %v3438_v40 = vadd.f32 %v3437_v39, %v3370_v26  ;;  %v3843_v37 = vpop.f32.mrb[19].mxu1 }
 0xa63   : > { %3442 = vst.msk [vmem:[%s405_s17] sm:$0x1] %vm3441_vm4, %v3438_v40 }
 0xa64   : > { %5049 = shalt.err (!%p5046_p3)
}
 0xa65   : > { %s5050_s18 = scalar_lea.hbm %s8043_s0, 16  ;;  %s5054_s19 = scalar_lea.hbm %s8097_s12, 64 }
 0xa66   : > { %p5051_p4 = scmp.ne.s32.totalorder %s8043_s0, %s5050_s18  ;;  %p5055_p9 = scmp.lt.u32.totalorder %s8043_s0, %s8097_s12 }
 0xa67   : > { %p5056_p10 = scmp.lt.u32.totalorder %s5054_s19, %s5050_s18  ;;  %p5058_p12 = scmp.lt.u32.totalorder %s5050_s18, %s8043_s0 }
 0xa68   : > { %p5052_p7 = pnand %p5051_p4, %p5231_p5 }
 0xa69   : > { %p5057_p11 = por %p5056_p10, %p5055_p9 }
 0xa6a   : > { %p5053_p8 = pneg %p5052_p7 }
 0xa6b   : > { %p5059_p13 = por %p5058_p12, %p5057_p11 }
 0xa6d   : > { %p5060_p0 = pnand %p5059_p13, %p5053_p8 }
 0xa6f   : > { %5063 = shalt.err (!%p5060_p0)
}
 0xa70   : > { %4205 = dma.vmem_to_hbm [thread:$0]  (%p5231_p5), %s8045_s28, 16, %s8043_s0, %s3444_s29  }
 0xa71 PF: > { %p4211_p1 = scmp.ge.s32.totalorder %s5098_s24, 2  ;;  %s3468_s26 = sand.u32 1, %s5086_s21  }
 0xa72   : > { %s3469_s1 = scalar_lea.sflag [#allocation3], %s3468_s26 }
 0xa73   : > { %p4208_p2 = pnand %p4211_p1, %p5235_p6 }
 0xa75   : > { %5081 = dma.done.wait (!%p4208_p2), %s3469_s1, 16  }
 0xa76   : > { %5083 = vsyncadd (!%p4208_p2), %s3469_s1, 4294967280  ;;  %p22_p3 = scmp.ge.s32.totalorder %s5218_s27, 6   ;;  %s8308_s21 = smov %s5090_s22 }
 0xa77   : > { %s8309_s22 = smov %s5094_s23  ;;  %s8310_s23 = smov %s5229_s30 }
 0xa78   : > { %s8311_s24 = smov %s5218_s27  ;;  %24 = sbr.rel (!%p22_p3) target bundleno = 8 (0x8), region = 103 }
 0xa7f   :  { %3473 = vsyncpa [#allocation3], 1 }
 0xa80   :  { %3475 = vsyncpa [#allocation3 + $0x1], 1 }

</bundles_post_ra>
